<compile_context>
chip_gen: v5e
topology: v5e:2x2
jax: 0.10.0
libtpu: 0.0.40
codegen_flags: <defaults>
</compile_context>

<pallas_src>
import functools

import jax
import jax.numpy as jnp
from jax.experimental import pallas as pl
from jax.experimental.pallas import tpu as pltpu

EPS = 1e-3


def fused_kernel(x_ref, w1_ref, g1_ref, b1_ref, w2_ref, g2_ref, b2_ref,
                 mask_ref, out_ref, *, W):
    # x_ref   : [Cin, M]        f32    (M = N*H*W, pixel (n,y,x) flattened in lanes)
    # w1_ref  : [Cmid, Cin]     bf16
    # g1/b1   : [Cmid, 1]       f32
    # w2_ref  : [Cout, 9*Cmid]  bf16   (row k = (ky*3+kx)*Cmid + ci)
    # g2/b2   : [Cout, 1]       f32
    # mask_ref: [9, M]          bf16   (per-tap border validity, 0/1)
    # out_ref : [Cout, M]       f32    (lane-dense output)
    Cin, M = x_ref.shape
    Cmid = w1_ref.shape[0]
    inv_m = 1.0 / M

    # ---- Conv1 (1x1): bf16 cast happens here (not in the wrapper) ----
    xb = x_ref[...].astype(jnp.bfloat16)
    y1 = jnp.dot(w1_ref[...], xb, preferred_element_type=jnp.float32)

    # ---- BatchNorm1 (batch stats, biased var; single pass) + ReLU ----
    s1 = jnp.sum(y1, axis=1, keepdims=True)
    q1 = jnp.sum(y1 * y1, axis=1, keepdims=True)
    mean1 = s1 * inv_m
    var1 = q1 * inv_m - mean1 * mean1
    scale1 = jax.lax.rsqrt(var1 + EPS) * g1_ref[...]
    y1 = jnp.maximum((y1 - mean1) * scale1 + b1_ref[...], 0.0)
    y1b = y1.astype(jnp.bfloat16)

    # ---- im2col for the 3x3 / pad=1 conv, fully lane-dense ----
    # Output pixel m = n*H*W + y*W + x needs source pixel m + (ky-1)*W + (kx-1)
    # (zero outside the image).  Each tap is a static lane shift of y1b; the
    # precomputed per-tap mask zeroes every lane whose source pixel lies
    # outside its own image (borders and, for N > 1, neighbouring images).
    pad = W + 1
    zpad = jnp.zeros((Cmid, pad), jnp.bfloat16)
    ypad = jnp.concatenate([zpad, y1b, zpad], axis=1)        # [Cmid, M + 2W + 2]

    taps = []
    for ky in range(3):
        for kx in range(3):
            t = ky * 3 + kx
            s = (ky - 1) * W + (kx - 1)
            tap = ypad[:, pad + s:pad + s + M]               # [Cmid, M]
            if t != 4:                                       # centre tap needs no mask
                tap = tap * mask_ref[t:t + 1, :]
            taps.append(tap)
    patches = jnp.concatenate(taps, axis=0)                  # [9*Cmid, M] bf16

    # ---- Conv2 (3x3, pad=1): one MXU matmul [Cout,144] @ [144,M] -> f32 ----
    y2 = jnp.dot(w2_ref[...], patches, preferred_element_type=jnp.float32)

    # ---- BatchNorm2 (batch stats, biased var; single pass), no ReLU ----
    s2 = jnp.sum(y2, axis=1, keepdims=True)
    q2 = jnp.sum(y2 * y2, axis=1, keepdims=True)
    mean2 = s2 * inv_m
    var2 = q2 * inv_m - mean2 * mean2
    scale2 = jax.lax.rsqrt(var2 + EPS) * g2_ref[...]
    out_ref[...] = (y2 - mean2) * scale2 + b2_ref[...]


@jax.jit
def model_forward(x_nchw, params):
    """x_nchw: [N, 192, H, W] f32 (PyTorch layout). Returns [N, 32, H, W] f32."""
    w1, g1, b1, w2, g2, b2 = params           # PyTorch shapes: [16,192,1,1], [32,16,3,3]
    N, Cin, H, W = x_nchw.shape
    Cmid, Cout = w1.shape[0], w2.shape[0]
    M = N * H * W

    # x stays f32 (cast to bf16 inside the kernel).  For N == 1 the layout
    # change is a free reshape; for N > 1 it is a real transpose (see note).
    if N == 1:
        xT = x_nchw.reshape(Cin, M)
    else:
        xT = jnp.transpose(x_nchw, (1, 0, 2, 3)).reshape(Cin, M)

    w1m = w1.reshape(Cmid, Cin).astype(jnp.bfloat16)
    # im2col weight row k = (ky*3 + kx)*Cmid + ci  <->  w2[co, ci, ky, kx]
    w2m = jnp.transpose(w2, (0, 2, 3, 1)).reshape(Cout, 9 * Cmid).astype(jnp.bfloat16)

    # Per-tap border masks.  Everything here depends only on static shapes, so
    # XLA constant-folds it; the kernel just DMAs ~9*M*2 bytes of constants and
    # avoids integer div/mod on the VALU.
    m_idx = jnp.arange(M, dtype=jnp.int32)
    yc = (m_idx // W) % H
    xc = m_idx % W
    rows = []
    for ky in range(3):
        for kx in range(3):
            v = jnp.ones((M,), jnp.float32)
            if ky == 0:
                v = v * (yc >= 1)
            if ky == 2:
                v = v * (yc <= H - 2)
            if kx == 0:
                v = v * (xc >= 1)
            if kx == 2:
                v = v * (xc <= W - 2)
            rows.append(v)
    tap_mask = jnp.stack(rows, axis=0).astype(jnp.bfloat16)   # [9, M]

    # VMEM budget derived from resident buffers (no grid -> whole arrays live).
    resident = (Cin * M * 4                 # x f32
                + Cout * M * 4              # out f32
                + Cmid * M * (4 + 4 + 2)    # y1 f32 pre/post BN + y1b bf16
                + 2 * 9 * Cmid * M * 2      # taps + patches bf16
                + Cout * M * 4              # y2 f32
                + 9 * M * 2                 # masks
                + (Cin * Cmid + 9 * Cmid * Cout) * 2 + (Cmid + Cout) * 8)
    vmem_limit = int(min(max(2 * resident, 16 << 20), 100 << 20))

    flops = 2 * M * Cin * Cmid + 2 * M * (9 * Cmid) * Cout
    bytes_accessed = (Cin * M * 4 + Cout * M * 4 + 9 * M * 2
                      + (Cin * Cmid + 9 * Cmid * Cout) * 2 + (Cmid + Cout) * 8)

    outT = pl.pallas_call(
        functools.partial(fused_kernel, W=W),
        out_shape=jax.ShapeDtypeStruct((Cout, M), jnp.float32),
        in_specs=[pl.BlockSpec(memory_space=pltpu.MemorySpace.VMEM)] * 8,
        out_specs=pl.BlockSpec(memory_space=pltpu.MemorySpace.VMEM),
        compiler_params=pltpu.CompilerParams(vmem_limit_bytes=vmem_limit),
        cost_estimate=pl.CostEstimate(flops=int(flops),
                                      transcendentals=2 * (Cmid + Cout),
                                      bytes_accessed=int(bytes_accessed)),
    )(xT, w1m,
      g1.reshape(Cmid, 1).astype(jnp.float32),
      b1.reshape(Cmid, 1).astype(jnp.float32),
      w2m,
      g2.reshape(Cout, 1).astype(jnp.float32),
      b2.reshape(Cout, 1).astype(jnp.float32),
      tap_mask)

    # Scaling plan for large N*H*W (corrected per review): a pixel-block grid
    # can NOT be ("parallel",) with per-block BN -- that computes per-tile
    # statistics.  Correct structure: phase 1 runs an "arbitrary" grid axis
    # over pixel blocks accumulating (sum, sum_sq) for BN1/BN2 in VMEM/SMEM
    # scratch while writing un-normalized y2 blocks to HBM; phase 2 (a second
    # grid axis or pallas_call, which may then be "parallel"/megacore-sharded
    # on v7x) applies the normalization.  Block sizes must be re-derived
    # against v7x's 64 MiB/TC VMEM (32 MiB scoped default), and for N > 1 the
    # natural [N, Cin, H*W] layout should be gridded over N to avoid the
    # wrapper transpose above.
    if N == 1:
        return outT.reshape(N, Cout, H, W)
    return jnp.transpose(outT.reshape(Cout, N, H, W), (1, 0, 2, 3))


def reference_forward(x_nchw, params):
    """Pure-JAX f32 reference matching PyTorch training-mode semantics."""
    w1, g1, b1, w2, g2, b2 = params
    y1 = jax.lax.conv_general_dilated(
        x_nchw, w1, window_strides=(1, 1), padding='VALID',
        dimension_numbers=('NCHW', 'OIHW', 'NCHW'))
    m1 = jnp.mean(y1, axis=(0, 2, 3), keepdims=True)
    v1 = jnp.mean(jnp.square(y1 - m1), axis=(0, 2, 3), keepdims=True)
    y1 = (y1 - m1) / jnp.sqrt(v1 + EPS) * g1.reshape(1, -1, 1, 1) + b1.reshape(1, -1, 1, 1)
    y1 = jnp.maximum(y1, 0.0)
    y2 = jax.lax.conv_general_dilated(
        y1, w2, window_strides=(1, 1), padding=((1, 1), (1, 1)),
        dimension_numbers=('NCHW', 'OIHW', 'NCHW'))
    m2 = jnp.mean(y2, axis=(0, 2, 3), keepdims=True)
    v2 = jnp.mean(jnp.square(y2 - m2), axis=(0, 2, 3), keepdims=True)
    return (y2 - m2) / jnp.sqrt(v2 + EPS) * g2.reshape(1, -1, 1, 1) + b2.reshape(1, -1, 1, 1)


def init_params(key):
    Cin, Cmid, Cout = 192, 16, 32
    k1, k2, k3, k4, k5, k6 = jax.random.split(key, 6)
    # PyTorch-native weight shapes: conv1 [16,192,1,1], conv2 [32,16,3,3]
    w1 = jax.random.normal(k1, (Cmid, Cin, 1, 1), jnp.float32) / jnp.sqrt(Cin)
    w2 = jax.random.normal(k2, (Cout, Cmid, 3, 3), jnp.float32) / jnp.sqrt(9.0 * Cmid)
    # BatchNorm affine params (randomized to exercise the affine path)
    g1 = 1.0 + 0.1 * jax.random.normal(k3, (Cmid,), jnp.float32)
    b1 = 0.1 * jax.random.normal(k4, (Cmid,), jnp.float32)
    g2 = 1.0 + 0.1 * jax.random.normal(k5, (Cout,), jnp.float32)
    b2 = 0.1 * jax.random.normal(k6, (Cout,), jnp.float32)
    return (w1, g1, b1, w2, g2, b2)


if __name__ == "__main__":
    key = jax.random.PRNGKey(0)
    kx, kp = jax.random.split(key)

    # Module spec shape: [1, 192, 28, 28]; channels fixed by the module (192->16->32).
    N, C, H, W = 1, 192, 28, 28
    x = jax.random.normal(kx, (N, C, H, W), jnp.float32)
    params = init_params(kp)

    out = jax.block_until_ready(model_forward(x, params))
    ref = reference_forward(x, params)

    assert out.shape == (N, 32, H, W), out.shape
    # bf16 MXU operands vs. f32 reference -> allow ~1e-2-scale differences.
    max_err = float(jnp.max(jnp.abs(out - ref)))
    assert jnp.allclose(out, ref, atol=5e-2, rtol=5e-2), max_err
    print("KERNEL_OK")
</pallas_src>

<mosaic_0001>
module attributes {stable_mosaic.version = 11 : i64} {
  func.func @fused_kernel(%arg0: memref<192x784xf32, #tpu.memory_space<vmem>>, %arg1: memref<16x192xbf16, #tpu.memory_space<vmem>>, %arg2: memref<16x1xf32, #tpu.memory_space<vmem>>, %arg3: memref<16x1xf32, #tpu.memory_space<vmem>>, %arg4: memref<32x144xbf16, #tpu.memory_space<vmem>>, %arg5: memref<32x1xf32, #tpu.memory_space<vmem>>, %arg6: memref<32x1xf32, #tpu.memory_space<vmem>>, %arg7: memref<9x784xbf16, #tpu.memory_space<vmem>>, %arg8: memref<32x784xf32, #tpu.memory_space<vmem>>) attributes {dimension_semantics = [], scalar_prefetch = 0 : i64, scratch_operands = 0 : i64, tpu.core_type = #tpu.core_type<tc>} {
    %c0 = arith.constant 0 : index
    %c0_0 = arith.constant 0 : index
    %0 = vector.load %arg0[%c0, %c0_0] : memref<192x784xf32, #tpu.memory_space<vmem>>, vector<192x784xf32>
    %1 = arith.truncf %0 : vector<192x784xf32> to vector<192x784xbf16>
    %c0_1 = arith.constant 0 : index
    %c0_2 = arith.constant 0 : index
    %2 = vector.load %arg1[%c0_1, %c0_2] : memref<16x192xbf16, #tpu.memory_space<vmem>>, vector<16x192xbf16>
    %cst = arith.constant dense<0.000000e+00> : vector<16x784xf32>
    %3 = tpu.matmul %2, %1, %cst {dimension_numbers = #tpu.dot_dimension_numbers<[1], [0], [0], [1], [0, 0, 1, 1], [], []>} : vector<16x192xbf16>, vector<192x784xbf16>, vector<16x784xf32> -> vector<16x784xf32>
    %cst_3 = arith.constant dense<0.000000e+00> : vector<16xf32>
    %4 = vector.multi_reduction <add>, %3, %cst_3 [1] : vector<16x784xf32> to vector<16xf32>
    %5 = vector.shape_cast %4 : vector<16xf32> to vector<16x1xf32>
    %6 = arith.mulf %3, %3 : vector<16x784xf32>
    %cst_4 = arith.constant dense<0.000000e+00> : vector<16xf32>
    %7 = vector.multi_reduction <add>, %6, %cst_4 [1] : vector<16x784xf32> to vector<16xf32>
    %8 = vector.shape_cast %7 : vector<16xf32> to vector<16x1xf32>
    %cst_5 = arith.constant 0.00127551018 : f32
    %9 = vector.broadcast %cst_5 : f32 to vector<16x1xf32>
    %10 = arith.mulf %5, %9 : vector<16x1xf32>
    %cst_6 = arith.constant 0.00127551018 : f32
    %11 = vector.broadcast %cst_6 : f32 to vector<16x1xf32>
    %12 = arith.mulf %8, %11 : vector<16x1xf32>
    %13 = arith.mulf %10, %10 : vector<16x1xf32>
    %14 = arith.subf %12, %13 : vector<16x1xf32>
    %cst_7 = arith.constant 1.000000e-03 : f32
    %15 = vector.broadcast %cst_7 : f32 to vector<16x1xf32>
    %16 = arith.addf %14, %15 : vector<16x1xf32>
    %17 = math.rsqrt %16 : vector<16x1xf32>
    %c0_8 = arith.constant 0 : index
    %c0_9 = arith.constant 0 : index
    %18 = vector.load %arg2[%c0_8, %c0_9] : memref<16x1xf32, #tpu.memory_space<vmem>>, vector<16x1xf32>
    %19 = arith.mulf %17, %18 : vector<16x1xf32>
    %20 = vector.broadcast %10 : vector<16x1xf32> to vector<16x784xf32>
    %21 = arith.subf %3, %20 : vector<16x784xf32>
    %22 = vector.broadcast %19 : vector<16x1xf32> to vector<16x784xf32>
    %23 = arith.mulf %21, %22 : vector<16x784xf32>
    %c0_10 = arith.constant 0 : index
    %c0_11 = arith.constant 0 : index
    %24 = vector.load %arg3[%c0_10, %c0_11] : memref<16x1xf32, #tpu.memory_space<vmem>>, vector<16x1xf32>
    %25 = vector.broadcast %24 : vector<16x1xf32> to vector<16x784xf32>
    %26 = arith.addf %23, %25 : vector<16x784xf32>
    %cst_12 = arith.constant 0.000000e+00 : f32
    %27 = vector.broadcast %cst_12 : f32 to vector<16x784xf32>
    %28 = arith.maximumf %26, %27 : vector<16x784xf32>
    %29 = arith.truncf %28 : vector<16x784xf32> to vector<16x784xbf16>
    %cst_13 = arith.constant 0.000000e+00 : bf16
    %30 = vector.broadcast %cst_13 : bf16 to vector<16x29xbf16>
    %31 = tpu.concatenate %30, %29, %30 in 1 : vector<16x29xbf16>, vector<16x784xbf16>, vector<16x29xbf16> -> vector<16x842xbf16>
    %32 = vector.extract_strided_slice %31 {offsets = [0, 0], sizes = [16, 784], strides = [1, 1]} : vector<16x842xbf16> to vector<16x784xbf16>
    %c0_14 = arith.constant 0 : index
    %c0_15 = arith.constant 0 : index
    %33 = vector.load %arg7[%c0_14, %c0_15] : memref<9x784xbf16, #tpu.memory_space<vmem>>, vector<1x784xbf16>
    %34 = vector.broadcast %33 : vector<1x784xbf16> to vector<16x784xbf16>
    %35 = arith.mulf %32, %34 : vector<16x784xbf16>
    %36 = vector.extract_strided_slice %31 {offsets = [0, 1], sizes = [16, 784], strides = [1, 1]} : vector<16x842xbf16> to vector<16x784xbf16>
    %c1 = arith.constant 1 : index
    %c0_16 = arith.constant 0 : index
    %37 = vector.load %arg7[%c1, %c0_16] : memref<9x784xbf16, #tpu.memory_space<vmem>>, vector<1x784xbf16>
    %38 = vector.broadcast %37 : vector<1x784xbf16> to vector<16x784xbf16>
    %39 = arith.mulf %36, %38 : vector<16x784xbf16>
    %40 = vector.extract_strided_slice %31 {offsets = [0, 2], sizes = [16, 784], strides = [1, 1]} : vector<16x842xbf16> to vector<16x784xbf16>
    %c2 = arith.constant 2 : index
    %c0_17 = arith.constant 0 : index
    %41 = vector.load %arg7[%c2, %c0_17] : memref<9x784xbf16, #tpu.memory_space<vmem>>, vector<1x784xbf16>
    %42 = vector.broadcast %41 : vector<1x784xbf16> to vector<16x784xbf16>
    %43 = arith.mulf %40, %42 : vector<16x784xbf16>
    %44 = vector.extract_strided_slice %31 {offsets = [0, 28], sizes = [16, 784], strides = [1, 1]} : vector<16x842xbf16> to vector<16x784xbf16>
    %c3 = arith.constant 3 : index
    %c0_18 = arith.constant 0 : index
    %45 = vector.load %arg7[%c3, %c0_18] : memref<9x784xbf16, #tpu.memory_space<vmem>>, vector<1x784xbf16>
    %46 = vector.broadcast %45 : vector<1x784xbf16> to vector<16x784xbf16>
    %47 = arith.mulf %44, %46 : vector<16x784xbf16>
    %48 = vector.extract_strided_slice %31 {offsets = [0, 29], sizes = [16, 784], strides = [1, 1]} : vector<16x842xbf16> to vector<16x784xbf16>
    %49 = vector.extract_strided_slice %31 {offsets = [0, 30], sizes = [16, 784], strides = [1, 1]} : vector<16x842xbf16> to vector<16x784xbf16>
    %c5 = arith.constant 5 : index
    %c0_19 = arith.constant 0 : index
    %50 = vector.load %arg7[%c5, %c0_19] : memref<9x784xbf16, #tpu.memory_space<vmem>>, vector<1x784xbf16>
    %51 = vector.broadcast %50 : vector<1x784xbf16> to vector<16x784xbf16>
    %52 = arith.mulf %49, %51 : vector<16x784xbf16>
    %53 = vector.extract_strided_slice %31 {offsets = [0, 56], sizes = [16, 784], strides = [1, 1]} : vector<16x842xbf16> to vector<16x784xbf16>
    %c6 = arith.constant 6 : index
    %c0_20 = arith.constant 0 : index
    %54 = vector.load %arg7[%c6, %c0_20] : memref<9x784xbf16, #tpu.memory_space<vmem>>, vector<1x784xbf16>
    %55 = vector.broadcast %54 : vector<1x784xbf16> to vector<16x784xbf16>
    %56 = arith.mulf %53, %55 : vector<16x784xbf16>
    %57 = vector.extract_strided_slice %31 {offsets = [0, 57], sizes = [16, 784], strides = [1, 1]} : vector<16x842xbf16> to vector<16x784xbf16>
    %c7 = arith.constant 7 : index
    %c0_21 = arith.constant 0 : index
    %58 = vector.load %arg7[%c7, %c0_21] : memref<9x784xbf16, #tpu.memory_space<vmem>>, vector<1x784xbf16>
    %59 = vector.broadcast %58 : vector<1x784xbf16> to vector<16x784xbf16>
    %60 = arith.mulf %57, %59 : vector<16x784xbf16>
    %61 = vector.extract_strided_slice %31 {offsets = [0, 58], sizes = [16, 784], strides = [1, 1]} : vector<16x842xbf16> to vector<16x784xbf16>
    %c8 = arith.constant 8 : index
    %c0_22 = arith.constant 0 : index
    %62 = vector.load %arg7[%c8, %c0_22] : memref<9x784xbf16, #tpu.memory_space<vmem>>, vector<1x784xbf16>
    %63 = vector.broadcast %62 : vector<1x784xbf16> to vector<16x784xbf16>
    %64 = arith.mulf %61, %63 : vector<16x784xbf16>
    %65 = tpu.concatenate %35, %39, %43, %47, %48, %52, %56, %60, %64 in 0 : vector<16x784xbf16>, vector<16x784xbf16>, vector<16x784xbf16>, vector<16x784xbf16>, vector<16x784xbf16>, vector<16x784xbf16>, vector<16x784xbf16>, vector<16x784xbf16>, vector<16x784xbf16> -> vector<144x784xbf16>
    %c0_23 = arith.constant 0 : index
    %c0_24 = arith.constant 0 : index
    %66 = vector.load %arg4[%c0_23, %c0_24] : memref<32x144xbf16, #tpu.memory_space<vmem>>, vector<32x144xbf16>
    %cst_25 = arith.constant dense<0.000000e+00> : vector<32x784xf32>
    %67 = tpu.matmul %66, %65, %cst_25 {dimension_numbers = #tpu.dot_dimension_numbers<[1], [0], [0], [1], [0, 0, 1, 1], [], []>} : vector<32x144xbf16>, vector<144x784xbf16>, vector<32x784xf32> -> vector<32x784xf32>
    %cst_26 = arith.constant dense<0.000000e+00> : vector<32xf32>
    %68 = vector.multi_reduction <add>, %67, %cst_26 [1] : vector<32x784xf32> to vector<32xf32>
    %69 = vector.shape_cast %68 : vector<32xf32> to vector<32x1xf32>
    %70 = arith.mulf %67, %67 : vector<32x784xf32>
    %cst_27 = arith.constant dense<0.000000e+00> : vector<32xf32>
    %71 = vector.multi_reduction <add>, %70, %cst_27 [1] : vector<32x784xf32> to vector<32xf32>
    %72 = vector.shape_cast %71 : vector<32xf32> to vector<32x1xf32>
    %cst_28 = arith.constant 0.00127551018 : f32
    %73 = vector.broadcast %cst_28 : f32 to vector<32x1xf32>
    %74 = arith.mulf %69, %73 : vector<32x1xf32>
    %cst_29 = arith.constant 0.00127551018 : f32
    %75 = vector.broadcast %cst_29 : f32 to vector<32x1xf32>
    %76 = arith.mulf %72, %75 : vector<32x1xf32>
    %77 = arith.mulf %74, %74 : vector<32x1xf32>
    %78 = arith.subf %76, %77 : vector<32x1xf32>
    %cst_30 = arith.constant 1.000000e-03 : f32
    %79 = vector.broadcast %cst_30 : f32 to vector<32x1xf32>
    %80 = arith.addf %78, %79 : vector<32x1xf32>
    %81 = math.rsqrt %80 : vector<32x1xf32>
    %c0_31 = arith.constant 0 : index
    %c0_32 = arith.constant 0 : index
    %82 = vector.load %arg5[%c0_31, %c0_32] : memref<32x1xf32, #tpu.memory_space<vmem>>, vector<32x1xf32>
    %83 = arith.mulf %81, %82 : vector<32x1xf32>
    %84 = vector.broadcast %74 : vector<32x1xf32> to vector<32x784xf32>
    %85 = arith.subf %67, %84 : vector<32x784xf32>
    %86 = vector.broadcast %83 : vector<32x1xf32> to vector<32x784xf32>
    %87 = arith.mulf %85, %86 : vector<32x784xf32>
    %c0_33 = arith.constant 0 : index
    %c0_34 = arith.constant 0 : index
    %88 = vector.load %arg6[%c0_33, %c0_34] : memref<32x1xf32, #tpu.memory_space<vmem>>, vector<32x1xf32>
    %89 = vector.broadcast %88 : vector<32x1xf32> to vector<32x784xf32>
    %90 = arith.addf %87, %89 : vector<32x784xf32>
    %c0_35 = arith.constant 0 : index
    %c0_36 = arith.constant 0 : index
    %91 = vector.load %arg8[%c0_35, %c0_36] : memref<32x784xf32, #tpu.memory_space<vmem>>, vector<32x784xf32>
    tpu.vector_store %arg8[%c0_35, %c0_36], %90 {strides = array<i32>} : memref<32x784xf32, #tpu.memory_space<vmem>>, vector<32x784xf32>,
    return
  }
}

</mosaic_0001>

<bundles_post_ra>
// kernel: model_forward.1
= control target key start
LH: loop header
LB: loop body
LE: loop exit
PB: predicated region body
PF: predicated region fallthrough
CT: control target
= control target key end

     0   :  { %vm293_vm0 = vcmask 523264   ;;  %vm498_vm1 = vcmask 130048   ;;  %s2836_s21 = smov 57   ;;  %s2837_s28 = smov 56   ;;  %vm1410_vm5 = vcmask 465920   ;;  %vm1083_vm9 = vcmask 228352   ;;  %s5083_s0 = inlined_call_operand.vmem [shape: f32[192,784], index: 0, kind: input, shape index: {}]   ;;  %s5084_s1 = inlined_call_operand.vmem [shape: bf16[16,192], index: 1, kind: input, shape index: {}]   ;;  %s5085_s7 = inlined_call_operand.vmem [shape: bf16[9,784], index: 7, kind: input, shape index: {}]   ;;  %s5086_s3 = inlined_call_operand.vmem [shape: f32[16,1], index: 3, kind: input, shape index: {}]   ;;  %s5087_s2 = inlined_call_operand.vmem [shape: f32[16,1], index: 2, kind: input, shape index: {}]   ;;  %s5088_s4 = inlined_call_operand.vmem [shape: bf16[32,144], index: 4, kind: input, shape index: {}]   ;;  %s5089_s6 = inlined_call_operand.vmem [shape: f32[32,1], index: 6, kind: input, shape index: {}]   ;;  %s5090_s5 = inlined_call_operand.vmem [shape: f32[32,1], index: 5, kind: input, shape index: {}]   ;;  %s5091_s8 = inlined_call_operand.vmem [shape: f32[32,784], index: 8, kind: output, shape index: {}]  }
   0x1   :  { %v128_v0 = vld [vmem:[%s5083_s0 + $0x310] sm:$0xff]  ;;  %v135_v1 = vld [vmem:[%s5083_s0 + $0x348] sm:$0xff]  ;;  %v129_v5 = vld [vmem:[%s5083_s0 + $0x318] sm:$0xff]  ;;  %s2838_s30 = smov 58   ;;  %s2840_s10 = smov 30   ;;  %vm1318_vm10 = vcmask 457728  }
   0x2   :  { %v184_v2 = vld [vmem:[%s5083_s0 + $0x4d0] sm:$0xff]  ;;  %v247_v3 = vpack.c.bf16 %v135_v1, %v128_v0  ;;  %v191_v4 = vld [vmem:[%s5083_s0 + $0x508] sm:$0xff]  ;;  %v185_v9 = vld [vmem:[%s5083_s0 + $0x4d8] sm:$0xff]  ;;  %s2841_s15 = smov 1   ;;  %s2842_s16 = smov 2   ;;  %vm991_vm11 = vcmask 15360  }
   0x3   :  { %v136_v6 = vld [vmem:[%s5083_s0 + $0x350] sm:$0xff]  ;;  %v275_v7 = vpack.c.bf16 %v191_v4, %v184_v2  ;;  %v114_v11 = vld [vmem:[%s5083_s0 + $0x2a0] sm:$0xff]  ;;  %v121_v13 = vld [vmem:[%s5083_s0 + $0x2d8] sm:$0xff]  ;;  %vm1524_vm12 = vcmask 474112   ;;  %vm1204_vm13 = vcmask 244736   ;;  %vm707_vm14 = vcmask 236544  }
   0x4   :  { %v248_v8 = vpack.c.bf16 %v136_v6, %v129_v5  ;;  %v192_v10 = vld [vmem:[%s5083_s0 + $0x510] sm:$0xff]  ;;  %297 = vmatpush.bf16.msra.mxu0 %v247_v3  ;;  %v170_v14 = vld [vmem:[%s5083_s0 + $0x460] sm:$0xff]  ;;  %v177_v15 = vld [vmem:[%s5083_s0 + $0x498] sm:$0xff]  ;;  %v240_v16 = vpack.c.bf16 %v121_v13, %v114_v11  ;;  %vm877_vm15 = vcmask 7168   ;;  %s2845_s11 = smov 98   ;;  %s2846_s12 = smov 71  }
   0x5   :  { %v276_v12 = vpack.c.bf16 %v192_v10, %v185_v9  ;;  %315 = vmatpush.bf16.msra.mxu1 %v275_v7  ;;  %v268_v17 = vpack.c.bf16 %v177_v15, %v170_v14  ;;  %v115_v18 = vld [vmem:[%s5083_s0 + $0x2a8] sm:$0xff]  ;;  %v122_v19 = vld [vmem:[%s5083_s0 + $0x2e0] sm:$0xff]  ;;  %v100_v23 = vld [vmem:[%s5083_s0 + $0x230] sm:$0xff]  ;;  %s2847_s13 = smov 100   ;;  %s2848_s14 = smov 72  }
   0x6   :  { %325 = vmatpush.bf16.msra.mxu2 %v248_v8  ;;  %v171_v20 = vld [vmem:[%s5083_s0 + $0x468] sm:$0xff]  ;;  %v241_v21 = vpack.c.bf16 %v122_v19, %v115_v18  ;;  %v178_v22 = vld [vmem:[%s5083_s0 + $0x4a0] sm:$0xff]  ;;  %v156_v26 = vld [vmem:[%s5083_s0 + $0x3f0] sm:$0xff]  ;;  %s2849_s17 = smov 126   ;;  %s2850_s18 = smov 70  }
   0x7   :  { %343 = vmatpush.bf16.msra.mxu3 %v276_v12  ;;  %v107_v24 = vld [vmem:[%s5083_s0 + $0x268] sm:$0xff]  ;;  %v269_v25 = vpack.c.bf16 %v178_v22, %v171_v20  ;;  %v101_v28 = vld [vmem:[%s5083_s0 + $0x238] sm:$0xff]  ;;  %v108_v30 = vld [vmem:[%s5083_s0 + $0x270] sm:$0xff]  ;;  %s2851_s22 = smov 127  }
   0x8   :  { %v163_v27 = vld [vmem:[%s5083_s0 + $0x428] sm:$0xff]  ;;  %298 = vmatpush.bf16.msra.mxu0 %v240_v16  ;;  %v233_v29 = vpack.c.bf16 %v107_v24, %v100_v23  ;;  %v157_v31 = vld [vmem:[%s5083_s0 + $0x3f8] sm:$0xff]  ;;  %v164_v32 = vld [vmem:[%s5083_s0 + $0x430] sm:$0xff]  ;;  %v234_v34 = vpack.c.bf16 %v108_v30, %v101_v28 }
   0x9   :  { %316 = vmatpush.bf16.msra.mxu1 %v268_v17  ;;  %v261_v33 = vpack.c.bf16 %v163_v27, %v156_v26  ;;  %v86_v35 = vld [vmem:[%s5083_s0 + $0x1c0] sm:$0xff]  ;;  %v93_v36 = vld [vmem:[%s5083_s0 + $0x1f8] sm:$0xff]  ;;  %v262_v38 = vpack.c.bf16 %v164_v32, %v157_v31  ;;  %v87_v40 = vld [vmem:[%s5083_s0 + $0x1c8] sm:$0xff] }
   0xa   :  { %326 = vmatpush.bf16.msra.mxu2 %v241_v21  ;;  %v142_v37 = vld [vmem:[%s5083_s0 + $0x380] sm:$0xff]  ;;  %v149_v39 = vld [vmem:[%s5083_s0 + $0x3b8] sm:$0xff]  ;;  %v143_v42 = vld [vmem:[%s5083_s0 + $0x388] sm:$0xff]  ;;  %v226_v45 = vpack.c.bf16 %v93_v36, %v86_v35 }
   0xb   :  { %344 = vmatpush.bf16.msra.mxu3 %v269_v25  ;;  %v94_v41 = vld [vmem:[%s5083_s0 + $0x200] sm:$0xff]  ;;  %v137_v46 = vld [vmem:[%s5083_s0 + $0x358] sm:$0xff]  ;;  %v254_v49 = vpack.c.bf16 %v149_v39, %v142_v37  ;;  %v72_v51 = vld [vmem:[%s5083_s0 + $0x150] sm:$0xff] }
   0xc   :  { %v150_v43 = vld [vmem:[%s5083_s0 + $0x3c0] sm:$0xff]  ;;  %299 = vmatpush.bf16.msra.mxu0 %v233_v29  ;;  %v193_v48 = vld [vmem:[%s5083_s0 + $0x518] sm:$0xff]  ;;  %v227_v50 = vpack.c.bf16 %v94_v41, %v87_v40  ;;  %v79_v52 = vld [vmem:[%s5083_s0 + $0x188] sm:$0xff] }
   0xd   :  { %v130_v44 = vld [vmem:[%s5083_s0 + $0x320] sm:$0xff]  ;;  %317 = vmatpush.bf16.msra.mxu1 %v261_v33  ;;  %v255_v53 = vpack.c.bf16 %v150_v43, %v143_v42  ;;  %v73_v55 = vld [vmem:[%s5083_s0 + $0x158] sm:$0xff]  ;;  %v80_v56 = vld [vmem:[%s5083_s0 + $0x190] sm:$0xff]  ;;  %v219_v60 = vpack.c.bf16 %v79_v52, %v72_v51 }
   0xe   :  { %v186_v47 = vld [vmem:[%s5083_s0 + $0x4e0] sm:$0xff]  ;;  %327 = vmatpush.bf16.msra.mxu2 %v234_v34  ;;  %v249_v54 = vpack.c.bf16 %v137_v46, %v130_v44  ;;  %v116_v58 = vld [vmem:[%s5083_s0 + $0x2b0] sm:$0xff]  ;;  %v123_v59 = vld [vmem:[%s5083_s0 + $0x2e8] sm:$0xff]  ;;  %v220_v63 = vpack.c.bf16 %v80_v56, %v73_v55 }
   0xf   :  { %345 = vmatpush.bf16.msra.mxu3 %v262_v38  ;;  %v277_v57 = vpack.c.bf16 %v193_v48, %v186_v47  ;;  %v172_v61 = vld [vmem:[%s5083_s0 + $0x470] sm:$0xff]  ;;  %v179_v62 = vld [vmem:[%s5083_s0 + $0x4a8] sm:$0xff]  ;;  %v58_v0 = vld [vmem:[%s5083_s0 + $0xe0] sm:$0xff]  ;;  %v242_v3 = vpack.c.bf16 %v123_v59, %v116_v58 }
  0x10   :  { %300 = vmatpush.bf16.msra.mxu0 %v226_v45  ;;  %v65_v1 = vld [vmem:[%s5083_s0 + $0x118] sm:$0xff]  ;;  %v59_v2 = vld [vmem:[%s5083_s0 + $0xe8] sm:$0xff]  ;;  %v66_v4 = vld [vmem:[%s5083_s0 + $0x120] sm:$0xff]  ;;  %v270_v7 = vpack.c.bf16 %v179_v62, %v172_v61 }
  0x11   :  { %318 = vmatpush.bf16.msra.mxu1 %v254_v49  ;;  %v2692_v5 = vld [vmem:[%s5084_s1 + $0x4] sm:$0xf]  ;;  %v2651_v6 = vld [vmem:[%s5084_s1 + $0x8] sm:$0xf0]  ;;  %v109_v9 = vld [vmem:[%s5083_s0 + $0x278] sm:$0xff]  ;;  %v212_v11 = vpack.c.bf16 %v65_v1, %v58_v0  ;;  %v213_v14 = vpack.c.bf16 %v66_v4, %v59_v2 }
  0x12   :  { %328 = vmatpush.bf16.msra.mxu2 %v227_v50  ;;  %v102_v8 = vld [vmem:[%s5083_s0 + $0x240] sm:$0xff]  ;;  %v3053_v10 = vor.u32 %v2692_v5, %v2651_v6  ;;  %v165_v13 = vld [vmem:[%s5083_s0 + $0x438] sm:$0xff]  ;;  %v44_v15 = vld [vmem:[%s5083_s0 + $0x70] sm:$0xff] }
  0x13   :  { %346 = vmatpush.bf16.msra.mxu3 %v255_v53  ;;  %v158_v12 = vld [vmem:[%s5083_s0 + $0x400] sm:$0xff]  ;;  %v51_v16 = vld [vmem:[%s5083_s0 + $0xa8] sm:$0xff]  ;;  %v235_v17 = vpack.c.bf16 %v109_v9, %v102_v8  ;;  %v45_v18 = vld [vmem:[%s5083_s0 + $0x78] sm:$0xff] }
  0x14   :  { %301 = vmatpush.bf16.msra.mxu0 %v219_v60  ;;  %v52_v19 = vld [vmem:[%s5083_s0 + $0xb0] sm:$0xff]  ;;  %v263_v21 = vpack.c.bf16 %v165_v13, %v158_v12  ;;  %v95_v22 = vld [vmem:[%s5083_s0 + $0x208] sm:$0xff]  ;;  %2655 = vmatmul.msk.bf16.vlgmr.msra.gmra.mxu1 %vm293_vm0, %v3053_v10  ;;  %v205_v25 = vpack.c.bf16 %v51_v16, %v44_v15  ;;  %v30_v28 = vld [vmem:[%s5083_s0] sm:$0xff] }
  0x15   :  { %353 = vmatpush.bf16.msrb.mxu1 %v249_v54  ;;  %v88_v20 = vld [vmem:[%s5083_s0 + $0x1d0] sm:$0xff]  ;;  %v151_v24 = vld [vmem:[%s5083_s0 + $0x3c8] sm:$0xff]  ;;  %v206_v29 = vpack.c.bf16 %v52_v19, %v45_v18  ;;  %v37_v30 = vld [vmem:[%s5083_s0 + $0x38] sm:$0xff] }
  0x16   :  { %329 = vmatpush.bf16.msra.mxu2 %v220_v63  ;;  %2656 = vmatmul.msk.bf16.vlgmr.msra.gmra.mxu3 %vm293_vm0, %v3053_v10  ;;  %v144_v23 = vld [vmem:[%s5083_s0 + $0x390] sm:$0xff]  ;;  %v139_v27 = vld [vmem:[%s5083_s0 + $0x368] sm:$0xff]  ;;  %v38_v32 = vld [vmem:[%s5083_s0 + $0x40] sm:$0xff]  ;;  %v228_v33 = vpack.c.bf16 %v95_v22, %v88_v20  ;;  %v198_v42 = vpack.c.bf16 %v37_v30, %v30_v28 }
  0x17   :  { %371 = vmatpush.bf16.msrb.mxu3 %v277_v57  ;;  %v132_v26 = vld [vmem:[%s5083_s0 + $0x330] sm:$0xff]  ;;  %v31_v31 = vld [vmem:[%s5083_s0 + $0x8] sm:$0xff]  ;;  %v74_v34 = vld [vmem:[%s5083_s0 + $0x160] sm:$0xff]  ;;  %v256_v37 = vpack.c.bf16 %v151_v24, %v144_v23 }
  0x18   :  { %302 = vmatpush.bf16.msra.mxu0 %v212_v11  ;;  %v131_v35 = vld [vmem:[%s5083_s0 + $0x328] sm:$0xff]  ;;  %v138_v36 = vld [vmem:[%s5083_s0 + $0x360] sm:$0xff]  ;;  %v81_v38 = vld [vmem:[%s5083_s0 + $0x198] sm:$0xff]  ;;  %v251_v41 = vpack.c.bf16 %v139_v27, %v132_v26  ;;  %v199_v45 = vpack.c.bf16 %v38_v32, %v31_v31 }
  0x19   :  { %354 = vmatpush.bf16.msrb.mxu1 %v242_v3  ;;  %v187_v39 = vld [vmem:[%s5083_s0 + $0x4e8] sm:$0xff]  ;;  %v194_v40 = vld [vmem:[%s5083_s0 + $0x520] sm:$0xff]  ;;  %v250_v46 = vpack.c.bf16 %v138_v36, %v131_v35  ;;  %v125_v48 = vld [vmem:[%s5083_s0 + $0x2f8] sm:$0xff]  ;;  %v221_v49 = vpack.c.bf16 %v81_v38, %v74_v34 }
  0x1a   :  { %330 = vmatpush.bf16.msra.mxu2 %v213_v14  ;;  %v2649_v43 = vld [vmem:[%s5084_s1] sm:$0xf]  ;;  %v2693_v44 = vld [vmem:[%s5084_s1 + $0x4] sm:$0xf0]  ;;  %v278_v50 = vpack.c.bf16 %v194_v40, %v187_v39  ;;  %v60_v51 = vld [vmem:[%s5083_s0 + $0xf0] sm:$0xff]  ;;  %s2843_s1 = smov 29  }
  0x1b   :  { %372 = vmatpush.bf16.msrb.mxu3 %v270_v7  ;;  %v118_v47 = vld [vmem:[%s5083_s0 + $0x2c0] sm:$0xff]  ;;  %v117_v52 = vld [vmem:[%s5083_s0 + $0x2b8] sm:$0xff]  ;;  %v124_v53 = vld [vmem:[%s5083_s0 + $0x2f0] sm:$0xff]  ;;  %v3146_v54 = vor.u32 %v2693_v44, %v2649_v43 }
  0x1c   :  { %303 = vmatpush.bf16.msra.mxu0 %v205_v25  ;;  %v67_v55 = vld [vmem:[%s5083_s0 + $0x128] sm:$0xff]  ;;  %v173_v56 = vld [vmem:[%s5083_s0 + $0x478] sm:$0xff]  ;;  %v180_v57 = vld [vmem:[%s5083_s0 + $0x4b0] sm:$0xff]  ;;  %v244_v58 = vpack.c.bf16 %v125_v48, %v118_v47  ;;  %v243_v59 = vpack.c.bf16 %v124_v53, %v117_v52 }
  0x1d   :  { %355 = vmatpush.bf16.msrb.mxu1 %v235_v17  ;;  %v104_v60 = vld [vmem:[%s5083_s0 + $0x250] sm:$0xff]  ;;  %v111_v61 = vld [vmem:[%s5083_s0 + $0x288] sm:$0xff]  ;;  %v214_v62 = vpack.c.bf16 %v67_v55, %v60_v51  ;;  %v271_v63 = vpack.c.bf16 %v180_v57, %v173_v56  ;;  %v46_v0 = vld [vmem:[%s5083_s0 + $0x80] sm:$0xff] }
  0x1e   :  { %331 = vmatpush.bf16.msra.mxu2 %v206_v29  ;;  %v103_v1 = vld [vmem:[%s5083_s0 + $0x248] sm:$0xff]  ;;  %v110_v2 = vld [vmem:[%s5083_s0 + $0x280] sm:$0xff]  ;;  %v53_v3 = vld [vmem:[%s5083_s0 + $0xb8] sm:$0xff]  ;;  %v237_v6 = vpack.c.bf16 %v111_v61, %v104_v60 }
  0x1f   :  { %373 = vmatpush.bf16.msrb.mxu3 %v263_v21  ;;  %v159_v4 = vld [vmem:[%s5083_s0 + $0x408] sm:$0xff]  ;;  %v166_v5 = vld [vmem:[%s5083_s0 + $0x440] sm:$0xff]  ;;  %v236_v7 = vpack.c.bf16 %v110_v2, %v103_v1  ;;  %v97_v9 = vld [vmem:[%s5083_s0 + $0x218] sm:$0xff]  ;;  %v207_v12 = vpack.c.bf16 %v53_v3, %v46_v0 }
  0x20   :  { %304 = vmatpush.bf16.msra.mxu0 %v198_v42  ;;  %v90_v8 = vld [vmem:[%s5083_s0 + $0x1e0] sm:$0xff]  ;;  %v32_v11 = vld [vmem:[%s5083_s0 + $0x10] sm:$0xff]  ;;  %v264_v13 = vpack.c.bf16 %v166_v5, %v159_v4  ;;  %v39_v14 = vld [vmem:[%s5083_s0 + $0x48] sm:$0xff] }
  0x21   :  { %356 = vmatpush.bf16.msrb.mxu1 %v228_v33  ;;  %v89_v15 = vld [vmem:[%s5083_s0 + $0x1d8] sm:$0xff]  ;;  %v96_v16 = vld [vmem:[%s5083_s0 + $0x210] sm:$0xff]  ;;  %v230_v20 = vpack.c.bf16 %v97_v9, %v90_v8  ;;  %v195_v21 = vld [vmem:[%s5083_s0 + $0x528] sm:$0xff]  ;;  %v200_v27 = vpack.c.bf16 %v39_v14, %v32_v11 }
  0x22   :  { %332 = vmatpush.bf16.msra.mxu2 %v199_v45  ;;  %v145_v17 = vld [vmem:[%s5083_s0 + $0x398] sm:$0xff]  ;;  %v152_v18 = vld [vmem:[%s5083_s0 + $0x3d0] sm:$0xff]  ;;  %v229_v24 = vpack.c.bf16 %v96_v16, %v89_v15  ;;  %v83_v26 = vld [vmem:[%s5083_s0 + $0x1a8] sm:$0xff] }
  0x23   :  { %374 = vmatpush.bf16.msrb.mxu3 %v256_v37  ;;  %305 = vmatmul.bf16.vlgmr.msra.gmra.mxu0 %v3146_v54  ;;  %v188_v19 = vld [vmem:[%s5083_s0 + $0x4f0] sm:$0xff]  ;;  %v133_v22 = vld [vmem:[%s5083_s0 + $0x338] sm:$0xff]  ;;  %v257_v28 = vpack.c.bf16 %v152_v18, %v145_v17  ;;  %v75_v29 = vld [vmem:[%s5083_s0 + $0x168] sm:$0xff] }
  0x24   :  { %381 = vmatpush.bf16.msrb.mxu0 %v250_v46  ;;  %v140_v23 = vld [vmem:[%s5083_s0 + $0x370] sm:$0xff]  ;;  %v82_v30 = vld [vmem:[%s5083_s0 + $0x1a0] sm:$0xff]  ;;  %v279_v31 = vpack.c.bf16 %v195_v21, %v188_v19  ;;  %v181_v35 = vld [vmem:[%s5083_s0 + $0x4b8] sm:$0xff] }
  0x25   :  { %357 = vmatpush.bf16.msrb.mxu1 %v221_v49  ;;  %333 = vmatmul.bf16.vlgmr.msra.gmra.mxu2 %v3146_v54  ;;  %v76_v25 = vld [vmem:[%s5083_s0 + $0x170] sm:$0xff]  ;;  %v252_v32 = vpack.c.bf16 %v140_v23, %v133_v22  ;;  %v174_v33 = vld [vmem:[%s5083_s0 + $0x480] sm:$0xff]  ;;  %v119_v36 = vld [vmem:[%s5083_s0 + $0x2c8] sm:$0xff]  ;;  %v222_v38 = vpack.c.bf16 %v82_v30, %v75_v29 }
  0x26   :  { %399 = vmatpush.bf16.msrb.mxu2 %v278_v50  ;;  %2657 = vmatmul.msk.bf16.vlgmr.msrb.gmra.mxu3 %vm293_vm0, %v3053_v10  ;;  %v223_v34 = vpack.c.bf16 %v83_v26, %v76_v25  ;;  %v126_v37 = vld [vmem:[%s5083_s0 + $0x300] sm:$0xff]  ;;  %v69_v40 = vld [vmem:[%s5083_s0 + $0x138] sm:$0xff]  ;;  %v68_v42 = vld [vmem:[%s5083_s0 + $0x130] sm:$0xff]  ;;  %v272_v43 = vpack.c.bf16 %v181_v35, %v174_v33 }
  0x27   :  { %409 = vmatpush.bf16.msra.mxu3 %v251_v41  ;;  %v62_v39 = vld [vmem:[%s5083_s0 + $0x100] sm:$0xff]  ;;  %v61_v41 = vld [vmem:[%s5083_s0 + $0xf8] sm:$0xff]  ;;  %v245_v44 = vpack.c.bf16 %v126_v37, %v119_v36  ;;  %v160_v45 = vld [vmem:[%s5083_s0 + $0x410] sm:$0xff] }
  0x28   :  { %382 = vmatpush.bf16.msrb.mxu0 %v243_v59  ;;  %v216_v46 = vpack.c.bf16 %v69_v40, %v62_v39  ;;  %v167_v47 = vld [vmem:[%s5083_s0 + $0x448] sm:$0xff]  ;;  %v105_v48 = vld [vmem:[%s5083_s0 + $0x258] sm:$0xff]  ;;  %v112_v49 = vld [vmem:[%s5083_s0 + $0x290] sm:$0xff]  ;;  %v215_v50 = vpack.c.bf16 %v68_v42, %v61_v41 }
  0x29   :  { %358 = vmatpush.bf16.msrb.mxu1 %v214_v62  ;;  %v48_v51 = vld [vmem:[%s5083_s0 + $0x90] sm:$0xff]  ;;  %v55_v52 = vld [vmem:[%s5083_s0 + $0xc8] sm:$0xff]  ;;  %v54_v55 = vld [vmem:[%s5083_s0 + $0xc0] sm:$0xff]  ;;  %v265_v56 = vpack.c.bf16 %v167_v47, %v160_v45  ;;  %v238_v57 = vpack.c.bf16 %v112_v49, %v105_v48 }
  0x2a   :  { %400 = vmatpush.bf16.msrb.mxu2 %v271_v63  ;;  %v47_v53 = vld [vmem:[%s5083_s0 + $0x88] sm:$0xff]  ;;  %v41_v59 = vld [vmem:[%s5083_s0 + $0x58] sm:$0xff]  ;;  %v146_v60 = vld [vmem:[%s5083_s0 + $0x3a0] sm:$0xff]  ;;  %v209_v61 = vpack.c.bf16 %v55_v52, %v48_v51 }
  0x2b   :  { %410 = vmatpush.bf16.msra.mxu3 %v244_v58  ;;  %v34_v58 = vld [vmem:[%s5083_s0 + $0x20] sm:$0xff]  ;;  %v153_v62 = vld [vmem:[%s5083_s0 + $0x3d8] sm:$0xff]  ;;  %v91_v63 = vld [vmem:[%s5083_s0 + $0x1e8] sm:$0xff]  ;;  %v208_v1 = vpack.c.bf16 %v54_v55, %v47_v53 }
  0x2c   :  { %383 = vmatpush.bf16.msrb.mxu0 %v236_v7  ;;  %v98_v0 = vld [vmem:[%s5083_s0 + $0x220] sm:$0xff]  ;;  %v189_v2 = vld [vmem:[%s5083_s0 + $0x4f8] sm:$0xff]  ;;  %v196_v3 = vld [vmem:[%s5083_s0 + $0x530] sm:$0xff]  ;;  %v258_v8 = vpack.c.bf16 %v153_v62, %v146_v60  ;;  %v202_v11 = vpack.c.bf16 %v41_v59, %v34_v58 }
  0x2d   :  { %359 = vmatpush.bf16.msrb.mxu1 %v207_v12  ;;  %v33_v4 = vld [vmem:[%s5083_s0 + $0x18] sm:$0xff]  ;;  %v40_v5 = vld [vmem:[%s5083_s0 + $0x50] sm:$0xff]  ;;  %v231_v9 = vpack.c.bf16 %v98_v0, %v91_v63  ;;  %v280_v12 = vpack.c.bf16 %v196_v3, %v189_v2  ;;  %v175_v16 = vld [vmem:[%s5083_s0 + $0x488] sm:$0xff] }
  0x2e   :  { %401 = vmatpush.bf16.msrb.mxu2 %v264_v13  ;;  %v197_v7 = vld [vmem:[%s5083_s0 + $0x538] sm:$0xff]  ;;  %v84_v14 = vld [vmem:[%s5083_s0 + $0x1b0] sm:$0xff]  ;;  %v201_v15 = vpack.c.bf16 %v40_v5, %v33_v4  ;;  %v182_v17 = vld [vmem:[%s5083_s0 + $0x4c0] sm:$0xff] }
  0x2f   :  { %411 = vmatpush.bf16.msra.mxu3 %v237_v6  ;;  %v190_v6 = vld [vmem:[%s5083_s0 + $0x500] sm:$0xff]  ;;  %v77_v13 = vld [vmem:[%s5083_s0 + $0x178] sm:$0xff]  ;;  %v176_v19 = vld [vmem:[%s5083_s0 + $0x490] sm:$0xff]  ;;  %v273_v22 = vpack.c.bf16 %v182_v17, %v175_v16 }
  0x30   :  { %384 = vmatpush.bf16.msrb.mxu0 %v229_v24  ;;  %v281_v18 = vpack.c.bf16 %v197_v7, %v190_v6  ;;  %v224_v21 = vpack.c.bf16 %v84_v14, %v77_v13  ;;  %v63_v23 = vld [vmem:[%s5083_s0 + $0x108] sm:$0xff]  ;;  %v70_v24 = vld [vmem:[%s5083_s0 + $0x140] sm:$0xff]  ;;  %v161_v25 = vld [vmem:[%s5083_s0 + $0x418] sm:$0xff] }
  0x31   :  { %360 = vmatpush.bf16.msrb.mxu1 %v200_v27  ;;  %v168_v26 = vld [vmem:[%s5083_s0 + $0x450] sm:$0xff]  ;;  %v169_v29 = vld [vmem:[%s5083_s0 + $0x458] sm:$0xff]  ;;  %v217_v30 = vpack.c.bf16 %v70_v24, %v63_v23  ;;  %v154_v35 = vld [vmem:[%s5083_s0 + $0x3e0] sm:$0xff] }
  0x32   :  { %402 = vmatpush.bf16.msrb.mxu2 %v257_v28  ;;  %v162_v28 = vld [vmem:[%s5083_s0 + $0x420] sm:$0xff]  ;;  %v56_v33 = vld [vmem:[%s5083_s0 + $0xd0] sm:$0xff]  ;;  %v155_v40 = vld [vmem:[%s5083_s0 + $0x3e8] sm:$0xff] }
  0x33   :  { %412 = vmatpush.bf16.msra.mxu3 %v230_v20  ;;  %v183_v20 = vld [vmem:[%s5083_s0 + $0x4c8] sm:$0xff]  ;;  %v134_v36 = vld [vmem:[%s5083_s0 + $0x340] sm:$0xff]  ;;  %v267_v37 = vpack.c.bf16 %v169_v29, %v162_v28  ;;  %v148_v39 = vld [vmem:[%s5083_s0 + $0x3b0] sm:$0xff] }
  0x34   :  { %361 = vmatmul.bf16.vlgmr.msrb.gmra.mxu1 %v3146_v54  ;;  %385 = vmatpush.bf16.msrb.mxu0 %v222_v38  ;;  %v274_v27 = vpack.c.bf16 %v183_v20, %v176_v19  ;;  %v141_v38 = vld [vmem:[%s5083_s0 + $0x378] sm:$0xff]  ;;  %v120_v47 = vld [vmem:[%s5083_s0 + $0x2d0] sm:$0xff]  ;;  %v127_v48 = vld [vmem:[%s5083_s0 + $0x308] sm:$0xff] }
  0x35   :  { %427 = vmatpush.bf16.msra.mxu1 %v279_v31  ;;  %2658 = vmatmul.msk.bf16.vlgmr.msrb.gmra.mxu2 %vm293_vm0, %v3053_v10  ;;  %v266_v31 = vpack.c.bf16 %v168_v26, %v161_v25  ;;  %v253_v45 = vpack.c.bf16 %v141_v38, %v134_v36  ;;  %v106_v51 = vld [vmem:[%s5083_s0 + $0x260] sm:$0xff]  ;;  %v113_v52 = vld [vmem:[%s5083_s0 + $0x298] sm:$0xff]  ;;  %v92_v55 = vld [vmem:[%s5083_s0 + $0x1f0] sm:$0xff] }
  0x36   :  { %437 = vmatpush.bf16.msra.mxu2 %v252_v32  ;;  %v49_v32 = vld [vmem:[%s5083_s0 + $0x98] sm:$0xff]  ;;  %v239_v53 = vpack.c.bf16 %v113_v52, %v106_v51  ;;  %v78_v58 = vld [vmem:[%s5083_s0 + $0x180] sm:$0xff]  ;;  %v36_v2 = vld [vmem:[%s5083_s0 + $0x30] sm:$0xff] }
  0x37   :  { %413 = vmatpush.bf16.msra.mxu3 %v223_v34  ;;  %v147_v34 = vld [vmem:[%s5083_s0 + $0x3a8] sm:$0xff]  ;;  %v210_v41 = vpack.c.bf16 %v56_v33, %v49_v32  ;;  %v85_v59 = vld [vmem:[%s5083_s0 + $0x1b8] sm:$0xff]  ;;  %v50_v63 = vld [vmem:[%s5083_s0 + $0xa0] sm:$0xff] }
  0x38   :  { %386 = vmatpush.bf16.msrb.mxu0 %v215_v50  ;;  %v259_v42 = vpack.c.bf16 %v154_v35, %v147_v34  ;;  %v246_v50 = vpack.c.bf16 %v127_v48, %v120_v47  ;;  %v225_v60 = vpack.c.bf16 %v85_v59, %v78_v58  ;;  %v57_v0 = vld [vmem:[%s5083_s0 + $0xd8] sm:$0xff]  ;;  %v43_v3 = vld [vmem:[%s5083_s0 + $0x68] sm:$0xff] }
  0x39   :  { %428 = vmatpush.bf16.msra.mxu1 %v272_v43  ;;  %v35_v43 = vld [vmem:[%s5083_s0 + $0x28] sm:$0xff]  ;;  %v204_v4 = vpack.c.bf16 %v43_v3, %v36_v2 }
  0x3a   :  { %438 = vmatpush.bf16.msra.mxu2 %v245_v44  ;;  %v42_v44 = vld [vmem:[%s5083_s0 + $0x60] sm:$0xff] }
  0x3b   :  { %414 = vmatpush.bf16.msra.mxu3 %v216_v46  ;;  %v260_v46 = vpack.c.bf16 %v155_v40, %v148_v39  ;;  %v203_v49 = vpack.c.bf16 %v42_v44, %v35_v43 }
  0x3c   :  { %387 = vmatpush.bf16.msrb.mxu0 %v208_v1  ;;  %v211_v1 = vpack.c.bf16 %v57_v0, %v50_v63 }
  0x3d   :  { %429 = vmatpush.bf16.msra.mxu1 %v265_v56  ;;  %v99_v56 = vld [vmem:[%s5083_s0 + $0x228] sm:$0xff] }
  0x3e   :  { %439 = vmatpush.bf16.msra.mxu2 %v238_v57  ;;  %v232_v57 = vpack.c.bf16 %v99_v56, %v92_v55 }
  0x3f   :  { %415 = vmatpush.bf16.msra.mxu3 %v209_v61  ;;  %v64_v61 = vld [vmem:[%s5083_s0 + $0x110] sm:$0xff] }
  0x40   :  { %388 = vmatpush.bf16.msrb.mxu0 %v201_v15 }
  0x41   :  { %430 = vmatpush.bf16.msra.mxu1 %v258_v8 }
  0x42   :  { %440 = vmatpush.bf16.msra.mxu2 %v231_v9 }
  0x43   :  { %416 = vmatpush.bf16.msra.mxu3 %v202_v11  ;;  %389 = vmatmul.bf16.vlgmr.msrb.gmra.mxu0 %v3146_v54 }
  0x44   :  { %2659 = vmatmul.msk.bf16.vlgmr.msra.gmra.mxu1 %vm293_vm0, %v3053_v10 }
  0x45   :  { %455 = vmatpush.bf16.msrb.mxu1 %v280_v12 }
  0x46   :  { %417 = vmatmul.bf16.vlgmr.msra.gmra.mxu3 %v3146_v54  ;;  %441 = vmatpush.bf16.msra.mxu2 %v224_v21 }
  0x47   :  { %483 = vmatpush.bf16.msrb.mxu3 %v281_v18 }
  0x49   :  { %456 = vmatpush.bf16.msrb.mxu1 %v273_v22 }
  0x4a   :  { %442 = vmatpush.bf16.msra.mxu2 %v217_v30 }
  0x4b   :  { %484 = vmatpush.bf16.msrb.mxu3 %v274_v27 }
  0x4d   :  { %457 = vmatpush.bf16.msrb.mxu1 %v266_v31 }
  0x4e   :  { %443 = vmatpush.bf16.msra.mxu2 %v210_v41 }
  0x4f   :  { %485 = vmatpush.bf16.msrb.mxu3 %v267_v37 }
  0x51   :  { %458 = vmatpush.bf16.msrb.mxu1 %v259_v42 }
  0x52   :  { %444 = vmatpush.bf16.msra.mxu2 %v203_v49 }
  0x53   :  { %486 = vmatpush.bf16.msrb.mxu3 %v260_v46 }
  0x54   :  { %2660 = vmatmul.msk.bf16.vlgmr.msrb.gmra.mxu1 %vm293_vm0, %v3053_v10 }
  0x55   :  { %465 = vmatpush.bf16.msra.mxu1 %v253_v45  ;;  %445 = vmatmul.bf16.vlgmr.msra.gmra.mxu2 %v3146_v54 }
  0x56   :  { %2661 = vmatmul.msk.bf16.vlgmr.msrb.gmra.mxu3 %vm293_vm0, %v3053_v10  ;;  %v71_v10 = vld [vmem:[%s5083_s0 + $0x148] sm:$0xff]  ;;  %s2839_s0 = smov 28   ;;  %vm724_vm0 = vcmask 367616  }
  0x57   :  { %v218_v62 = vpack.c.bf16 %v71_v10, %v64_v61 }
  0x59   :  { %466 = vmatpush.bf16.msra.mxu1 %v246_v50 }
  0x5d   :  { %467 = vmatpush.bf16.msra.mxu1 %v239_v53 }
  0x61   :  { %468 = vmatpush.bf16.msra.mxu1 %v232_v57 }
  0x65   :  { %469 = vmatpush.bf16.msra.mxu1 %v225_v60 }
  0x69   :  { %470 = vmatpush.bf16.msra.mxu1 %v218_v62 }
  0x6d   :  { %471 = vmatpush.bf16.msra.mxu1 %v211_v1 }
  0x71   :  { %472 = vmatpush.bf16.msra.mxu1 %v204_v4 }
  0x74   :  { %473 = vmatmul.bf16.vlgmr.msra.gmra.mxu1 %v3146_v54  ;;  %v2835_v54 = vmov 0  }
  0x75   :  { %2716 = vset.pattern.permute.xlu1 %v2835_v54  ;;  %2715 = vset.pattern.permute.xlu0 %v2835_v54 }
  0x76   :  { %2797 = vset.pattern.permute.xlu2 %v2835_v54 }
  0x91   :  { %v320_v5 = vpop.f32.mrf.mxu1 }
  0x99   :  { %v322_v6 = vpop.f32.mrf.mxu1  ;;  %v348_v7 = vpop.f32.mrf.mxu3 }
  0xa0   :  { %v306_v16 = vpop.f32.mrf.mxu0 }
  0xa1   :  { %v350_v9 = vpop.f32.mrf.mxu3  ;;  %v3440_v26 = vadd.f32 %v320_v5, %v306_v16 }
  0xa3   :  { %v512_v32 = vmul.f32 %v3440_v26, %v3440_v26 }
  0xa8   :  { %v334_v12 = vpop.f32.mrf.mxu2  ;;  %v308_v20 = vpop.f32.mrf.mxu0 }
  0xa9   :  { %v376_v13 = vpop.f32.mrf.mxu3  ;;  %v3438_v25 = vadd.f32 %v348_v7, %v334_v12  ;;  %v3461_v41 = vadd.f32 %v322_v6, %v308_v20 }
  0xab   :  { %v513_v28 = vmul.f32 %v3438_v25, %v3438_v25  ;;  %v493_v33 = vadd.f32 %v3438_v25, %v3440_v26  ;;  %v519_v52 = vmul.f32 %v3461_v41, %v3461_v41 }
  0xad   :  { %v526_v37 = vadd.f32 %v513_v28, %v512_v32 }
  0xb0   :  { %v336_v15 = vpop.f32.mrf.mxu2 }
  0xb1   :  { %v362_v8 = vpop.f32.mrf.mxu1  ;;  %v378_v17 = vpop.f32.mrf.mxu3  ;;  %v3454_v36 = vadd.f32 %v350_v9, %v336_v15 }
  0xb2   :  { %v3442_v27 = vadd.f32 %v376_v13, %v362_v8 }
  0xb3   :  { %v520_v47 = vmul.f32 %v3454_v36, %v3454_v36  ;;  %v503_v53 = vadd.f32 %v3454_v36, %v3461_v41 }
  0xb4   :  { %v514_v34 = vmul.f32 %v3442_v27, %v3442_v27  ;;  %v494_v38 = vadd.f32 %v493_v33, %v3442_v27 }
  0xb5   :  { %v535_v59 = vadd.f32 %v520_v47, %v519_v52 }
  0xb6   :  { %v527_v44 = vadd.f32 %v526_v37, %v514_v34  ;;  %v1240_v34 = vld [vmem:[%s5085_s7] sm:$0x88] }
  0xb7   :  { %v1249_v37 = vunpack.c.h.b16 %v1240_v34 }
  0xb8   :  { %v404_v19 = vpop.f32.mrf.mxu2 }
  0xb9   :  { %v364_v11 = vpop.f32.mrf.mxu1 }
  0xba   :  { %v3463_v42 = vadd.f32 %v378_v17, %v364_v11 }
  0xbc   :  { %v521_v55 = vmul.f32 %v3463_v42, %v3463_v42  ;;  %v504_v60 = vadd.f32 %v503_v53, %v3463_v42 }
  0xbe   :  { %v536_v2 = vadd.f32 %v535_v59, %v521_v55  ;;  %v1446_v55 = vld [vmem:[%s5085_s7 + $0x1c] sm:$0x11] }
  0xc0   :  { %v406_v23 = vpop.f32.mrf.mxu2  ;;  %v390_v24 = vpop.f32.mrf.mxu0 }
  0xc1   :  { %v432_v14 = vpop.f32.mrf.mxu1  ;;  %v3446_v29 = vadd.f32 %v404_v19, %v390_v24 }
  0xc3   :  { %v515_v39 = vmul.f32 %v3446_v29, %v3446_v29  ;;  %v495_v45 = vadd.f32 %v494_v38, %v3446_v29 }
  0xc5   :  { %v528_v51 = vadd.f32 %v527_v44, %v515_v39  ;;  %v1256_v39 = vpack.c.b16 %v1249_v37, %v1249_v37 }
  0xc7   :  { %v1358_v47 = vshrl.u32 %v1256_v39, 16 }
  0xc8   :  { %v392_v43 = vpop.f32.mrf.mxu0 }
  0xc9   :  { %v434_v18 = vpop.f32.mrf.mxu1  ;;  %v418_v21 = vpop.f32.mrf.mxu3  ;;  %v3472_v49 = vadd.f32 %v406_v23, %v392_v43 }
  0xca   :  { %v3459_v40 = vadd.f32 %v432_v14, %v418_v21  ;;  %v1119_v21 = vld [vmem:[%s5085_s7] sm:$0x44] }
  0xcb   :  { %v522_v62 = vmul.f32 %v3472_v49, %v3472_v49  ;;  %v505_v5 = vadd.f32 %v504_v60, %v3472_v49  ;;  %v1128_v32 = vunpack.c.h.b16 %v1119_v21  ;;  %v1454_v60 = vunpack.c.l.b16 %v1446_v55 }
  0xcc   :  { %v516_v48 = vmul.f32 %v3459_v40, %v3459_v40  ;;  %v496_v57 = vadd.f32 %v495_v45, %v3459_v40 }
  0xcd   :  { %v537_v11 = vadd.f32 %v536_v2, %v522_v62  ;;  %v1135_v43 = vpack.c.b16 %v1128_v32, %v1128_v32 }
  0xce   :  { %v529_v1 = vadd.f32 %v528_v51, %v516_v48  ;;  %v913_v51 = vld [vmem:[%s5085_s7] sm:$0x22] }
  0xcf   :  { %v1147_v53 = vshrl.u32 %v1135_v43, 16  ;;  %v921_v62 = vunpack.c.l.b16 %v913_v51 }
  0xd1   :  { %v460_v22 = vpop.f32.mrf.mxu1  ;;  %v420_v30 = vpop.f32.mrf.mxu3 }
  0xd2   :  { %v3488_v63 = vadd.f32 %v434_v18, %v420_v30  ;;  %v1127_v30 = vunpack.c.l.b16 %v1119_v21 }
  0xd4   :  { %v523_v12 = vmul.f32 %v3488_v63, %v3488_v63  ;;  %v506_v14 = vadd.f32 %v505_v5, %v3488_v63  ;;  %v1134_v33 = vpack.c.b16 %v1127_v30, %v1127_v30  ;;  %v1461_v5 = vpack.c.b16 %v1454_v60, %v1454_v60 }
  0xd6   :  { %v538_v20 = vadd.f32 %v537_v11, %v523_v12  ;;  %v1142_v44 = vshrl.u32 %v1134_v33, 16  ;;  %v1469_v11 = vpack.i.b16 %v1461_v5, %v1461_v5 }
  0xd8   :  { %v446_v31 = vpop.f32.mrf.mxu2  ;;  %v1143_v52 = vpack.i.b16 %v1142_v44, %v1142_v44 }
  0xd9   :  { %v462_v35 = vpop.f32.mrf.mxu1  ;;  %v3466_v46 = vadd.f32 %v460_v22, %v446_v31  ;;  %v488_v50 = vpop.f32.mrf.mxu3 }
  0xdb   :  { %v517_v58 = vmul.f32 %v3466_v46, %v3466_v46  ;;  %v497_v0 = vadd.f32 %v496_v57, %v3466_v46  ;;  %v1267_v57 = vpack.i.b16 %v1256_v39, %v1256_v39 }
  0xdd   :  { %v530_v8 = vadd.f32 %v529_v1, %v517_v58  ;;  %v1269_v2 = vperm.slane %v1267_v57, 3 }
  0xe0   :  { %v448_v61 = vpop.f32.mrf.mxu2 }
  0xe1   :  { %v3496_v6 = vadd.f32 %v462_v35, %v448_v61  ;;  %v490_v16 = vpop.f32.mrf.mxu3  ;;  %v1248_v35 = vunpack.c.l.b16 %v1240_v34  ;;  %v1455_v61 = vunpack.c.h.b16 %v1446_v55  ;;  %v617_v55 = vld [vmem:[%s5086_s3 + $0x8] sm:$0xff] }
  0xe3   :  { %v524_v15 = vmul.f32 %v3496_v6, %v3496_v6  ;;  %v507_v19 = vadd.f32 %v506_v14, %v3496_v6  ;;  %v1255_v38 = vpack.c.b16 %v1248_v35, %v1248_v35  ;;  %v616_v14 = vld [vmem:[%s5086_s3] sm:$0xff] }
  0xe5   :  { %v539_v54 = vadd.f32 %v538_v20, %v524_v15  ;;  %v1354_v45 = vshrl.u32 %v1255_v38, 16  ;;  %v928_v15 = vpack.c.b16 %v921_v62, %v921_v62  ;;  %v1471_v20 = vperm.slane %v1469_v11, 0  ;;  %v1242_v11 = vld [vmem:[%s5085_s7 + $0x10] sm:$0x88] }
  0xe7   :  { %v1355_v48 = vpack.i.b16 %v1354_v45, %v1354_v45  ;;  %v1027_v30 = vshrl.u32 %v928_v15, 16  ;;  %v1496_v32 = vunpack.c.l.bf16 %v1471_v20  ;;  %v936_v35 = vpack.i.b16 %v928_v15, %v928_v15 }
  0xe9   :  { %v1357_v58 = vperm.slane %v1355_v48, 3  ;;  %v1120_v48 = vld [vmem:[%s5085_s7 + $0x8] sm:$0x44]  ;;  %v938_v60 = vperm.slane %v936_v35, 1 }
  0xf1   :  { %v474_v56 = vpop.f32.mrf.mxu1 }
  0xf2   :  { %v3484_v10 = vadd.f32 %v488_v50, %v474_v56  ;;  %v1359_v50 = vpack.i.b16 %v1358_v47, %v1358_v47  ;;  %v1263_v56 = vpack.i.b16 %v1255_v38, %v1255_v38  ;;  %v1028_v38 = vpack.i.b16 %v1027_v30, %v1027_v30 }
  0xf4   :  { %v499_v3 = vsel %vm498_vm1, %v3484_v10, 0.0  ;;  %v518_v4 = vmul.f32 %v3484_v10, %v3484_v10  ;;  %v1361_v59 = vperm.slane %v1359_v50, 3  ;;  %v1265_v1 = vperm.slane %v1263_v56, 3 }
  0xf5   :  { %v500_v7 = vadd.f32 %v499_v3, %v497_v0  ;;  %v922_v0 = vunpack.c.h.b16 %v913_v51  ;;  %v1382_v3 = vunpack.c.l.bf16 %v1357_v58 }
  0xf6   :  { %v531_v9 = vsel %vm498_vm1, %v518_v4, 0.0  ;;  %v1383_v4 = vunpack.c.l.bf16 %v1361_v59 }
  0xf7   :  { %501 = vadd.xlane.f32.xlu0 %v500_v7  ;;  %v532_v13 = vadd.f32 %v531_v9, %v530_v8  ;;  %v1462_v7 = vpack.c.b16 %v1455_v61, %v1455_v61  ;;  %v1148_v8 = vpack.i.b16 %v1147_v53, %v1147_v53  ;;  %v1030_v53 = vperm.slane %v1028_v38, 1 }
  0xf8   :  { %v2717_v9 = vpack.i.bf16 %v1383_v4, %v1382_v3  ;;  %v1130_v4 = vunpack.c.h.b16 %v1120_v48 }
  0xf9   :  { %v476_v17 = vpop.f32.mrf.mxu1  ;;  %533 = vadd.xlane.f32.xlu1 %v532_v13  ;;  %v1473_v12 = vpack.i.b16 %v1462_v7, %v1462_v7  ;;  %v1145_v13 = vperm.slane %v1143_v52, 2  ;;  %v1055_v62 = vunpack.c.l.bf16 %v1030_v53 }
  0xfa   :  { %v3504_v18 = vadd.f32 %v490_v16, %v476_v17  ;;  %v929_v16 = vpack.c.b16 %v922_v0, %v922_v0  ;;  %v1290_v17 = vunpack.c.l.bf16 %v1265_v1  ;;  %2718 = vrot.lane.b32.xlu2 %v2717_v9, %s2836_s21  ;;  %v1129_v0 = vunpack.c.l.b16 %v1120_v48 }
  0xfb   :  { %v1475_v21 = vperm.slane %v1473_v12, 0  ;;  %v3538_v43 = vunpack.c.l.bf16 %v1145_v13 }
  0xfc   :  { %v508_v22 = vsel %vm498_vm1, %v3504_v18, 0.0  ;;  %v525_v23 = vmul.f32 %v3504_v18, %v3504_v18  ;;  %v940_v51 = vpack.i.b16 %v929_v16, %v929_v16  ;;  %v1136_v9 = vpack.c.b16 %v1129_v0, %v1129_v0 }
  0xfd   :  { %v509_v24 = vadd.f32 %v508_v22, %v507_v19  ;;  %v728_v19 = vld [vmem:[%s5085_s7] sm:$0x11]  ;;  %v1291_v22 = vunpack.c.l.bf16 %v1269_v2  ;;  %v1497_v33 = vunpack.c.l.bf16 %v1475_v21 }
  0xfe   :  { %v540_v28 = vsel %vm498_vm1, %v525_v23, 0.0  ;;  %v736_v23 = vunpack.c.l.b16 %v728_v19  ;;  %v942_v7 = vperm.slane %v940_v51, 1  ;;  %v1152_v20 = vshrl.u32 %v1136_v9, 16 }
  0xff   :  { %510 = vadd.xlane.f32.xlu0 %v509_v24  ;;  %v541_v31 = vadd.f32 %v540_v28, %v539_v54  ;;  %v1150_v24 = vperm.slane %v1148_v8, 2  ;;  %v1241_v54 = vld [vmem:[%s5085_s7 + $0x8] sm:$0x88]  ;;  %v737_v28 = vunpack.c.h.b16 %v728_v19  ;;  %v2722_v44 = vpack.i.bf16 %v1291_v22, %v1290_v17  ;;  %v914_v22 = vld [vmem:[%s5085_s7 + $0x8] sm:$0x22] }
 0x100   :  { %v3534_v34 = vpack.c.b16 %v736_v23, %v736_v23  ;;  %v1250_v45 = vunpack.c.l.b16 %v1241_v54  ;;  %v2742_v56 = vpack.i.bf16 %v1497_v33, %v1496_v32  ;;  %v1251_v57 = vunpack.c.h.b16 %v1241_v54 }
 0x101   :  { %542 = vadd.xlane.f32.xlu1 %v541_v31  ;;  %v1031_v31 = vshrl.u32 %v929_v16, 16  ;;  %v3536_v37 = vpack.c.b16 %v737_v28, %v737_v28  ;;  %v1177_v50 = vunpack.c.l.bf16 %v1150_v24  ;;  %v963_v16 = vunpack.c.l.bf16 %v938_v60 }
 0x102   :  { %v821_v47 = vshrl.u32 %v3534_v34, 16  ;;  %2723 = vrot.lane.b32.xlu2 %v2722_v44, %s2837_s28  ;;  %v1257_v1 = vpack.c.b16 %v1250_v45, %v1250_v45  ;;  %v1258_v12 = vpack.c.b16 %v1251_v57, %v1251_v57  ;;  %v1252_v54 = vunpack.c.l.b16 %v1242_v11  ;;  %v729_v57 = vld [vmem:[%s5085_s7 + $0x8] sm:$0x11] }
 0x103   :  { %v1032_v39 = vpack.i.b16 %v1031_v31, %v1031_v31  ;;  %v825_v52 = vshrl.u32 %v3536_v37, 16  ;;  %v2727_v5 = vpack.i.bf16 %v1177_v50, %v3538_v43  ;;  %v964_v28 = vunpack.c.l.bf16 %v942_v7 }
 0x104   :  { %v822_v58 = vpack.i.b16 %v821_v47, %v821_v47  ;;  %v1362_v15 = vshrl.u32 %v1257_v1, 16  ;;  %v1366_v24 = vshrl.u32 %v1258_v12, 16  ;;  %v1271_v30 = vpack.i.b16 %v1257_v1, %v1257_v1 }
 0x105   :  { %v1034_v59 = vperm.slane %v1032_v39, 1  ;;  %v826_v61 = vpack.i.b16 %v825_v52, %v825_v52  ;;  %v1153_v32 = vpack.i.b16 %v1152_v20, %v1152_v20  ;;  %v1253_v39 = vunpack.c.h.b16 %v1242_v11 }
 0x106   :  { %v824_v2 = vperm.slane %v822_v58, 0  ;;  %v1363_v23 = vpack.i.b16 %v1362_v15, %v1362_v15  ;;  %v1367_v38 = vpack.i.b16 %v1366_v24, %v1366_v24  ;;  %v923_v44 = vunpack.c.l.b16 %v914_v22  ;;  %v915_v58 = vld [vmem:[%s5085_s7 + $0x10] sm:$0x22] }
 0x107   :  { %v1056_v3 = vunpack.c.l.bf16 %v1034_v59  ;;  %v828_v8 = vperm.slane %v826_v61, 0  ;;  %v1155_v43 = vperm.slane %v1153_v32, 2  ;;  %v924_v45 = vunpack.c.h.b16 %v914_v22 }
 0x108   :  { %v849_v13 = vunpack.c.l.bf16 %v824_v2  ;;  %v1365_v35 = vperm.slane %v1363_v23, 3  ;;  %v3557_v47 = vpack.c.b16 %v1252_v54, %v1252_v54  ;;  %v1369_v50 = vperm.slane %v1367_v38, 3 }
 0x109   :  { %v850_v17 = vunpack.c.l.bf16 %v828_v8  ;;  %v2732_v19 = vpack.i.bf16 %v1056_v3, %v1055_v62  ;;  %v3560_v52 = vpack.c.b16 %v1253_v39, %v1253_v39  ;;  %v2737_v53 = vpack.i.bf16 %v964_v28, %v963_v16 }
 0x10a   :  { %v1384_v51 = vunpack.c.l.bf16 %v1365_v35  ;;  %v1178_v59 = vunpack.c.l.bf16 %v1155_v43  ;;  %v1385_v61 = vunpack.c.l.bf16 %v1369_v50  ;;  %v1273_v0 = vperm.slane %v1271_v30, 3 }
 0x10b   :  { %v2747_v31 = vpack.i.bf16 %v850_v17, %v849_v13  ;;  %2733 = vrot.lane.b32.xlu2 %v2732_v19, %s2839_s0  ;;  %v1374_v62 = vshrl.u32 %v3560_v52, 16  ;;  %v930_v1 = vpack.c.b16 %v923_v44, %v923_v44  ;;  %v925_v3 = vunpack.c.l.b16 %v915_v58 }
 0x10c   :  { %v738_v8 = vunpack.c.l.b16 %v729_v57  ;;  %v739_v11 = vunpack.c.h.b16 %v729_v57  ;;  %v1292_v23 = vunpack.c.l.bf16 %v1273_v0 }
 0x10d   :  { %v1375_v7 = vpack.i.b16 %v1374_v62, %v1374_v62  ;;  %v3572_v13 = vpack.c.b16 %v925_v3, %v925_v3  ;;  %v944_v19 = vpack.i.b16 %v930_v1, %v930_v1  ;;  %v1035_v35 = vshrl.u32 %v930_v1, 16 }
 0x10e   :  { %v3581_v54 = vpack.c.b16 %v739_v11, %v739_v11 }
 0x10f   :  { %v1377_v16 = vperm.slane %v1375_v7, 3  ;;  %v1043_v22 = vshrl.u32 %v3572_v13, 16  ;;  %v946_v38 = vperm.slane %v944_v19, 1  ;;  %v1036_v50 = vpack.i.b16 %v1035_v35, %v1035_v35  ;;  %v1243_v19 = vld [vmem:[%s5085_s7 + $0x18] sm:$0x8] }
 0x110   :  { %5124 = vst [vmem:[#allocation3_spill] sm:$0xff] %v3581_v54 }
 0x111   :  { %v1044_v32 = vpack.i.b16 %v1043_v22, %v1043_v22 }
 0x113   :  { %620 = vperm.xlu0 %2715, %v616_v14   ;;  %v1137_v14 = vpack.c.b16 %v1130_v4, %v1130_v4  ;;  %v931_v4 = vpack.c.b16 %v924_v45, %v924_v45 }
 0x115   :  { %v1157_v21 = vshrl.u32 %v1137_v14, 16  ;;  %v948_v20 = vpack.i.b16 %v931_v4, %v931_v4  ;;  %v1039_v44 = vshrl.u32 %v931_v4, 16 }
 0x117   :  { %v1158_v33 = vpack.i.b16 %v1157_v21, %v1157_v21  ;;  %v3577_v21 = vpack.c.b16 %v738_v8, %v738_v8  ;;  %v950_v39 = vperm.slane %v948_v20, 1  ;;  %v1040_v57 = vpack.i.b16 %v1039_v44, %v1039_v44 }
 0x119   :  { %v1160_v48 = vperm.slane %v1158_v33, 2  ;;  %5123 = vst [vmem:[#allocation2_spill] sm:$0xff] %v3577_v21  ;;  %v829_v43 = vshrl.u32 %v3577_v21, 16  ;;  %v1042_v62 = vperm.slane %v1040_v57, 1 }
 0x11a   :  { %625 = vperm.xlu1 %2716, %v617_v55   ;;  %v1275_v55 = vpack.i.b16 %v1258_v12, %v1258_v12  ;;  %v926_v12 = vunpack.c.h.b16 %v915_v58  ;;  %v1038_v58 = vperm.slane %v1036_v50, 1 }
 0x11b   :  { %2743 = vrot.lane.b32.xlu0 %v2742_v56, %s2838_s30  ;;  %v1370_v56 = vshrl.u32 %v3557_v47, 16  ;;  %v1179_v60 = vunpack.c.l.bf16 %v1160_v48  ;;  %v833_v48 = vshrl.u32 %v3581_v54, 16  ;;  %v1058_v7 = vunpack.c.l.bf16 %v1042_v62 }
 0x11c   :  { %v1277_v9 = vperm.slane %v1275_v55, 3  ;;  %v3574_v17 = vpack.c.b16 %v926_v12, %v926_v12  ;;  %v1057_v3 = vunpack.c.l.bf16 %v1038_v58 }
 0x11d   :  { %v1371_v2 = vpack.i.b16 %v1370_v56, %v1370_v56  ;;  %v2762_v14 = vpack.i.bf16 %v1179_v60, %v1178_v59  ;;  %v1448_v56 = vld [vmem:[%s5085_s7 + $0x2c] sm:$0x11]  ;;  %v965_v59 = vunpack.c.l.bf16 %v946_v38  ;;  %v966_v60 = vunpack.c.l.bf16 %v950_v39 }
 0x11e   :  { %v1293_v24 = vunpack.c.l.bf16 %v1277_v9  ;;  %v1047_v28 = vshrl.u32 %v3574_v17, 16  ;;  %v834_v0 = vpack.i.b16 %v833_v48, %v833_v48  ;;  %v1458_v1 = vunpack.c.l.b16 %v1448_v56  ;;  %v1447_v48 = vld [vmem:[%s5085_s7 + $0x24] sm:$0x11] }
 0x11f   :  { %v1373_v15 = vperm.slane %v1371_v2, 3  ;;  %v1459_v2 = vunpack.c.h.b16 %v1448_v56  ;;  %v2767_v9 = vpack.i.bf16 %v1058_v7, %v1057_v3  ;;  %v2772_v11 = vpack.i.bf16 %v966_v60, %v965_v59 }
 0x120   :  { %v1048_v33 = vpack.i.b16 %v1047_v28, %v1047_v28  ;;  %v2757_v45 = vpack.i.bf16 %v1293_v24, %v1292_v23  ;;  %v836_v12 = vperm.slane %v834_v0, 0  ;;  %v1254_v28 = vunpack.c.l.b16 %v1243_v19 }
 0x121   :  { %v1386_v30 = vunpack.c.l.bf16 %v1373_v15  ;;  %v1466_v15 = vpack.c.b16 %v1459_v2, %v1459_v2  ;;  %v1456_v50 = vunpack.c.l.b16 %v1447_v48 }
 0x122   :  { %2728 = vrot.lane.b32.xlu1 %v2727_v5, %s2840_s10  ;;  %v2752_v5 = vpack.i.bf16 %v1385_v61, %v1384_v51  ;;  %v1050_v55 = vperm.slane %v1048_v33, 1  ;;  %v830_v61 = vpack.i.b16 %v829_v43, %v829_v43  ;;  %v852_v22 = vunpack.c.l.bf16 %v836_v12 }
 0x123   :  { %2748 = vrot.lane.b32.xlu0 %v2747_v31, %s2841_s15  ;;  %v1387_v31 = vunpack.c.l.bf16 %v1377_v16  ;;  %v1489_v24 = vpack.i.b16 %v1466_v15, %v1466_v15  ;;  %v1261_v33 = vpack.c.b16 %v1254_v28, %v1254_v28 }
 0x124   :  { %2753 = vrot.lane.b32.xlu2 %v2752_v5, %s2836_s21  ;;  %v1060_v5 = vunpack.c.l.bf16 %v1050_v55  ;;  %v832_v8 = vperm.slane %v830_v61, 0 }
 0x125   :  { %v2782_v51 = vpack.i.bf16 %v1387_v31, %v1386_v30  ;;  %v1378_v39 = vshrl.u32 %v1261_v33, 16  ;;  %v1287_v57 = vpack.i.b16 %v1261_v33, %v1261_v33 }
 0x126   :  { %v851_v20 = vunpack.c.l.bf16 %v832_v8 }
 0x127   :  { %v1379_v44 = vpack.i.b16 %v1378_v39, %v1378_v39  ;;  %v1289_v62 = vperm.slane %v1287_v57, 3 }
 0x128   :  { %v2777_v30 = vpack.i.bf16 %v852_v22, %v851_v20 }
 0x129   :  { %v1296_v3 = vunpack.c.l.bf16 %v1289_v62 }
 0x12a   :  { %2738 = vrot.lane.b32.xlu1 %v2737_v53, %s2842_s16  ;;  %v1046_v53 = vperm.slane %v1044_v32, 1  ;;  %v1491_v32 = vperm.slane %v1489_v24, 0 }
 0x12b   :  { %2763 = vrot.lane.b32.xlu0 %v2762_v14, %s2840_s10  ;;  %v1465_v14 = vpack.c.b16 %v1458_v1, %v1458_v1 }
 0x12c   :  { %v1059_v4 = vunpack.c.l.bf16 %v1046_v53  ;;  %2768 = vrot.lane.b32.xlu2 %v2767_v9, %s2839_s0  ;;  %v1501_v38 = vunpack.c.l.bf16 %v1491_v32  ;;  %v1463_v53 = vpack.c.b16 %v1456_v50, %v1456_v50 }
 0x12d   :  { %v1485_v23 = vpack.i.b16 %v1465_v14, %v1465_v14 }
 0x12e   :  { %v2803_v16 = vpack.i.bf16 %v1060_v5, %v1059_v4  ;;  %v1477_v58 = vpack.i.b16 %v1463_v53, %v1463_v53  ;;  %v1279_v4 = vpack.i.b16 %v3557_v47, %v3557_v47  ;;  %v1283_v5 = vpack.i.b16 %v3560_v52, %v3560_v52 }
 0x12f   :  { %v1487_v31 = vperm.slane %v1485_v23, 0 }
 0x130   :  { %v1479_v60 = vperm.slane %v1477_v58, 0  ;;  %v1281_v7 = vperm.slane %v1279_v4, 3  ;;  %v1285_v8 = vperm.slane %v1283_v5, 3 }
 0x131   :  { %v1500_v35 = vunpack.c.l.bf16 %v1487_v31 }
 0x132   :  { %2758 = vrot.lane.b32.xlu1 %v2757_v45, %s2837_s28  ;;  %v1381_v45 = vperm.slane %v1379_v44, 3  ;;  %v1498_v0 = vunpack.c.l.bf16 %v1479_v60  ;;  %v1294_v9 = vunpack.c.l.bf16 %v1281_v7 }
 0x133   :  { %2783 = vrot.lane.b32.xlu0 %v2782_v51, %s2836_s21  ;;  %v2818_v43 = vpack.i.bf16 %v1501_v38, %v1500_v35  ;;  %v1457_v51 = vunpack.c.h.b16 %v1447_v48 }
 0x134   :  { %v1388_v56 = vunpack.c.l.bf16 %v1381_v45 }
 0x135   :  { %v1464_v55 = vpack.c.b16 %v1457_v51, %v1457_v51 }
 0x137   :  { %v1481_v59 = vpack.i.b16 %v1464_v55, %v1464_v55  ;;  %v574_v55 = vld [vmem:[%s5087_s2] sm:$0xff] }
 0x139   :  { %v1483_v61 = vperm.slane %v1481_v59, 0 }
 0x13a   :  { %2773 = vrot.lane.b32.xlu1 %v2772_v11, %s2842_s16  ;;  %v1295_v11 = vunpack.c.l.bf16 %v1285_v8 }
 0x13b   :  { %2804 = vrot.lane.b32.xlu0 %v2803_v16, %s2839_s0  ;;  %v1499_v1 = vunpack.c.l.bf16 %v1483_v61 }
 0x13c   :  { %v2792_v12 = vpack.i.bf16 %v1295_v11, %v1294_v9 }
 0x13d   :  { %v2787_v2 = vpack.i.bf16 %v1499_v1, %v1498_v0 }
 0x13f   :  { %2788 = vrot.lane.b32.xlu2 %v2787_v2, %s2838_s30  ;;  %v575_v2 = vld [vmem:[%s5087_s2 + $0x8] sm:$0xff] }
 0x142   :  { %2778 = vrot.lane.b32.xlu1 %v2777_v30, %s2841_s15 }
 0x147   :  { %2793 = vrot.lane.b32.xlu2 %v2792_v12, %s2837_s28 }
 0x14a   :  { %2819 = vrot.lane.b32.xlu1 %v2818_v43, %s2838_s30 }
 0x152   :  { %1408 = vrot.lane.b32.xlu1 %v1388_v56, %s2836_s21 }
 0x154   :  { %v3615_v22 = vpop.permute.xlu2 %2718 }
 0x155   :  { %v2721_v60 = vunpack.i.h.bf16 %v3615_v22 }
 0x15a   :  { %1316 = vrot.lane.b32.xlu1 %v1296_v3, %s2837_s28 }
 0x15c   :  { %v3621_v33 = vpop.permute.xlu2 %2723 }
 0x165   :  { %v3623_v45 = vpop.permute.xlu2 %2733 }
 0x166   :  { %v2736_v8 = vunpack.i.h.bf16 %v3623_v45 }
 0x16a   :  { %v502_v14 = vpop.xlane.xlu0 %501 }
 0x16b   :  { %v3611_v15 = vmul.f32 0.0012755102, %v502_v14 }
 0x16c   :  { %v534_v16 = vpop.xlane.xlu1 %533 }
 0x16d   :  { %v546_v19 = vmul.f32 0.0012755102, %v534_v16  ;;  %v548_v47 = vmul.f32 %v3611_v15, %v3611_v15 }
 0x16f   :  { %v550_v20 = vsub.f32 %v546_v19, %v548_v47  ;;  %v2726_v19 = vunpack.i.h.bf16 %v3621_v33 }
 0x171   :  { %v552_v52 = vadd.f32 0.001, %v550_v20 }
 0x172   :  { %v511_v23 = vpop.xlane.xlu0 %510 }
 0x173   :  { %2823 = vrsqrt.f32 %v552_v52  ;;  %v3617_v24 = vmul.f32 0.0012755102, %v511_v23  ;;  %vm560_vm3 = vweird.f32 %v552_v52  ;;  %v956_v23 = vpack.i.b16 %v3574_v17, %v3574_v17 }
 0x174   :  { %v543_v28 = vpop.xlane.xlu1 %542 }
 0x175   :  { %v547_v30 = vmul.f32 0.0012755102, %v543_v28  ;;  %v549_v31 = vmul.f32 %v3617_v24, %v3617_v24  ;;  %v1122_v28 = vld [vmem:[%s5085_s7 + $0x18] sm:$0x4] }
 0x177   :  { %v551_v32 = vsub.f32 %v547_v30, %v549_v31  ;;  %v1133_v30 = vunpack.c.l.b16 %v1122_v28 }
 0x179   :  { %v2824_v35 = vpop.eup %2823  ;;  %v553_v38 = vadd.f32 0.001, %v551_v32 }
 0x17a   :  { %v555_v39 = vmul.f32 %v2824_v35, %v552_v52  ;;  %vm561_vm2 = vweird.f32 %v2824_v35  ;;  %v952_v52 = vpack.i.b16 %v3572_v13, %v3572_v13 }
 0x17b   :  { %2825 = vrsqrt.f32 %v553_v38  ;;  %vm562_vm4 = vmor %vm560_vm3, %vm561_vm2  ;;  %vm570_vm7 = vweird.f32 %v553_v38  ;;  %vm1954_vm2 = vcmask 580608   ;;  %vm1897_vm3 = vcmask 588800  }
 0x17c   :  { %v556_v43 = vmul.f32 %v2824_v35, %v555_v39  ;;  %v954_v32 = vperm.slane %v952_v52, 1 }
 0x17e   :  { %v557_v44 = vmul.f32 0.5, %v556_v43  ;;  %v3629_v61 = vpop.permute.xlu2 %2753  ;;  %v967_v39 = vunpack.c.l.bf16 %v954_v32 }
 0x17f   :  { %v2755_v0 = vunpack.i.l.bf16 %v3629_v61 }
 0x180   :  { %v558_v48 = vsub.f32 1.5, %v557_v44 }
 0x181   :  { %v2826_v50 = vpop.eup %2825  ;;  %v3640_v3 = vsel %vm1410_vm5, %v2721_v60, %v2755_v0 }
 0x182   :  { %v565_v51 = vmul.f32 %v2826_v50, %v553_v38  ;;  %v559_v53 = vmul.f32 %v2824_v35, %v558_v48  ;;  %vm571_vm6 = vweird.f32 %v2826_v50  ;;  %v1140_v38 = vpack.c.b16 %v1133_v30, %v1133_v30 }
 0x183   :  { %vm572_vm8 = vmor %vm570_vm7, %vm571_vm6  ;;  %vm2011_vm6 = vcmask 572416   ;;  %vm1753_vm7 = vcmask 818176  }
 0x184   :  { %v566_v56 = vmul.f32 %v2826_v50, %v565_v51  ;;  %v563_v57 = vsel %vm562_vm4, %v2824_v35, %v559_v53  ;;  %v958_v35 = vperm.slane %v956_v23, 1  ;;  %v1172_v43 = vshrl.u32 %v1140_v38, 16  ;;  %v730_v53 = vld [vmem:[%s5085_s7 + $0x10] sm:$0x11] }
 0x185   :  { %v576_v58 = vmul.f32 %v574_v55, %v563_v57  ;;  %vm1840_vm4 = vcmask 801792  }
 0x186   :  { %v567_v59 = vmul.f32 0.5, %v566_v56  ;;  %v3645_v9 = vpop.permute.xlu2 %2768  ;;  %v968_v13 = vunpack.c.l.bf16 %v958_v35  ;;  %v740_v56 = vunpack.c.l.b16 %v730_v53 }
 0x187   :  { %594 = vperm.xlu2 %2797, %v576_v58   ;;  %v5099_v11 = vunpack.i.l.bf16 %v3645_v9  ;;  %v741_v58 = vunpack.c.h.b16 %v730_v53 }
 0x188   :  { %v568_v62 = vsub.f32 1.5, %v567_v59  ;;  %v2808_v44 = vpack.i.bf16 %v968_v13, %v967_v39 }
 0x189   :  { %v3655_v14 = vsel %vm1083_vm9, %v2736_v8, %v5099_v11 }
 0x18a   :  { %v569_v1 = vmul.f32 %v2826_v50, %v568_v62  ;;  %2809 = vrot.lane.b32.xlu0 %v2808_v44, %s2842_s16  ;;  %v3692_v62 = vpack.c.b16 %v740_v56, %v740_v56 }
 0x18c   :  { %v573_v4 = vsel %vm572_vm8, %v2826_v50, %v569_v1  ;;  %v3642_v5 = vpop.permute.xlu1 %625  ;;  %v1173_v50 = vpack.i.b16 %v1172_v43, %v1172_v43  ;;  %5125 = vst [vmem:[#allocation4_spill] sm:$0xff] %v3692_v62  ;;  %vm1696_vm8 = vcmask 1031168  }
 0x18d   :  { %v577_v7 = vmul.f32 %v575_v2, %v573_v4  ;;  %v3696_v2 = vpack.c.b16 %v741_v58, %v741_v58  ;;  %v837_v4 = vshrl.u32 %v3692_v62, 16 }
 0x18e   :  { %v1175_v55 = vperm.slane %v1173_v50, 2 }
 0x18f   :  { %599 = vperm.xlu2 %2797, %v577_v7   ;;  %5126 = vst [vmem:[#allocation5_spill] sm:$0xff] %v3696_v2  ;;  %v841_v7 = vshrl.u32 %v3696_v2, 16  ;;  %v838_v23 = vpack.i.b16 %v837_v4, %v837_v4 }
 0x190   :  { %v1182_v59 = vunpack.c.l.bf16 %v1175_v55 }
 0x191   :  { %v842_v28 = vpack.i.b16 %v841_v7, %v841_v7  ;;  %v840_v30 = vperm.slane %v838_v23, 0 }
 0x192   :  { %1202 = vrot.lane.b32.xlu1 %v1182_v59, %s2840_s10  ;;  %v1121_v59 = vld [vmem:[%s5085_s7 + $0x10] sm:$0x44] }
 0x193   :  { %v844_v32 = vperm.slane %v842_v28, 0  ;;  %v853_v38 = vunpack.c.l.bf16 %v840_v30  ;;  %v1131_v4 = vunpack.c.l.b16 %v1121_v59  ;;  %v1132_v7 = vunpack.c.h.b16 %v1121_v59 }
 0x194   :  { %v3648_v12 = vpop.permute.xlu1 %2728  ;;  %v580_v59 = vsub.f32 %v3442_v27, %v3611_v15 }
 0x195   :  { %v854_v13 = vunpack.c.l.bf16 %v844_v32  ;;  %v1138_v23 = vpack.c.b16 %v1131_v4, %v1131_v4  ;;  %v1139_v28 = vpack.c.b16 %v1132_v7, %v1132_v7  ;;  %v581_v4 = vsub.f32 %v3446_v29, %v3611_v15 }
 0x197   :  { %v2813_v50 = vpack.i.bf16 %v854_v13, %v853_v38  ;;  %v1162_v30 = vshrl.u32 %v1138_v23, 16  ;;  %v1167_v32 = vshrl.u32 %v1139_v28, 16  ;;  %v578_v23 = vsub.f32 %v3440_v26, %v3611_v15  ;;  %v621_v28 = vpop.permute.xlu0 %620 }
 0x199   :  { %v3694_v1 = vpop.permute.xlu2 %2788  ;;  %2814 = vrot.lane.b32.xlu0 %v2813_v50, %s2841_s15  ;;  %v1163_v38 = vpack.i.b16 %v1162_v30, %v1162_v30  ;;  %v1168_v13 = vpack.i.b16 %v1167_v32, %v1167_v32 }
 0x19a   :  { %v5096_v44 = vunpack.i.h.bf16 %v3694_v1 }
 0x19b   :  { %v1165_v50 = vperm.slane %v1163_v38, 2 }
 0x19c   :  { %v3657_v16 = vpop.permute.xlu1 %2738 }
 0x19d   :  { %v5098_v17 = vunpack.i.h.bf16 %v3657_v16 }
 0x1a1   :  { %v3704_v39 = vpop.permute.xlu2 %2793 }
 0x1a2   :  { %5127 = vst [vmem:[#allocation6_spill] sm:$0xff] %v3704_v39  ;;  %v5092_v43 = vunpack.i.l.bf16 %v3704_v39 }
 0x1a4   :  { %v3660_v47 = vpop.permute.xlu1 %2758 }
 0x1a5   :  { %v5094_v20 = vunpack.i.l.bf16 %v3660_v47  ;;  %v5095_v35 = vunpack.i.h.bf16 %v3660_v47 }
 0x1a7   :  { %v3675_v31 = vsel %vm1318_vm10, %v2726_v19, %v5094_v20  ;;  %v3715_v55 = vsel %vm1318_vm10, %v5095_v35, %v5092_v43  ;;  %v1170_v43 = vperm.slane %v1168_v13, 2 }
 0x1a9   :  { %v1181_v20 = vunpack.c.l.bf16 %v1170_v43 }
 0x1ac   :  { %v3678_v48 = vpop.permute.xlu1 %2773 }
 0x1ad   :  { %v5093_v51 = vunpack.i.l.bf16 %v3678_v48 }
 0x1af   :  { %v3690_v57 = vsel %vm991_vm11, %v5098_v17, %v5093_v51  ;;  %v1180_v51 = vunpack.c.l.bf16 %v1165_v50 }
 0x1b1   :  { %v2798_v35 = vpack.i.bf16 %v1181_v20, %v1180_v51  ;;  %v579_v20 = vsub.f32 %v3438_v25, %v3611_v15  ;;  %v584_v51 = vsub.f32 %v3484_v10, %v3611_v15  ;;  %v589_v25 = vsub.f32 %v3488_v63, %v3617_v24 }
 0x1b2   :  { %v590_v10 = vsub.f32 %v3496_v6, %v3617_v24  ;;  %v586_v63 = vsub.f32 %v3454_v36, %v3617_v24  ;;  %v591_v6 = vsub.f32 %v3504_v18, %v3617_v24 }
 0x1b3   :  { %2799 = vrot.lane.b32.xlu2 %v2798_v35, %s2840_s10  ;;  %s2844_s10 = smov 99  }
 0x1b4   :  { %v3701_v52 = vpop.permute.xlu1 %2778 }
 0x1bc   :  { %v3708_v53 = vpop.permute.xlu1 %2819 }
 0x1bd   :  { %5128 = vst [vmem:[#allocation7_spill] sm:$0xff] %v3708_v53  ;;  %v5097_v56 = vunpack.i.l.bf16 %v3708_v53 }
 0x1bf   :  { %v3724_v58 = vsel %vm1524_vm12, %v5096_v44, %v5097_v56  ;;  %v582_v44 = vsub.f32 %v3459_v40, %v3611_v15  ;;  %v583_v56 = vsub.f32 %v3466_v46, %v3611_v15 }
 0x1c0   :  { %5129 = vst [vmem:[#allocation8_spill] sm:$0xff] %v3724_v58 }
 0x1e1   :  { %v595_v7 = vpop.permute.xlu2 %594 }
 0x1e2   :  { %v606_v40 = vmul.f32 %v595_v7, %v582_v44  ;;  %v607_v35 = vmul.f32 %v595_v7, %v583_v56  ;;  %v604_v43 = vmul.f32 %v595_v7, %v580_v59  ;;  %v605_v46 = vmul.f32 %v595_v7, %v581_v4 }
 0x1e3   :  { %v602_v30 = vmul.f32 %v595_v7, %v578_v23  ;;  %v603_v27 = vmul.f32 %v595_v7, %v579_v20  ;;  %v608_v32 = vmul.f32 %v595_v7, %v584_v51  ;;  %v587_v56 = vsub.f32 %v3463_v42, %v3617_v24 }
 0x1e4   :  { %v632_v38 = vadd.f32 %v621_v28, %v606_v40  ;;  %v633_v29 = vadd.f32 %v621_v28, %v607_v35  ;;  %v630_v13 = vadd.f32 %v621_v28, %v604_v43  ;;  %v631_v50 = vadd.f32 %v621_v28, %v605_v46 }
 0x1e5   :  { %v628_v17 = vadd.f32 %v621_v28, %v602_v30  ;;  %v629_v26 = vadd.f32 %v621_v28, %v603_v27  ;;  %v634_v11 = vadd.f32 %v621_v28, %v608_v32  ;;  %v588_v59 = vsub.f32 %v3472_v49, %v3617_v24 }
 0x1e6   :  { %v646_v15 = vmax.f32 %v632_v38, 0.0  ;;  %v647_v44 = vmax.f32 %v633_v29, 0.0  ;;  %v644_v4 = vmax.f32 %v630_v13, 0.0  ;;  %v645_v7 = vmax.f32 %v631_v50, 0.0 }
 0x1e7   :  { %v585_v23 = vsub.f32 %v3461_v41, %v3617_v24  ;;  %v642_v51 = vmax.f32 %v628_v17, 0.0  ;;  %v643_v40 = vmax.f32 %v629_v26, 0.0  ;;  %v648_v46 = vmax.f32 %v634_v11, 0.0 }
 0x1e8   :  { %v658_v28 = vpack.c.bf16 %v647_v44, %v646_v15  ;;  %v657_v36 = vpack.c.bf16 %v645_v7, %v644_v4 }
 0x1e9   :  { %v600_v20 = vpop.permute.xlu2 %599  ;;  %v656_v24 = vpack.c.bf16 %v643_v40, %v642_v51 }
 0x1ea   :  { %v613_v35 = vmul.f32 %v600_v20, %v589_v25  ;;  %v614_v43 = vmul.f32 %v600_v20, %v590_v10  ;;  %v611_v42 = vmul.f32 %v600_v20, %v587_v56  ;;  %v612_v49 = vmul.f32 %v600_v20, %v588_v59 }
 0x1eb   :  { %v609_v30 = vmul.f32 %v600_v20, %v585_v23  ;;  %v610_v27 = vmul.f32 %v600_v20, %v586_v63  ;;  %v615_v15 = vmul.f32 %v600_v20, %v591_v6  ;;  %v677_v56 = vunpack.c.h.b16 %v658_v28 }
 0x1ec   :  { %v639_v32 = vadd.f32 %v3642_v5, %v613_v35  ;;  %v640_v41 = vadd.f32 %v3642_v5, %v614_v43  ;;  %v637_v38 = vadd.f32 %v3642_v5, %v611_v42  ;;  %v638_v17 = vadd.f32 %v3642_v5, %v612_v49 }
 0x1ed   :  { %v635_v29 = vadd.f32 %v3642_v5, %v609_v30  ;;  %v636_v18 = vadd.f32 %v3642_v5, %v610_v27  ;;  %v675_v59 = vunpack.c.h.b16 %v657_v36  ;;  %v659_v23 = vpack.c.bf16 %v648_v46, %v648_v46 }
 0x1ee   :  { %v653_v13 = vmax.f32 %v639_v32, 0.0  ;;  %v654_v11 = vmax.f32 %v640_v41, 0.0  ;;  %v651_v50 = vmax.f32 %v637_v38, 0.0  ;;  %v652_v26 = vmax.f32 %v638_v17, 0.0 }
 0x1ef   :  { %v649_v25 = vmax.f32 %v635_v29, 0.0  ;;  %v650_v10 = vmax.f32 %v636_v18, 0.0  ;;  %v672_v7 = vunpack.c.l.b16 %v656_v24  ;;  %v641_v35 = vadd.f32 %v3642_v5, %v615_v15  ;;  %v3777_v15 = vpop.permute.xlu0 %2743 }
 0x1f0   :  { %v662_v44 = vpack.c.bf16 %v654_v11, %v653_v13  ;;  %v661_v63 = vpack.c.bf16 %v652_v26, %v651_v50  ;;  %v676_v42 = vunpack.c.l.b16 %v658_v28  ;;  %v673_v51 = vunpack.c.h.b16 %v656_v24  ;;  %v3765_v11 = vpop.permute.xlu1 %1408  ;;  %5133 = vst [vmem:[#allocation12_spill] sm:$0xff] %v3777_v15 }
 0x1f1   :  { %v660_v4 = vpack.c.bf16 %v650_v10, %v649_v25  ;;  %v655_v32 = vmax.f32 %v641_v35, 0.0  ;;  %v674_v20 = vunpack.c.l.b16 %v657_v36  ;;  %v678_v5 = vunpack.c.l.b16 %v659_v23  ;;  %5130 = vst [vmem:[#allocation9_spill] sm:$0xff] %v3765_v11 }
 0x1f2   :  { %v684_v43 = vunpack.c.h.b16 %v662_v44  ;;  %v683_v49 = vunpack.c.l.b16 %v662_v44  ;;  %v682_v40 = vunpack.c.h.b16 %v661_v63  ;;  %v681_v6 = vunpack.c.l.b16 %v661_v63 }
 0x1f3   :  { %v679_v30 = vunpack.c.l.b16 %v660_v4  ;;  %v680_v27 = vunpack.c.h.b16 %v660_v4  ;;  %v663_v18 = vpack.c.bf16 %v655_v32, %v655_v32  ;;  %v755_v23 = vpack.i.b16 %v3536_v37, %v3536_v37 }
 0x1f4   :  { %v691_v41 = vpack.c.b16 %v684_v43, %v677_v56  ;;  %v690_v38 = vpack.c.b16 %v683_v49, %v676_v42  ;;  %v689_v17 = vpack.c.b16 %v682_v40, %v675_v59  ;;  %v688_v13 = vpack.c.b16 %v681_v6, %v674_v20 }
 0x1f5   :  { %v686_v29 = vpack.c.b16 %v679_v30, %v672_v7  ;;  %v687_v46 = vpack.c.b16 %v680_v27, %v673_v51  ;;  %v685_v28 = vunpack.c.l.b16 %v663_v18  ;;  %v751_v59 = vpack.i.b16 %v3534_v34, %v3534_v34 }
 0x1f6   :  { %703 = vrot.lane.b32.xlu0 %v691_v41, %s2843_s1  ;;  %699 = vrot.lane.b32.xlu1 %v689_v17, %s2843_s1  ;;  %v2720_v4 = vunpack.i.l.bf16 %v3615_v22  ;;  %v3791_v7 = vunpack.i.l.bf16 %v3621_v33  ;;  %v2735_v42 = vunpack.i.l.bf16 %v3623_v45  ;;  %v2756_v49 = vunpack.i.h.bf16 %v3629_v61 }
 0x1f7   :  { %693 = vrot.lane.b32.xlu2 %v686_v29, %s2843_s1  ;;  %v692_v24 = vpack.c.b16 %v685_v28, %v678_v5  ;;  %v3779_v44 = vpop.permute.xlu0 %2748  ;;  %v3793_v43 = vperm.slane %v751_v59, 0  ;;  %v3798_v51 = vperm.slane %v755_v23, 0  ;;  %v5104_v30 = vunpack.i.h.bf16 %v3645_v9 }
 0x1f8   :  { %v3767_v36 = vpop.permute.xlu1 %1316  ;;  %v1411_v27 = vsel %vm1410_vm5, %v2720_v4, %v2721_v60  ;;  %v1319_v32 = vsel %vm1318_vm10, %v3791_v7, %v2726_v19  ;;  %v2731_v41 = vunpack.i.h.bf16 %v3648_v12  ;;  %v3816_v20 = vunpack.i.l.bf16 %v3657_v16 }
 0x1f9   :  { %5131 = vst [vmem:[#allocation10_spill] sm:$0xff] %v3767_v36  ;;  %v5100_v6 = vunpack.i.h.bf16 %v3777_v15  ;;  %v3820_v17 = vunpack.i.l.bf16 %v3777_v15  ;;  %v1084_v33 = vsel %vm1083_vm9, %v2735_v42, %v2736_v8  ;;  %v3829_v60 = vsel %vm1410_vm5, %v2755_v0, %v2756_v49 }
 0x1fa   :  { %5135 = vst [vmem:[#allocation14_spill] sm:$0xff] %v3793_v43  ;;  %v2751_v29 = vunpack.i.h.bf16 %v3779_v44  ;;  %v3840_v45 = vunpack.i.l.bf16 %v3779_v44  ;;  %v5137_v61 = vunpack.i.l.bf16 %v3645_v9  ;;  %v5138_v5 = vunpack.i.h.bf16 %v3657_v16 }
 0x1fb   :  { %5136 = vst [vmem:[#allocation15_spill] sm:$0xff] %v3798_v51  ;;  %v3836_v19 = vsel %vm1524_vm12, %v3820_v17, %v5100_v6  ;;  %v5141_v16 = vunpack.i.l.bf16 %v3660_v47  ;;  %v5111_v11 = vunpack.i.h.bf16 %v3701_v52 }
 0x1fc   :  { %v3847_v0 = vsel %vm1083_vm9, %v5137_v61, %v5104_v30  ;;  %v3859_v28 = vsel %vm991_vm11, %v3816_v20, %v5138_v5 }
 0x1fe   :  { %701 = vrot.lane.b32.xlu1 %v690_v38, %s2843_s1  ;;  %v2730_v38 = vunpack.i.l.bf16 %v3648_v12 }
 0x1ff   :  { %695 = vrot.lane.b32.xlu2 %v687_v46, %s2843_s1  ;;  %v3781_v56 = vpop.permute.xlu0 %2763 }
 0x200   :  { %v2765_v22 = vunpack.i.l.bf16 %v3781_v56  ;;  %v1205_v8 = vsel %vm1204_vm13, %v2730_v38, %v2731_v41  ;;  %v5102_v46 = vunpack.i.h.bf16 %v3781_v56 }
 0x202   :  { %v3881_v5 = vsel %vm1204_vm13, %v2765_v22, %v5102_v46 }
 0x204   :  { %v1203_v26 = vpop.permute.xlu1 %1202 }
 0x206   :  { %705 = vrot.lane.b32.xlu1 %v692_v24, %s2843_s1  ;;  %v3863_v24 = vsel %vm877_vm15, %v3840_v45, %v2751_v29 }
 0x207   :  { %697 = vrot.lane.b32.xlu2 %v688_v13, %s2843_s1  ;;  %v3787_v63 = vpop.permute.xlu0 %2783 }
 0x208   :  { %5134 = vst [vmem:[#allocation13_spill] sm:$0xff] %v3787_v63  ;;  %v2785_v12 = vunpack.i.l.bf16 %v3787_v63  ;;  %v5103_v44 = vunpack.i.h.bf16 %v3787_v63 }
 0x20a   :  { %v3891_v37 = vsel %vm1410_vm5, %v2785_v12, %v5103_v44 }
 0x20d   :  { %v3769_v50 = vpop.permute.xlu2 %2799 }
 0x20e   :  { %v5101_v25 = vunpack.i.h.bf16 %v3769_v50 }
 0x20f   :  { %v3869_v59 = vpop.permute.xlu0 %2804 }
 0x210   :  { %v3775_v10 = vsel %vm1204_vm13, %v5101_v25, %v1203_v26  ;;  %v3866_v26 = vsel %vm1204_vm13, %v2731_v41, %v2765_v22  ;;  %5139 = vst [vmem:[#allocation16_spill] sm:$0xff] %v3869_v59  ;;  %v3884_v41 = vsel %vm1410_vm5, %v2756_v49, %v2785_v12  ;;  %v2806_v49 = vunpack.i.l.bf16 %v3869_v59 }
 0x211   :  { %5132 = vst [vmem:[#allocation11_spill] sm:$0xff] %v3775_v10 }
 0x251   :  { %v694_v35 = vpop.permute.xlu2 %693 }
 0x252   :  { %v722_v34 = vsel %vm707_vm14, 0, %v694_v35 }
 0x253   :  { %1769 = vrot.lane.b32.xlu1 %v722_v34, %s2844_s10  ;;  %v3851_v18 = vunpack.c.l.bf16 %v722_v34  ;;  %v3853_v13 = vunpack.c.h.bf16 %v722_v34  ;;  %v5140_v34 = vunpack.i.h.bf16 %v3660_v47 }
 0x255   :  { %v3876_v61 = vsel %vm1318_vm10, %v5141_v16, %v5140_v34  ;;  %v1218_v16 = vmul.f32 %v2730_v38, %v3851_v18  ;;  %v1424_v30 = vmul.f32 %v2720_v4, %v3851_v18 }
 0x259   :  { %v696_v23 = vpop.permute.xlu2 %695 }
 0x25a   :  { %v708_v6 = vsel %vm707_vm14, %v694_v35, %v696_v23  ;;  %v1225_v35 = vmul.f32 %v2730_v38, %v3853_v13  ;;  %v1097_v38 = vmul.f32 %v2735_v42, %v3851_v18 }
 0x25b   :  { %1771 = vrot.lane.b32.xlu0 %v708_v6, %s2844_s10  ;;  %v3894_v47 = vunpack.c.l.bf16 %v708_v6  ;;  %v3896_v34 = vunpack.c.h.bf16 %v708_v6  ;;  %v1431_v6 = vmul.f32 %v2720_v4, %v3853_v13 }
 0x25d   :  { %v1219_v25 = vmul.f32 %v1205_v8, %v3894_v47  ;;  %v1226_v46 = vmul.f32 %v1205_v8, %v3896_v34  ;;  %v1425_v12 = vmul.f32 %v1411_v27, %v3894_v47  ;;  %v1432_v44 = vmul.f32 %v1411_v27, %v3896_v34 }
 0x25e   :  { %v1098_v22 = vmul.f32 %v1084_v33, %v3894_v47  ;;  %v1105_v40 = vmul.f32 %v1084_v33, %v3896_v34  ;;  %v1104_v8 = vmul.f32 %v2735_v42, %v3853_v13  ;;  %v2780_v27 = vunpack.i.l.bf16 %v3701_v52 }
 0x25f   :  { %v3910_v10 = vpack.c.bf16 %v1219_v25, %v1218_v16  ;;  %v3912_v63 = vpack.c.bf16 %v1226_v46, %v1225_v35  ;;  %v3918_v36 = vpack.c.bf16 %v1425_v12, %v1424_v30  ;;  %v3920_v51 = vpack.c.bf16 %v1432_v44, %v1431_v6 }
 0x260   :  { %v3924_v33 = vpack.c.bf16 %v1098_v22, %v1097_v38  ;;  %v3926_v46 = vpack.c.bf16 %v1105_v40, %v1104_v8  ;;  %v1333_v35 = vmul.f32 %v1319_v32, %v3894_v47  ;;  %v1340_v30 = vmul.f32 %v1319_v32, %v3896_v34 }
 0x261   :  { %v698_v4 = vpop.permute.xlu2 %697  ;;  %v1806_v43 = vunpack.c.h.b16 %v3910_v10  ;;  %v1813_v25 = vunpack.c.h.b16 %v3912_v63  ;;  %v5142_v44 = vunpack.i.h.bf16 %v3678_v48  ;;  %v5143_v12 = vunpack.i.l.bf16 %v3678_v48 }
 0x262   :  { %v709_v42 = vsel %vm707_vm14, %v696_v23, %v698_v4  ;;  %v5144_v22 = vunpack.i.h.bf16 %v3645_v9  ;;  %v5145_v38 = vunpack.i.h.bf16 %v3869_v59  ;;  %v3951_v8 = vsel %vm877_vm15, %v2751_v29, %v2780_v27 }
 0x263   :  { %v3937_v6 = vsel %vm991_vm11, %v5143_v12, %v5142_v44  ;;  %1773 = vrot.lane.b32.xlu0 %v709_v42, %s2844_s10  ;;  %v1820_v32 = vpack.c.b16 %v1813_v25, %v1806_v43  ;;  %v1332_v44 = vmul.f32 %v3791_v7, %v3851_v18  ;;  %v1339_v9 = vmul.f32 %v3791_v7, %v3853_v13 }
 0x264   :  { %v3942_v40 = vsel %vm1083_vm9, %v5144_v22, %v2806_v49  ;;  %v3947_v23 = vsel %vm1083_vm9, %v2806_v49, %v5145_v38  ;;  %v1919_v49 = vunpack.c.l.b16 %v3918_v36  ;;  %v1926_v12 = vunpack.c.l.b16 %v3920_v51 }
 0x265   :  { %5146 = vst [vmem:[#allocation17_spill] sm:$0xff] %v3947_v23  ;;  %1828 = vrot.lane.b32.xlu1 %v1820_v32, %s2845_s11  ;;  %v1718_v43 = vunpack.c.l.b16 %v3924_v33  ;;  %v1725_v29 = vunpack.c.l.b16 %v3926_v46  ;;  %v3966_v25 = vsel %vm877_vm15, %v2780_v27, %v5111_v11  ;;  %v5148_v22 = vunpack.i.h.bf16 %v3704_v39  ;;  %v3975_v32 = vpop.permute.xlu0 %2809 }
 0x266   :  { %5147 = vst [vmem:[#allocation18_spill] sm:$0xff] %v3966_v25  ;;  %v5149_v7 = vunpack.i.l.bf16 %v3704_v39  ;;  %v3977_v16 = vpack.c.bf16 %v1333_v35, %v1332_v44  ;;  %v3979_v59 = vpack.c.bf16 %v1340_v30, %v1339_v9  ;;  %v1006_v27 = vmul.f32 %v3859_v28, %v3894_v47 }
 0x267   :  { %5150 = vst [vmem:[#allocation19_spill] sm:$0xff] %v3975_v32  ;;  %v1013_v11 = vmul.f32 %v3859_v28, %v3896_v34  ;;  %v5151_v39 = vunpack.i.l.bf16 %v3769_v50  ;;  %v1920_v35 = vunpack.c.h.b16 %v3918_v36  ;;  %v1005_v30 = vmul.f32 %v3816_v20, %v3851_v18 }
 0x268   :  { %v3973_v38 = vsel %vm1318_vm10, %v5149_v7, %v5148_v22  ;;  %v5152_v22 = vunpack.i.h.bf16 %v3781_v56  ;;  %v1012_v44 = vmul.f32 %v3816_v20, %v3853_v13  ;;  %v3999_v9 = vunpack.c.l.bf16 %v709_v42  ;;  %v4003_v28 = vpop.permute.xlu1 %699 }
 0x269   :  { %v4001_v21 = vunpack.c.h.bf16 %v709_v42  ;;  %v1933_v15 = vpack.c.b16 %v1926_v12, %v1919_v49  ;;  %v1732_v54 = vpack.c.b16 %v1725_v29, %v1718_v43  ;;  %v1927_v56 = vunpack.c.h.b16 %v3920_v51 }
 0x26a   :  { %v3992_v7 = vsel %vm1204_vm13, %v5152_v22, %v5151_v39  ;;  %v710_v39 = vsel %vm707_vm14, %v698_v4, %v4003_v28  ;;  %v1862_v36 = vunpack.c.l.b16 %v3977_v16  ;;  %v1869_v22 = vunpack.c.l.b16 %v3979_v59 }
 0x26b   :  { %1775 = vrot.lane.b32.xlu2 %v710_v39, %s2844_s10  ;;  %v4011_v20 = vunpack.c.l.bf16 %v710_v39  ;;  %v4013_v62 = vunpack.c.h.bf16 %v710_v39  ;;  %1940 = vrot.lane.b32.xlu0 %v1933_v15, %s2846_s12  ;;  %v4016_v42 = vpack.c.bf16 %v1006_v27, %v1005_v30  ;;  %v4018_v49 = vpack.c.bf16 %v1013_v11, %v1012_v44 }
 0x26c   :  { %v1863_v4 = vunpack.c.h.b16 %v3977_v16  ;;  %v1870_v51 = vunpack.c.h.b16 %v3979_v59  ;;  %v1538_v12 = vmul.f32 %v3820_v17, %v3851_v18  ;;  %v1545_v43 = vmul.f32 %v3820_v17, %v3853_v13 }
 0x26d   :  { %1739 = vrot.lane.b32.xlu1 %v1732_v54, %s2847_s13  ;;  %v1426_v15 = vmul.f32 %v3640_v3, %v3999_v9  ;;  %v1427_v11 = vmul.f32 %v3829_v60, %v4011_v20  ;;  %v1433_v16 = vmul.f32 %v3640_v3, %v4001_v21  ;;  %v1434_v59 = vmul.f32 %v3829_v60, %v4013_v62  ;;  %v4041_v58 = vpop.permute.xlu0 %2814 }
 0x26e   :  { %v1934_v29 = vpack.c.b16 %v1927_v56, %v1920_v35  ;;  %v1876_v27 = vpack.c.b16 %v1869_v22, %v1862_v36  ;;  %v1539_v17 = vmul.f32 %v3836_v19, %v3894_v47  ;;  %v1546_v54 = vmul.f32 %v3836_v19, %v3896_v34 }
 0x26f   :  { %v1661_v30 = vunpack.c.l.b16 %v4016_v42  ;;  %v1668_v44 = vunpack.c.l.b16 %v4018_v49  ;;  %v1439_v39 = vpack.c.bf16 %v1427_v11, %v1426_v15  ;;  %v1443_v2 = vpack.c.bf16 %v1434_v59, %v1433_v16 }
 0x270   :  { %v1334_v3 = vmul.f32 %v3675_v31, %v3999_v9  ;;  %v1335_v60 = vmul.f32 %v3876_v61, %v4011_v20  ;;  %v1341_v35 = vmul.f32 %v3675_v31, %v4001_v21  ;;  %v1342_v19 = vmul.f32 %v3876_v61, %v4013_v62 }
 0x271   :  { %v1719_v56 = vunpack.c.h.b16 %v3924_v33  ;;  %v1726_v36 = vunpack.c.h.b16 %v3926_v46  ;;  %v1921_v22 = vunpack.c.l.b16 %v1439_v39  ;;  %v1928_v15 = vunpack.c.l.b16 %v1443_v2 }
 0x272   :  { %v4053_v11 = vpack.c.bf16 %v1539_v17, %v1538_v12  ;;  %v4055_v16 = vpack.c.bf16 %v1546_v54, %v1545_v43  ;;  %v4057_v59 = vpack.c.bf16 %v1335_v60, %v1334_v3  ;;  %v4059_v25 = vpack.c.bf16 %v1342_v19, %v1341_v35 }
 0x273   :  { %v5153_v23 = vunpack.i.h.bf16 %v3769_v50  ;;  %v5154_v31 = vunpack.i.l.bf16 %v3769_v50  ;;  %v2811_v33 = vunpack.i.l.bf16 %v3975_v32  ;;  %1942 = vrot.lane.b32.xlu2 %v1934_v29, %s2846_s12  ;;  %1883 = vrot.lane.b32.xlu0 %v1876_v27, %s2848_s14  ;;  %v1675_v46 = vpack.c.b16 %v1668_v44, %v1661_v30  ;;  %v702_v44 = vpop.permute.xlu1 %701 }
 0x274   :  { %v4071_v12 = vpack.c.b16 %v1928_v15, %v1921_v22  ;;  %v891_v43 = vmul.f32 %v3840_v45, %v3851_v18  ;;  %v898_v17 = vmul.f32 %v3840_v45, %v3853_v13  ;;  %v1864_v50 = vunpack.c.l.b16 %v4057_v59 }
 0x275   :  { %v4066_v61 = vsel %vm1204_vm13, %v5154_v31, %v5153_v23  ;;  %v1871_v23 = vunpack.c.l.b16 %v4059_v25  ;;  %1682 = vrot.lane.b32.xlu1 %v1675_v46, %s2849_s17  ;;  %v1877_v29 = vpack.c.b16 %v1870_v51, %v1863_v4  ;;  %v1733_v54 = vpack.c.b16 %v1726_v36, %v1719_v56 }
 0x276   :  { %v1805_v27 = vunpack.c.l.b16 %v3910_v10  ;;  %v1812_v30 = vunpack.c.l.b16 %v3912_v63  ;;  %v1977_v3 = vunpack.c.h.b16 %v4053_v11  ;;  %v1984_v60 = vunpack.c.h.b16 %v4055_v16  ;;  %v4094_v63 = vpop.permute.xlu0 %703 }
 0x277   :  { %v1662_v45 = vunpack.c.h.b16 %v4016_v42  ;;  %v4085_v35 = vpack.c.b16 %v1871_v23, %v1864_v50  ;;  %v1669_v19 = vunpack.c.h.b16 %v4018_v49  ;;  %v892_v22 = vmul.f32 %v3863_v24, %v3894_v47 }
 0x278   :  { %v1099_v4 = vmul.f32 %v3655_v14, %v3999_v9  ;;  %v1100_v10 = vmul.f32 %v3847_v0, %v4011_v20  ;;  %v1106_v51 = vmul.f32 %v3655_v14, %v4001_v21  ;;  %v1107_v42 = vmul.f32 %v3847_v0, %v4013_v62 }
 0x279   :  { %v1922_v56 = vunpack.c.h.b16 %v1439_v39  ;;  %v1929_v36 = vunpack.c.h.b16 %v1443_v2  ;;  %v4102_v49 = vsel %vm707_vm14, %v702_v44, %v4094_v63  ;;  %v4106_v15 = vsel %vm707_vm14, %v4003_v28, %v702_v44 }
 0x27a   :  { %5155 = vst [vmem:[#allocation20_spill] sm:$0xff] %v4102_v49  ;;  %v4108_v31 = vpack.c.bf16 %v1100_v10, %v1099_v4  ;;  %v1008_v46 = vmul.f32 %v3937_v6, %v4011_v20  ;;  %v1991_v50 = vpack.c.b16 %v1984_v60, %v1977_v3  ;;  %v899_v14 = vmul.f32 %v3863_v24, %v3896_v34 }
 0x27b   :  { %v4114_v0 = vpack.c.bf16 %v1107_v42, %v1106_v51  ;;  %v4116_v2 = vpack.c.b16 %v1929_v36, %v1922_v56  ;;  %1885 = vrot.lane.b32.xlu2 %v1877_v29, %s2848_s14  ;;  %1741 = vrot.lane.b32.xlu0 %v1733_v54, %s2847_s13  ;;  %v1007_v39 = vmul.f32 %v3690_v57, %v3999_v9  ;;  %v4128_v24 = vunpack.c.l.bf16 %v4102_v49 }
 0x27c   :  { %v1720_v28 = vunpack.c.l.b16 %v4108_v31  ;;  %v1014_v23 = vmul.f32 %v3690_v57, %v4001_v21  ;;  %v1015_v44 = vmul.f32 %v3937_v6, %v4013_v62  ;;  %v4130_v3 = vpack.c.bf16 %v892_v22, %v891_v43 }
 0x27d   :  { %v4133_v29 = vunpack.c.l.bf16 %v4106_v15  ;;  %v1727_v54 = vunpack.c.l.b16 %v4114_v0  ;;  %1999 = vrot.lane.b32.xlu1 %v1991_v50, %s2850_s18  ;;  %v4138_v60 = vunpack.c.h.bf16 %v4106_v15  ;;  %v4140_v57 = vpack.c.bf16 %v1008_v46, %v1007_v39 }
 0x27e   :  { %v4142_v4 = vpack.c.bf16 %v1015_v44, %v1014_v23  ;;  %v1865_v6 = vunpack.c.h.b16 %v4057_v59  ;;  %v4146_v43 = vunpack.c.h.bf16 %v4102_v49  ;;  %v1819_v22 = vpack.c.b16 %v1812_v30, %v1805_v27 }
 0x27f   :  { %v4148_v10 = vpack.c.b16 %v1727_v54, %v1720_v28  ;;  %v1872_v51 = vunpack.c.h.b16 %v4059_v25  ;;  %v1676_v42 = vpack.c.b16 %v1669_v19, %v1662_v45  ;;  %v4151_v56 = vpack.c.bf16 %v899_v14, %v898_v17  ;;  %v916_v25 = vld [vmem:[%s5085_s7 + $0x18] sm:$0x2] }
 0x280   :  { %v1663_v36 = vunpack.c.l.b16 %v4140_v57  ;;  %v1670_v46 = vunpack.c.l.b16 %v4142_v4  ;;  %v1976_v50 = vunpack.c.l.b16 %v4053_v11  ;;  %v1983_v39 = vunpack.c.l.b16 %v4055_v16 }
 0x281   :  { %v4157_v59 = vpack.c.b16 %v1872_v51, %v1865_v6  ;;  %v1336_v27 = vmul.f32 %v3715_v55, %v4133_v29  ;;  %v1604_v30 = vunpack.c.l.b16 %v4130_v3  ;;  %v1337_v45 = vmul.f32 %v3973_v38, %v4128_v24 }
 0x282   :  { %v4165_v17 = vpack.c.b16 %v1670_v46, %v1663_v36  ;;  %v1343_v11 = vmul.f32 %v3715_v55, %v4138_v60  ;;  %v1221_v16 = vmul.f32 %v3881_v5, %v4011_v20  ;;  %v1228_v19 = vmul.f32 %v3881_v5, %v4013_v62 }
 0x283   :  { %v1344_v14 = vmul.f32 %v3973_v38, %v4146_v43  ;;  %v1428_v28 = vmul.f32 %v3884_v41, %v4133_v29  ;;  %1826 = vrot.lane.b32.xlu2 %v1819_v22, %s2845_s11  ;;  %1684 = vrot.lane.b32.xlu0 %v1676_v42, %s2849_s17  ;;  %v1611_v23 = vunpack.c.l.b16 %v4151_v56  ;;  %v1220_v55 = vmul.f32 %v3866_v26, %v3999_v9 }
 0x284   :  { %v4184_v44 = vpack.c.bf16 %v1337_v45, %v1336_v27  ;;  %v1429_v5 = vmul.f32 %v3891_v37, %v4128_v24  ;;  %v1227_v38 = vmul.f32 %v3866_v26, %v4001_v21  ;;  %v927_v54 = vunpack.c.l.b16 %v916_v25 }
 0x285   :  { %v4190_v6 = vpack.c.bf16 %v1344_v14, %v1343_v11  ;;  %v1435_v22 = vmul.f32 %v3884_v41, %v4138_v60  ;;  %1944 = vrot.lane.b32.xlu1 %v4071_v12, %s2846_s12  ;;  %v1436_v36 = vmul.f32 %v3891_v37, %v4146_v43  ;;  %v1990_v27 = vpack.c.b16 %v1983_v39, %v1976_v50 }
 0x286   :  { %v1866_v42 = vunpack.c.l.b16 %v4184_v44  ;;  %v4200_v46 = vpack.c.bf16 %v1429_v5, %v1428_v28  ;;  %v4202_v26 = vpack.c.bf16 %v1221_v16, %v1220_v55  ;;  %v4204_v25 = vpack.c.bf16 %v1228_v19, %v1227_v38 }
 0x287   :  { %v1873_v45 = vunpack.c.l.b16 %v4190_v6  ;;  %v1618_v41 = vpack.c.b16 %v1611_v23, %v1604_v30  ;;  %v4207_v11 = vpack.c.bf16 %v1436_v36, %v1435_v22  ;;  %v1222_v12 = vmul.f32 %v3992_v7, %v4133_v29 }
 0x288   :  { %v1923_v14 = vunpack.c.l.b16 %v4200_v46  ;;  %v1605_v51 = vunpack.c.h.b16 %v4130_v3  ;;  %v4213_v37 = vpack.c.b16 %v927_v54, %v927_v54  ;;  %v1223_v50 = vmul.f32 %v4066_v61, %v4128_v24 }
 0x289   :  { %v4215_v28 = vpack.c.b16 %v1873_v45, %v1866_v42  ;;  %v1612_v39 = vunpack.c.h.b16 %v4151_v56  ;;  %v1930_v30 = vunpack.c.l.b16 %v4207_v11  ;;  %v1229_v16 = vmul.f32 %v3992_v7, %v4138_v60 }
 0x28a   :  { %v1230_v19 = vmul.f32 %v4066_v61, %v4146_v43  ;;  %v5156_v23 = vunpack.i.h.bf16 %v3708_v53  ;;  %v5157_v3 = vunpack.i.l.bf16 %v3708_v53  ;;  %v1807_v5 = vunpack.c.l.b16 %v4202_v26 }
 0x28b   :  { %v1814_v38 = vunpack.c.l.b16 %v4204_v25  ;;  %v1234_v56 = vpack.c.bf16 %v1223_v50, %v1222_v12  ;;  %v5158_v7 = vunpack.i.h.bf16 %v3678_v48  ;;  %1625 = vrot.lane.b32.xlu0 %v1618_v41, %s2851_s22  ;;  %1997 = vrot.lane.b32.xlu2 %v1990_v27, %s2850_s18  ;;  %v4242_v22 = vpack.c.b16 %v1930_v30, %v1923_v14  ;;  %v1449_v50 = vld [vmem:[%s5085_s7 + $0x34] sm:$0x1] }
 0x28c   :  { %v4230_v55 = vsel %vm1524_vm12, %v5157_v3, %v5156_v23  ;;  %v1238_v42 = vpack.c.bf16 %v1230_v19, %v1229_v16  ;;  %v5159_v36 = vunpack.i.h.bf16 %v3975_v32  ;;  %v1051_v48 = vshrl.u32 %v4213_v37, 16 }
 0x28d   :  { %v995_v61 = vsel %vm991_vm11, %v5158_v7, %v2811_v33  ;;  %v1809_v41 = vunpack.c.l.b16 %v1234_v56  ;;  %v5160_v27 = vunpack.i.l.bf16 %v4041_v58  ;;  %v5161_v14 = vunpack.i.h.bf16 %v3701_v52  ;;  %1887 = vrot.lane.b32.xlu1 %v4085_v35, %s2848_s14  ;;  %v5162_v7 = vld [vmem:[#allocation17_spill] sm:$0xff] }
 0x28e   :  { %v996_v45 = vsel %vm991_vm11, %v2811_v33, %v5159_v36  ;;  %v1619_v33 = vpack.c.b16 %v1612_v39, %v1605_v51  ;;  %v1816_v16 = vunpack.c.l.b16 %v1238_v42  ;;  %v1101_v19 = vmul.f32 %v3942_v40, %v4133_v29 }
 0x28f   :  { %v4259_v30 = vsel %vm877_vm15, %v5161_v14, %v5160_v27  ;;  %v1821_v23 = vpack.c.b16 %v1814_v38, %v1807_v5  ;;  %v893_v3 = vmul.f32 %v3951_v8, %v3999_v9  ;;  %v1102_v36 = vmul.f32 %v5162_v7, %v4128_v24  ;;  %v5163_v14 = vld [vmem:[#allocation18_spill] sm:$0xff] }
 0x290   :  { %v1108_v52 = vmul.f32 %v3942_v40, %v4138_v60  ;;  %v1460_v27 = vunpack.c.l.b16 %v1449_v50  ;;  %v894_v54 = vmul.f32 %v5163_v14, %v4011_v20  ;;  %v4273_v35 = vpack.c.b16 %v1816_v16, %v1809_v41 }
 0x291   :  { %v1109_v51 = vmul.f32 %v5162_v7, %v4146_v43  ;;  %v1052_v39 = vpack.i.b16 %v1051_v48, %v1051_v48  ;;  %v1113_v5 = vpack.c.bf16 %v1102_v36, %v1101_v19  ;;  %v1867_v38 = vunpack.c.h.b16 %v4184_v44 }
 0x292   :  { %v1874_v12 = vunpack.c.h.b16 %v4190_v6  ;;  %v1721_v32 = vunpack.c.h.b16 %v4108_v31  ;;  %v1728_v40 = vunpack.c.h.b16 %v4114_v0  ;;  %v1009_v50 = vmul.f32 %v995_v61, %v4133_v29 }
 0x293   :  { %v1117_v53 = vpack.c.bf16 %v1109_v51, %v1108_v52  ;;  %v901_v41 = vmul.f32 %v5163_v14, %v4013_v62  ;;  %v1722_v16 = vunpack.c.l.b16 %v1113_v5  ;;  %v1010_v48 = vmul.f32 %v996_v45, %v4128_v24  ;;  %1777 = vrot.lane.b32.xlu0 %v4106_v15, %s2844_s10  ;;  %1627 = vrot.lane.b32.xlu2 %v1619_v33, %s2851_s22 }
 0x294   :  { %v4284_v49 = vpack.c.b16 %v1874_v12, %v1867_v38  ;;  %v1467_v44 = vpack.c.b16 %v1460_v27, %v1460_v27  ;;  %v4290_v31 = vpack.c.b16 %v1728_v40, %v1721_v32  ;;  %v1016_v0 = vmul.f32 %v995_v61, %v4138_v60 }
 0x295   :  { %v1729_v6 = vunpack.c.l.b16 %v1117_v53  ;;  %v1017_v19 = vmul.f32 %v996_v45, %v4146_v43  ;;  %v4294_v7 = vpack.c.bf16 %v1010_v48, %v1009_v50  ;;  %v1810_v36 = vunpack.c.h.b16 %v1234_v56  ;;  %1830 = vrot.lane.b32.xlu1 %v1821_v23, %s2845_s11  ;;  %v5164_v45 = vld [vmem:[#allocation8_spill] sm:$0xff] }
 0x296   :  { %v1817_v12 = vunpack.c.h.b16 %v1238_v42  ;;  %v1054_v52 = vperm.slane %v1052_v39, 1  ;;  %v1664_v15 = vunpack.c.h.b16 %v4140_v57  ;;  %v1671_v33 = vunpack.c.h.b16 %v4142_v4  ;;  %v731_v4 = vld [vmem:[%s5085_s7 + $0x18] sm:$0x1] }
 0x297   :  { %v4297_v14 = vpack.c.b16 %v1729_v6, %v1722_v16  ;;  %v4301_v27 = vpack.c.bf16 %v1017_v19, %v1016_v0  ;;  %v1666_v32 = vunpack.c.h.b16 %v4294_v7  ;;  %v1542_v51 = vmul.f32 %v5164_v45, %v4133_v29 }
 0x298   :  { %v4304_v61 = vpack.c.b16 %v1817_v12, %v1810_v36  ;;  %v1493_v56 = vpack.i.b16 %v1467_v44, %v1467_v44  ;;  %v4308_v42 = vpack.c.b16 %v1671_v33, %v1664_v15  ;;  %v1543_v23 = vmul.f32 %v4230_v55, %v4128_v24 }
 0x299   :  { %v1549_v57 = vmul.f32 %v5164_v45, %v4138_v60  ;;  %v1673_v39 = vunpack.c.h.b16 %v4301_v27  ;;  %v1550_v38 = vmul.f32 %v4230_v55, %v4146_v43  ;;  %v1723_v40 = vunpack.c.h.b16 %v1113_v5 }
 0x29a   :  { %v1730_v50 = vunpack.c.h.b16 %v1117_v53  ;;  %v5165_v16 = vunpack.i.h.bf16 %v4041_v58  ;;  %v5166_v48 = vunpack.i.l.bf16 %v4041_v58  ;;  %v1061_v6 = vunpack.c.l.bf16 %v1054_v52 }
 0x29b   :  { %v900_v0 = vmul.f32 %v3951_v8, %v4001_v21  ;;  %v1554_v19 = vpack.c.bf16 %v1543_v23, %v1542_v51  ;;  %v4327_v36 = vpack.c.bf16 %v894_v54, %v893_v3  ;;  %v4329_v12 = vpack.c.b16 %v1673_v39, %v1666_v32  ;;  %1743 = vrot.lane.b32.xlu0 %v4148_v10, %s2847_s13  ;;  %v5167_v51 = vld [vmem:[#allocation5_spill] sm:$0xff]  ;;  %v5168_v23 = vld [vmem:[#allocation4_spill] sm:$0xff] }
 0x29c   :  { %v882_v44 = vsel %vm877_vm15, %v5166_v48, %v5165_v16  ;;  %v1558_v15 = vpack.c.bf16 %v1550_v38, %v1549_v57  ;;  %v4331_v33 = vpack.c.b16 %v1730_v50, %v1723_v40  ;;  %1946 = vrot.lane.b32.xlu2 %v4116_v2, %s2846_s12  ;;  %v742_v55 = vunpack.c.l.b16 %v731_v4  ;;  %v5169_v50 = vld [vmem:[#allocation3_spill] sm:$0xff]  ;;  %v5171_v16 = vld [vmem:[#allocation2_spill] sm:$0xff] }
 0x29d   :  { %v4337_v53 = vpack.c.bf16 %v901_v41, %v900_v0  ;;  %v1980_v5 = vunpack.c.l.b16 %v1554_v19  ;;  %v895_v8 = vmul.f32 %v4259_v30, %v4133_v29  ;;  %v1495_v54 = vperm.slane %v1493_v56, 0  ;;  %1081 = vrot.lane.b32.xlu1 %v1061_v6, %s2839_s0 }
 0x29e   :  { %v1987_v3 = vunpack.c.l.b16 %v1558_v15  ;;  %v896_v52 = vmul.f32 %v882_v44, %v4128_v24  ;;  %v902_v32 = vmul.f32 %v4259_v30, %v4138_v60  ;;  %v960_v10 = vpack.i.b16 %v4213_v37, %v4213_v37 }
 0x29f   :  { %v903_v2 = vmul.f32 %v882_v44, %v4146_v43  ;;  %v1924_v41 = vunpack.c.h.b16 %v4200_v46  ;;  %v1931_v45 = vunpack.c.h.b16 %v4207_v11  ;;  %v771_v56 = vpack.i.b16 %v5167_v51, %v5167_v51 }
 0x2a0   :  { %v767_v57 = vpack.i.b16 %v5168_v23, %v5168_v23  ;;  %v4354_v4 = vpack.c.b16 %v1987_v3, %v1980_v5  ;;  %v907_v30 = vpack.c.bf16 %v896_v52, %v895_v8  ;;  %v1606_v39 = vunpack.c.l.b16 %v4327_v36  ;;  %v5174_v8 = vld [vmem:[#allocation12_spill] sm:$0xff] }
 0x2a1   :  { %v1613_v38 = vunpack.c.l.b16 %v4337_v53  ;;  %v911_v37 = vpack.c.bf16 %v903_v2, %v902_v32  ;;  %v4358_v40 = vpack.c.b16 %v1931_v45, %v1924_v41  ;;  %v5170_v46 = vpack.i.b16 %v5169_v50, %v5169_v50 }
 0x2a2   :  { %v5172_v48 = vpack.i.b16 %v5171_v16, %v5171_v16  ;;  %v4366_v6 = vpack.c.b16 %v742_v55, %v742_v55  ;;  %v1608_v0 = vunpack.c.l.b16 %v907_v30  ;;  %v5173_v5 = vunpack.i.l.bf16 %v3694_v1 }
 0x2a3   :  { %v765_v11 = vperm.slane %v5170_v46, 0  ;;  %v5175_v3 = vunpack.i.h.bf16 %v5174_v8  ;;  %v1502_v32 = vunpack.c.l.bf16 %v1495_v54  ;;  %v962_v2 = vperm.slane %v960_v10, 1  ;;  %1686 = vrot.lane.b32.xlu0 %v4165_v17, %s2849_s17 }
 0x2a4   :  { %v761_v44 = vperm.slane %v5172_v48, 0  ;;  %v1615_v41 = vunpack.c.l.b16 %v911_v37  ;;  %v5176_v45 = vunpack.i.h.bf16 %v3694_v1  ;;  %v5177_v51 = vmov %v5173_v5  ;;  %1889 = vrot.lane.b32.xlu2 %v4157_v59, %s2848_s14 }
 0x2a5   :  { %v4373_v52 = vsel %vm1524_vm12, %v5175_v3, %v5173_v5  ;;  %v769_v50 = vperm.slane %v767_v57, 0  ;;  %v845_v55 = vshrl.u32 %v4366_v6, 16  ;;  %v1665_v46 = vunpack.c.l.b16 %v4294_v7  ;;  %1522 = vrot.lane.b32.xlu1 %v1502_v32, %s2838_s30 }
 0x2a6   :  { %v1527_v23 = vsel %vm1524_vm12, %v5177_v51, %v5176_v45  ;;  %v773_v16 = vperm.slane %v771_v56, 0  ;;  %v1620_v54 = vpack.c.b16 %v1613_v38, %v1606_v39  ;;  %v4386_v10 = vpack.c.b16 %v1615_v41, %v1608_v0  ;;  %v5178_v38 = vld [vmem:[#allocation14_spill] sm:$0xff] }
 0x2a7   :  { %v1672_v48 = vunpack.c.l.b16 %v4301_v27  ;;  %v1540_v1 = vmul.f32 %v4373_v52, %v3999_v9  ;;  %v1609_v57 = vunpack.c.h.b16 %v907_v30  ;;  %v1616_v5 = vunpack.c.h.b16 %v911_v37  ;;  %v5179_v27 = vld [vmem:[#allocation15_spill] sm:$0xff] }
 0x2a8   :  { %v1981_v8 = vunpack.c.h.b16 %v1554_v19  ;;  %v969_v7 = vunpack.c.l.bf16 %v962_v2  ;;  %v1541_v56 = vmul.f32 %v1527_v23, %v4011_v20  ;;  %v1988_v3 = vunpack.c.h.b16 %v1558_v15 }
 0x2a9   :  { %v4393_v17 = vpack.c.b16 %v1672_v48, %v1665_v46  ;;  %v846_v59 = vpack.i.b16 %v845_v55, %v845_v55  ;;  %v4395_v39 = vpack.c.b16 %v1616_v5, %v1609_v57  ;;  %v792_v0 = vunpack.c.l.bf16 %v5178_v38 }
 0x2aa   :  { %v793_v41 = vunpack.c.l.bf16 %v5179_v27  ;;  %v4399_v45 = vpack.c.b16 %v1988_v3, %v1981_v8  ;;  %v794_v30 = vunpack.c.l.bf16 %v761_v44  ;;  %v795_v37 = vunpack.c.l.bf16 %v765_v11 }
 0x2ab   :  { %v796_v19 = vunpack.c.l.bf16 %v769_v50  ;;  %v1548_v32 = vmul.f32 %v1527_v23, %v4013_v62  ;;  %v799_v2 = vmul.f32 %v792_v0, %v3851_v18  ;;  %v806_v15 = vmul.f32 %v792_v0, %v3853_v13  ;;  %1629 = vrot.lane.b32.xlu0 %v1620_v54, %s2851_s22 }
 0x2ac   :  { %v800_v51 = vmul.f32 %v793_v41, %v3894_v47  ;;  %v807_v55 = vmul.f32 %v793_v41, %v3896_v34  ;;  %v801_v46 = vmul.f32 %v794_v30, %v3999_v9  ;;  %v802_v48 = vmul.f32 %v795_v37, %v4011_v20  ;;  %989 = vrot.lane.b32.xlu2 %v969_v7, %s2842_s16 }
 0x2ad   :  { %v808_v57 = vmul.f32 %v794_v30, %v4001_v21  ;;  %v809_v11 = vmul.f32 %v795_v37, %v4013_v62  ;;  %v797_v44 = vunpack.c.l.bf16 %v773_v16  ;;  %v803_v23 = vmul.f32 %v796_v19, %v4133_v29  ;;  %1891 = vrot.lane.b32.xlu1 %v4215_v28, %s2848_s14 }
 0x2ae   :  { %v813_v5 = vpack.c.bf16 %v800_v51, %v799_v2  ;;  %v848_v18 = vperm.slane %v846_v59, 0  ;;  %v817_v13 = vpack.c.bf16 %v807_v55, %v806_v15  ;;  %v814_v47 = vpack.c.bf16 %v802_v48, %v801_v46 }
 0x2af   :  { %v810_v34 = vmul.f32 %v796_v19, %v4138_v60  ;;  %v818_v20 = vpack.c.bf16 %v809_v11, %v808_v57  ;;  %v804_v8 = vmul.f32 %v797_v44, %v4128_v24  ;;  %v811_v7 = vmul.f32 %v797_v44, %v4146_v43 }
 0x2b0   :  { %v1568_v9 = vunpack.c.l.b16 %v813_v5  ;;  %v1569_v50 = vunpack.c.h.b16 %v813_v5  ;;  %v1575_v62 = vunpack.c.l.b16 %v817_v13  ;;  %v1576_v16 = vunpack.c.h.b16 %v817_v13 }
 0x2b1   :  { %v1570_v29 = vunpack.c.l.b16 %v814_v47  ;;  %v1571_v3 = vunpack.c.h.b16 %v814_v47  ;;  %v1577_v54 = vunpack.c.l.b16 %v818_v20  ;;  %v1578_v38 = vunpack.c.h.b16 %v818_v20 }
 0x2b2   :  { %v815_v59 = vpack.c.bf16 %v804_v8, %v803_v23  ;;  %v855_v0 = vunpack.c.l.bf16 %v848_v18  ;;  %v1547_v60 = vmul.f32 %v4373_v52, %v4001_v21  ;;  %v4420_v27 = vpack.c.b16 %v1575_v62, %v1568_v9  ;;  %v5183_v8 = vld [vmem:[#allocation9_spill] sm:$0xff] }
 0x2b3   :  { %v4422_v41 = vpack.c.b16 %v1576_v16, %v1569_v50  ;;  %v4424_v24 = vpack.c.b16 %v1577_v54, %v1570_v29  ;;  %v4426_v28 = vpack.c.b16 %v1578_v38, %v1571_v3  ;;  %v819_v30 = vpack.c.bf16 %v811_v7, %v810_v34  ;;  %1948 = vrot.lane.b32.xlu0 %v4242_v22, %s2846_s12  ;;  %v706_v22 = vpop.permute.xlu1 %705  ;;  %v5184_v62 = vld [vmem:[#allocation13_spill] sm:$0xff] }
 0x2b4   :  { %v1572_v37 = vunpack.c.l.b16 %v815_v59  ;;  %v4428_v19 = vpack.c.bf16 %v1541_v56, %v1540_v1  ;;  %v4430_v2 = vpack.c.bf16 %v1548_v32, %v1547_v60  ;;  %v1573_v43 = vunpack.c.h.b16 %v815_v59  ;;  %875 = vrot.lane.b32.xlu2 %v855_v0, %s2841_s15 }
 0x2b5   :  { %v1579_v51 = vunpack.c.l.b16 %v819_v30  ;;  %v1580_v15 = vunpack.c.h.b16 %v819_v30  ;;  %1834 = vrot.lane.b32.xlu1 %v4273_v35, %s2845_s11  ;;  %v1808_v32 = vunpack.c.h.b16 %v4202_v26  ;;  %v1815_v55 = vunpack.c.h.b16 %v4204_v25 }
 0x2b6   :  { %v1978_v1 = vunpack.c.l.b16 %v4428_v19  ;;  %v1985_v56 = vunpack.c.l.b16 %v4430_v2  ;;  %v713_v57 = vsel %vm707_vm14, %v4094_v63, %v706_v22  ;;  %v5180_v63 = vld [vmem:[#allocation10_spill] sm:$0xff]  ;;  %v1607_v47 = vunpack.c.h.b16 %v4327_v36 }
 0x2b7   :  { %v4435_v21 = vpack.c.b16 %v1579_v51, %v1572_v37  ;;  %v4437_v52 = vpack.c.b16 %v1580_v15, %v1573_v43  ;;  %v1822_v48 = vpack.c.b16 %v1815_v55, %v1808_v32  ;;  %v4451_v35 = vsel %vm724_vm0, %v713_v57, 0  ;;  %v5186_v43 = vld [vmem:[#allocation11_spill] sm:$0xff] }
 0x2b8   :  { %v1992_v46 = vpack.c.b16 %v1985_v56, %v1978_v1  ;;  %v4454_v26 = vunpack.c.l.bf16 %v4451_v35  ;;  %v4457_v25 = vunpack.c.h.bf16 %v4451_v35  ;;  %v1614_v34 = vunpack.c.h.b16 %v4337_v53 }
 0x2b9   :  { %v5185_v16 = vunpack.i.h.bf16 %v5184_v62  ;;  %v1979_v7 = vunpack.c.h.b16 %v4428_v19  ;;  %v1986_v59 = vunpack.c.h.b16 %v4430_v2  ;;  %v2694_v62 = vld [vmem:[%s5088_s4 + $0x4] sm:$0xf] }
 0x2ba   :  { %v1224_v51 = vmul.f32 %v5186_v43, %v4454_v26  ;;  %v1231_v15 = vmul.f32 %v5186_v43, %v4457_v25 }
 0x2bb   :  { %2001 = vrot.lane.b32.xlu0 %v1992_v46, %s2850_s18  ;;  %v1416_v29 = vsel %vm1410_vm5, %v5185_v16, %v5183_v8  ;;  %v1993_v56 = vpack.c.b16 %v1986_v59, %v1979_v7  ;;  %vm1783_vm5 = vcmask 809984  }
 0x2bc   :  { %1832 = vrot.lane.b32.xlu2 %v1822_v48, %s2845_s11  ;;  %v1430_v53 = vmul.f32 %v1416_v29, %v4454_v26  ;;  %v1437_v3 = vmul.f32 %v1416_v29, %v4457_v25  ;;  %v1235_v19 = vpack.c.bf16 %v1224_v51, %v1224_v51  ;;  %v1239_v32 = vpack.c.bf16 %v1231_v15, %v1231_v15 }
 0x2bd   :  { %1747 = vrot.lane.b32.xlu1 %v4297_v14, %s2847_s13  ;;  %v5181_v14 = vld [vmem:[#allocation6_spill] sm:$0xff] }
 0x2be   :  { %v5182_v11 = vunpack.i.h.bf16 %v5181_v14  ;;  %v1445_v38 = vpack.c.bf16 %v1437_v3, %v1437_v3  ;;  %v1811_v46 = vunpack.c.l.b16 %v1235_v19  ;;  %v1818_v48 = vunpack.c.l.b16 %v1239_v32 }
 0x2c0   :  { %v1324_v44 = vsel %vm1318_vm10, %v5182_v11, %v5180_v63  ;;  %v1932_v37 = vunpack.c.l.b16 %v1445_v38  ;;  %v1825_v63 = vpack.c.b16 %v1818_v48, %v1811_v46  ;;  %v5187_v11 = vld [vmem:[#allocation20_spill] sm:$0xff]  ;;  %vm1639_vm10 = vcmask 1039360   ;;  %v2695_v38 = vld [vmem:[%s5088_s4 + $0x4] sm:$0xf0] }
 0x2c1   :  { %v1338_v23 = vmul.f32 %v1324_v44, %v4454_v26  ;;  %v1345_v18 = vmul.f32 %v1324_v44, %v4457_v25 }
 0x2c3   :  { %1893 = vrot.lane.b32.xlu0 %v4284_v49, %s2848_s14  ;;  %v1349_v49 = vpack.c.bf16 %v1338_v23, %v1338_v23 }
 0x2c4   :  { %1745 = vrot.lane.b32.xlu2 %v4290_v31, %s2847_s13  ;;  %v1353_v31 = vpack.c.bf16 %v1345_v18, %v1345_v18 }
 0x2c5   :  { %v4463_v5 = vpop.permute.xlu2 %1775  ;;  %1692 = vrot.lane.b32.xlu1 %v4329_v12, %s2849_s17  ;;  %v1770_v9 = vpop.permute.xlu1 %1769  ;;  %v1868_v50 = vunpack.c.l.b16 %v1349_v49 }
 0x2c6   :  { %v1875_v20 = vunpack.c.l.b16 %v1353_v31 }
 0x2cb   :  { %1836 = vrot.lane.b32.xlu0 %v4304_v61, %s2845_s11  ;;  %v1621_v61 = vpack.c.b16 %v1614_v34, %v1607_v47 }
 0x2cc   :  { %1688 = vrot.lane.b32.xlu2 %v4308_v42, %s2849_s17  ;;  %v1882_v42 = vpack.c.b16 %v1875_v20, %v1868_v50 }
 0x2cd   :  { %v4477_v13 = vpop.permute.xlu2 %1942  ;;  %v4479_v12 = vpop.permute.xlu0 %1771  ;;  %2005 = vrot.lane.b32.xlu1 %v4354_v4, %s2850_s18 }
 0x2ce   :  { %v1784_v18 = vsel %vm1783_vm5, %v1770_v9, %v4479_v12 }
 0x2d3   :  { %1749 = vrot.lane.b32.xlu0 %v4331_v33, %s2847_s13  ;;  %v1441_v33 = vpack.c.bf16 %v1430_v53, %v1430_v53 }
 0x2d4   :  { %1631 = vrot.lane.b32.xlu2 %v1621_v61, %s2851_s22 }
 0x2d5   :  { %v4492_v4 = vpop.permute.xlu2 %1885  ;;  %v4494_v36 = vpop.permute.xlu0 %1773  ;;  %1895 = vrot.lane.b32.xlu1 %v1882_v42, %s2848_s14  ;;  %v1925_v30 = vunpack.c.l.b16 %v1441_v33  ;;  %v2664_v33 = vld [vmem:[%s5088_s4] sm:$0xf] }
 0x2d7   :  { %v4499_v54 = vpop.permute.xlu1 %1828 }
 0x2db   :  { %1633 = vrot.lane.b32.xlu0 %v4386_v10, %s2851_s22 }
 0x2dc   :  { %1950 = vrot.lane.b32.xlu2 %v4358_v40, %s2846_s12  ;;  %v1939_v40 = vpack.c.b16 %v1932_v37, %v1925_v30 }
 0x2dd   :  { %v1827_v0 = vpop.permute.xlu2 %1826  ;;  %v1941_v60 = vpop.permute.xlu0 %1940 }
 0x2de   :  { %v1955_v10 = vsel %vm1954_vm2, %v1941_v60, %v4477_v13  ;;  %v1841_v14 = vsel %vm1840_vm4, %v1827_v0, %v4499_v54  ;;  %v5188_v0 = vld [vmem:[#allocation19_spill] sm:$0xff] }
 0x2df   :  { %v1740_v1 = vpop.permute.xlu1 %1739  ;;  %2053 = vmatpush.bf16.msra.mxu0 %v1955_v10  ;;  %v5189_v60 = vunpack.i.h.bf16 %v5188_v0 }
 0x2e3   :  { %1952 = vrot.lane.b32.xlu0 %v1939_v40, %s2846_s12  ;;  %v1785_v40 = vsel %vm1783_vm5, %v4479_v12, %v4494_v36 }
 0x2e4   :  { %2003 = vrot.lane.b32.xlu2 %v1993_v56, %s2850_s18 }
 0x2e5   :  { %v1884_v2 = vpop.permute.xlu0 %1883  ;;  %v1998_v55 = vpop.permute.xlu2 %1997 }
 0x2e6   :  { %v1898_v22 = vsel %vm1897_vm3, %v1884_v2, %v4492_v4  ;;  %v5190_v2 = vunpack.i.h.bf16 %v4041_v58  ;;  %v5191_v58 = vld [vmem:[#allocation16_spill] sm:$0xff] }
 0x2e7   :  { %v1683_v57 = vpop.permute.xlu1 %1682  ;;  %2054 = vmatpush.bf16.msra.mxu0 %v1898_v22 }
 0x2eb   :  { %2055 = vmatpush.bf16.msra.mxu0 %v1841_v14  ;;  %1838 = vrot.lane.b32.xlu0 %v1825_v63, %s2845_s11 }
 0x2ec   :  { %1779 = vrot.lane.b32.xlu2 %v5187_v11, %s2844_s10 }
 0x2ed   :  { %v4522_v44 = vpop.permute.xlu0 %1741  ;;  %v4524_v23 = vpop.permute.xlu2 %1627 }
 0x2ee   :  { %v1754_v47 = vsel %vm1753_vm7, %v1740_v1, %v4522_v44 }
 0x2ef   :  { %2056 = vmatpush.bf16.msra.mxu0 %v1784_v18  ;;  %v4528_v49 = vpop.permute.xlu1 %1999 }
 0x2f0   :  { %v2012_v31 = vsel %vm2011_vm6, %v1998_v55, %v4528_v49  ;;  %v2696_v55 = vld [vmem:[%s5088_s4 + $0x14] sm:$0xf] }
 0x2f1   :  { %2079 = vmatpush.bf16.msrb.mxu2 %v2012_v31 }
 0x2f3   :  { %2057 = vmatpush.bf16.msra.mxu0 %v1754_v47 }
 0x2f4   :  { %1690 = vrot.lane.b32.xlu2 %v4393_v17, %s2849_s17 }
 0x2f5   :  { %v4536_v34 = vpop.permute.xlu0 %1684 }
 0x2f6   :  { %v4538_v50 = vpop.permute.xlu2 %1946  ;;  %v1697_v9 = vsel %vm1696_vm8, %v1683_v57, %v4536_v34  ;;  %v5192_v57 = vunpack.i.h.bf16 %v5191_v58 }
 0x2f7   :  { %2058 = vmatpush.bf16.msra.mxu0 %v1697_v9  ;;  %v1945_v20 = vpop.permute.xlu1 %1944 }
 0x2f8   :  { %v1956_v61 = vsel %vm1954_vm2, %v4477_v13, %v1945_v20  ;;  %v1957_v42 = vsel %vm1954_vm2, %v1945_v20, %v4538_v50  ;;  %v2666_v13 = vld [vmem:[%s5088_s4 + $0x8] sm:$0xf0] }
 0x2f9   :  { %2091 = vmatpush.bf16.msra.mxu3 %v1956_v61  ;;  %2129 = vmatpush.bf16.msra.mxu2 %v1957_v42  ;;  %v4558_v29 = vor.u32 %v2694_v62, %v2666_v13 }
 0x2fb   :  { %2678 = vmatmul.msk.bf16.vlgmr.msrb.gmra.mxu2 %vm498_vm1, %v4558_v29 }
 0x2fc   :  { %1635 = vrot.lane.b32.xlu2 %v4395_v39, %s2851_s22 }
 0x2fd   :  { %v1626_v17 = vpop.permute.xlu0 %1625 }
 0x2fe   :  { %v4548_v8 = vpop.permute.xlu2 %1889  ;;  %v1640_v16 = vsel %vm1639_vm10, %v1626_v17, %v4524_v23  ;;  %v2672_v17 = vld [vmem:[%s5088_s4 + $0x10] sm:$0xf] }
 0x2ff   :  { %v1888_v53 = vpop.permute.xlu1 %1887  ;;  %2059 = vmatpush.bf16.msra.mxu0 %v1640_v16 }
 0x300   :  { %v1899_v39 = vsel %vm1897_vm3, %v4492_v4, %v1888_v53  ;;  %v1900_v3 = vsel %vm1897_vm3, %v1888_v53, %v4548_v8  ;;  %v4575_v4 = vor.u32 %v2695_v38, %v2664_v33 }
 0x301   :  { %2092 = vmatpush.bf16.msra.mxu3 %v1899_v39  ;;  %2130 = vmatpush.bf16.msra.mxu2 %v1900_v3 }
 0x303   :  { %2060 = vmatpush.bf16.msra.mxu0 %v4420_v27 }
 0x304   :  { %2007 = vrot.lane.b32.xlu2 %v4399_v45, %s2850_s18 }
 0x305   :  { %v4577_v7 = vpop.permute.xlu0 %1777 }
 0x306   :  { %v990_v59 = vpop.permute.xlu2 %989  ;;  %2061 = vmatmul.bf16.vlgmr.msra.gmra.mxu0 %v4575_v4 }
 0x307   :  { %v997_v27 = vsel %vm991_vm11, %v5189_v60, %v990_v59  ;;  %v1831_v43 = vpop.permute.xlu1 %1830  ;;  %v5193_v60 = vld [vmem:[#allocation7_spill] sm:$0xff] }
 0x308   :  { %v1011_v30 = vmul.f32 %v997_v27, %v4454_v26  ;;  %v1018_v37 = vmul.f32 %v997_v27, %v4457_v25  ;;  %v1842_v51 = vsel %vm1840_vm4, %v4499_v54, %v1831_v43  ;;  %v5194_v27 = vunpack.i.h.bf16 %v5193_v60 }
 0x309   :  { %2093 = vmatpush.bf16.msra.mxu3 %v1842_v51 }
 0x30a   :  { %v1022_v45 = vpack.c.bf16 %v1011_v30, %v1011_v30  ;;  %v1026_v15 = vpack.c.bf16 %v1018_v37, %v1018_v37 }
 0x30c   :  { %v1667_v10 = vunpack.c.l.b16 %v1022_v45  ;;  %v1674_v1 = vunpack.c.l.b16 %v1026_v15  ;;  %1781 = vrot.lane.b32.xlu2 %v4451_v35, %s2844_s10  ;;  %v2674_v35 = vld [vmem:[%s5088_s4 + $0x18] sm:$0xf0]  ;;  %v1786_v45 = vsel %vm1783_vm5, %v4494_v36, %v4463_v5 }
 0x30d   :  { %v1744_v56 = vpop.permute.xlu0 %1743  ;;  %2094 = vmatpush.bf16.msra.mxu3 %v1785_v40  ;;  %v4604_v22 = vor.u32 %v2696_v55, %v2674_v35 }
 0x30e   :  { %v876_v19 = vpop.permute.xlu2 %875  ;;  %v1681_v32 = vpack.c.b16 %v1674_v1, %v1667_v10  ;;  %v1755_v14 = vsel %vm1753_vm7, %v4522_v44, %v1744_v56  ;;  %v2697_v44 = vld [vmem:[%s5088_s4 + $0x14] sm:$0xf0] }
 0x30f   :  { %v883_v54 = vsel %vm877_vm15, %v5190_v2, %v876_v19  ;;  %v1082_v48 = vpop.permute.xlu1 %1081  ;;  %2679 = vmatmul.msk.bf16.gmra.mxu2 %vm498_vm1, %v4604_v22  ;;  %v4621_v62 = vor.u32 %v2697_v44, %v2672_v17 }
 0x310   :  { %v897_v46 = vmul.f32 %v883_v54, %v4454_v26  ;;  %v904_v12 = vmul.f32 %v883_v54, %v4457_v25  ;;  %1694 = vrot.lane.b32.xlu0 %v1681_v32, %s2849_s17  ;;  %v1089_v63 = vsel %vm1083_vm9, %v5192_v57, %v1082_v48 }
 0x311   :  { %v1103_v31 = vmul.f32 %v1089_v63, %v4454_v26  ;;  %v1110_v47 = vmul.f32 %v1089_v63, %v4457_v25  ;;  %2095 = vmatpush.bf16.msra.mxu3 %v1755_v14 }
 0x312   :  { %v908_v11 = vpack.c.bf16 %v897_v46, %v897_v46  ;;  %v912_v18 = vpack.c.bf16 %v904_v12, %v904_v12 }
 0x313   :  { %v1114_v61 = vpack.c.bf16 %v1103_v31, %v1103_v31  ;;  %v1118_v42 = vpack.c.bf16 %v1110_v47, %v1110_v47 }
 0x314   :  { %v1610_v9 = vunpack.c.l.b16 %v908_v11  ;;  %v1617_v20 = vunpack.c.l.b16 %v912_v18 }
 0x315   :  { %v1724_v13 = vunpack.c.l.b16 %v1114_v61  ;;  %v1731_v16 = vunpack.c.l.b16 %v1118_v42  ;;  %v1687_v53 = vpop.permute.xlu0 %1686 }
 0x316   :  { %v1833_v39 = vpop.permute.xlu2 %1832  ;;  %v1624_v3 = vpack.c.b16 %v1617_v20, %v1610_v9  ;;  %v1698_v33 = vsel %vm1696_vm8, %v4536_v34, %v1687_v53  ;;  %2066 = vmatmul.bf16.gmra.mxu0 %v4621_v62 }
 0x317   :  { %v1843_v38 = vsel %vm1840_vm4, %v1831_v43, %v1833_v39  ;;  %2096 = vmatpush.bf16.msra.mxu3 %v1698_v33  ;;  %v1523_v59 = vpop.permute.xlu1 %1522  ;;  %v1738_v0 = vpack.c.b16 %v1731_v16, %v1724_v13 }
 0x318   :  { %1637 = vrot.lane.b32.xlu2 %v1624_v3, %s2851_s22  ;;  %v1530_v30 = vsel %vm1524_vm12, %v5194_v27, %v1523_v59  ;;  %2131 = vmatpush.bf16.msra.mxu2 %v1843_v38 }
 0x319   :  { %v1544_v37 = vmul.f32 %v1530_v30, %v4454_v26  ;;  %v1551_v51 = vmul.f32 %v1530_v30, %v4457_v25  ;;  %1751 = vrot.lane.b32.xlu1 %v1738_v0, %s2847_s13 }
 0x31b   :  { %v1555_v34 = vpack.c.bf16 %v1544_v37, %v1544_v37  ;;  %v1559_v43 = vpack.c.bf16 %v1551_v51, %v1551_v51 }
 0x31c   :  { %2132 = vmatpush.bf16.msra.mxu2 %v1786_v45 }
 0x31d   :  { %v1982_v15 = vunpack.c.l.b16 %v1555_v34  ;;  %v1989_v10 = vunpack.c.l.b16 %v1559_v43  ;;  %v1630_v1 = vpop.permute.xlu0 %1629  ;;  %v775_v43 = vpack.i.b16 %v4366_v6, %v4366_v6 }
 0x31e   :  { %v1746_v40 = vpop.permute.xlu2 %1745  ;;  %v1641_v19 = vsel %vm1639_vm10, %v4524_v23, %v1630_v1 }
 0x31f   :  { %v1756_v32 = vsel %vm1753_vm7, %v1744_v56, %v1746_v40  ;;  %v1892_v2 = vpop.permute.xlu1 %1891  ;;  %2097 = vmatpush.bf16.msra.mxu3 %v1641_v19  ;;  %v1996_v54 = vpack.c.b16 %v1989_v10, %v1982_v15  ;;  %v777_v45 = vperm.slane %v775_v43, 0 }
 0x320   :  { %2133 = vmatpush.bf16.msra.mxu2 %v1756_v32  ;;  %v1901_v57 = vsel %vm1897_vm3, %v4548_v8, %v1892_v2  ;;  %v1787_v8 = vsel %vm1783_vm5, %v4463_v5, %v4577_v7 }
 0x321   :  { %2009 = vrot.lane.b32.xlu1 %v1996_v54, %s2850_s18 }
 0x323   :  { %2098 = vmatpush.bf16.msra.mxu3 %v4422_v41 }
 0x325   :  { %v1949_v55 = vpop.permute.xlu0 %1948 }
 0x326   :  { %v1689_v36 = vpop.permute.xlu2 %1688  ;;  %2099 = vmatmul.bf16.vlgmr.msra.gmra.mxu3 %v4575_v4  ;;  %v1958_v58 = vsel %vm1954_vm2, %v4538_v50, %v1949_v55 }
 0x327   :  { %v1699_v35 = vsel %vm1696_vm8, %v1687_v53, %v1689_v36  ;;  %v1835_v46 = vpop.permute.xlu1 %1834 }
 0x328   :  { %2134 = vmatpush.bf16.msra.mxu2 %v1699_v35  ;;  %v1844_v11 = vsel %vm1840_vm4, %v1833_v39, %v1835_v46 }
 0x32d   :  { %v2002_v12 = vpop.permute.xlu0 %2001 }
 0x32e   :  { %v1632_v23 = vpop.permute.xlu2 %1631  ;;  %v2013_v56 = vsel %vm2011_vm6, %v4528_v49, %v2002_v12 }
 0x32f   :  { %v1642_v48 = vsel %vm1639_vm10, %v1630_v1, %v1632_v23  ;;  %2117 = vmatpush.bf16.msrb.mxu1 %v2013_v56  ;;  %v1748_v41 = vpop.permute.xlu1 %1747 }
 0x330   :  { %2135 = vmatpush.bf16.msra.mxu2 %v1642_v48  ;;  %v1757_v61 = vsel %vm1753_vm7, %v1746_v40, %v1748_v41  ;;  %v798_v40 = vunpack.c.l.bf16 %v777_v45 }
 0x332   :  { %2680 = vmatmul.msk.bf16.vlgmr.msrb.gmra.mxu1 %vm498_vm1, %v4558_v29  ;;  %v805_v19 = vmul.f32 %v798_v40, %v4454_v26  ;;  %v812_v32 = vmul.f32 %v798_v40, %v4457_v25 }
 0x333   :  { %2167 = vmatpush.bf16.msra.mxu1 %v1958_v58 }
 0x334   :  { %2136 = vmatpush.bf16.msra.mxu2 %v4424_v24  ;;  %v816_v6 = vpack.c.bf16 %v805_v19, %v805_v19 }
 0x335   :  { %v1894_v63 = vpop.permute.xlu0 %1893 }
 0x336   :  { %v1951_v49 = vpop.permute.xlu2 %1950  ;;  %2104 = vmatmul.bf16.gmra.mxu3 %v4621_v62  ;;  %v1902_v24 = vsel %vm1897_vm3, %v1892_v2, %v1894_v63  ;;  %v1574_v26 = vunpack.c.l.b16 %v816_v6 }
 0x337   :  { %2168 = vmatpush.bf16.msra.mxu1 %v1901_v57  ;;  %v1959_v14 = vsel %vm1954_vm2, %v1949_v55, %v1951_v49  ;;  %2137 = vmatmul.bf16.vlgmr.msra.gmra.mxu2 %v4575_v4  ;;  %v4657_v50 = vpop.permute.xlu1 %1692 }
 0x338   :  { %2205 = vmatpush.bf16.msrb.mxu2 %v1959_v14 }
 0x33b   :  { %2169 = vmatpush.bf16.msra.mxu1 %v1844_v11 }
 0x33c   :  { %2206 = vmatpush.bf16.msrb.mxu2 %v1902_v24 }
 0x33d   :  { %v1837_v18 = vpop.permute.xlu0 %1836 }
 0x33e   :  { %v2004_v31 = vpop.permute.xlu2 %2003  ;;  %v1845_v9 = vsel %vm1840_vm4, %v1835_v46, %v1837_v18 }
 0x33f   :  { %2170 = vmatpush.bf16.msra.mxu1 %v1787_v8  ;;  %v2014_v47 = vsel %vm2011_vm6, %v2002_v12, %v2004_v31  ;;  %v2006_v20 = vpop.permute.xlu1 %2005  ;;  %v820_v12 = vpack.c.bf16 %v812_v32, %v812_v32 }
 0x340   :  { %2155 = vmatpush.bf16.msrb.mxu0 %v2014_v47  ;;  %2207 = vmatpush.bf16.msrb.mxu2 %v1845_v9  ;;  %v2015_v42 = vsel %vm2011_vm6, %v2004_v31, %v2006_v20 }
 0x341   :  { %2193 = vmatpush.bf16.msrb.mxu3 %v2015_v42  ;;  %v1581_v25 = vunpack.c.l.b16 %v820_v12 }
 0x342   :  { %2681 = vmatmul.msk.bf16.gmra.mxu1 %vm498_vm1, %v4604_v22 }
 0x343   :  { %2171 = vmatpush.bf16.msra.mxu1 %v1757_v61  ;;  %2682 = vmatmul.msk.bf16.vlgmr.msrb.gmra.mxu0 %vm498_vm1, %v4558_v29 }
 0x345   :  { %v1750_v5 = vpop.permute.xlu0 %1749 }
 0x346   :  { %v1780_v17 = vpop.permute.xlu2 %1779  ;;  %2684 = vmatmul.msk.bf16.vlgmr.msrb.gmra.mxu3 %vm498_vm1, %v4558_v29  ;;  %v1758_v13 = vsel %vm1753_vm7, %v1748_v41, %v1750_v5 }
 0x347   :  { %2142 = vmatmul.bf16.gmra.mxu2 %v4621_v62  ;;  %v1788_v44 = vsel %vm1783_vm5, %v4577_v7, %v1780_v17  ;;  %v1896_v60 = vpop.permute.xlu1 %1895 }
 0x348   :  { %2208 = vmatpush.bf16.msrb.mxu2 %v1788_v44  ;;  %v1903_v27 = vsel %vm1897_vm3, %v1894_v63, %v1896_v60 }
 0x34c   :  { %2209 = vmatpush.bf16.msrb.mxu2 %v1758_v13 }
 0x34d   :  { %v1634_v16 = vpop.permute.xlu0 %1633 }
 0x34e   :  { %v1691_v53 = vpop.permute.xlu2 %1690  ;;  %v1643_v33 = vsel %vm1639_vm10, %v1632_v23, %v1634_v16 }
 0x34f   :  { %v1700_v39 = vsel %vm1696_vm8, %v1689_v36, %v1691_v53  ;;  %v1701_v3 = vsel %vm1696_vm8, %v1691_v53, %v4657_v50 }
 0x350   :  { %2172 = vmatpush.bf16.msra.mxu1 %v1700_v39  ;;  %2210 = vmatpush.bf16.msrb.mxu2 %v1701_v3 }
 0x353   :  { %2683 = vmatmul.msk.bf16.gmra.mxu0 %vm498_vm1, %v4604_v22 }
 0x354   :  { %2173 = vmatpush.bf16.msra.mxu1 %v1643_v33 }
 0x355   :  { %v1953_v7 = vpop.permute.xlu0 %1952 }
 0x356   :  { %v1960_v38 = vsel %vm1954_vm2, %v1951_v49, %v1953_v7  ;;  %v1636_v59 = vpop.permute.xlu2 %1635  ;;  %2685 = vmatmul.msk.bf16.gmra.mxu3 %vm498_vm1, %v4604_v22  ;;  %v1588_v49 = vpack.c.b16 %v1581_v25, %v1574_v26 }
 0x357   :  { %v1644_v0 = vsel %vm1639_vm10, %v1634_v16, %v1636_v59 }
 0x358   :  { %2174 = vmatpush.bf16.msra.mxu1 %v4426_v28  ;;  %2211 = vmatpush.bf16.msrb.mxu2 %v1644_v0 }
 0x35b   :  { %2175 = vmatmul.bf16.vlgmr.msra.gmra.mxu1 %v4575_v4 }
 0x35c   :  { %2243 = vmatpush.bf16.msrb.mxu1 %v1960_v38  ;;  %2212 = vmatpush.bf16.msrb.mxu2 %v4435_v21 }
 0x35d   :  { %v1839_v30 = vpop.permute.xlu0 %1838 }
 0x35e   :  { %v2008_v37 = vpop.permute.xlu2 %2007  ;;  %v1846_v51 = vsel %vm1840_vm4, %v1837_v18, %v1839_v30 }
 0x35f   :  { %v2016_v34 = vsel %vm2011_vm6, %v2006_v20, %v2008_v37  ;;  %2213 = vmatmul.bf16.vlgmr.msrb.gmra.mxu2 %v4575_v4 }
 0x360   :  { %2244 = vmatpush.bf16.msrb.mxu1 %v1903_v27  ;;  %2281 = vmatpush.bf16.msra.mxu2 %v1953_v7 }
 0x361   :  { %2231 = vmatpush.bf16.msra.mxu0 %v2016_v34 }
 0x364   :  { %2245 = vmatpush.bf16.msrb.mxu1 %v1846_v51  ;;  %2282 = vmatpush.bf16.msra.mxu2 %v1896_v60 }
 0x365   :  { %2686 = vmatmul.msk.bf16.vlgmr.msra.gmra.mxu0 %vm498_vm1, %v4558_v29 }
 0x366   :  { %v1782_v28 = vpop.permute.xlu2 %1781 }
 0x367   :  { %v1789_v21 = vsel %vm1783_vm5, %v1780_v17, %v1782_v28 }
 0x368   :  { %2283 = vmatpush.bf16.msra.mxu2 %v1839_v30  ;;  %2246 = vmatpush.bf16.msrb.mxu1 %v1789_v21 }
 0x36b   :  { %2180 = vmatmul.bf16.gmra.mxu1 %v4621_v62 }
 0x36c   :  { %2284 = vmatpush.bf16.msra.mxu2 %v1782_v28 }
 0x36f   :  { %2218 = vmatmul.bf16.gmra.mxu2 %v4621_v62 }
 0x372   :  { %v1638_v56 = vpop.permute.xlu2 %1637 }
 0x373   :  { %v1645_v57 = vsel %vm1639_vm10, %v1636_v59, %v1638_v56 }
 0x375   :  { %2687 = vmatmul.msk.bf16.gmra.mxu0 %vm498_vm1, %v4604_v22 }
 0x37e   :  { %v2081_v10 = vpop.f32.mrf.mxu2 }
 0x382   :  { %v1695_v35 = vpop.permute.xlu0 %1694 }
 0x383   :  { %v2062_v15 = vpop.f32.mrf.mxu0  ;;  %v1702_v23 = vsel %vm1696_vm8, %v4657_v50, %v1695_v35 }
 0x384   :  { %v4704_v1 = vadd.f32 %v2081_v10, %v2062_v15 }
 0x386   :  { %v2083_v36 = vpop.f32.mrf.mxu2  ;;  %v2355_v10 = vmul.f32 %v4704_v1, %v4704_v1 }
 0x38b   :  { %v1752_v2 = vpop.permute.xlu1 %1751  ;;  %v2064_v54 = vpop.f32.mrf.mxu0 }
 0x38c   :  { %2285 = vmatpush.bf16.msra.mxu2 %v1752_v2  ;;  %v1759_v55 = vsel %vm1753_vm7, %v1750_v5, %v1752_v2  ;;  %v4709_v46 = vadd.f32 %v2083_v36, %v2064_v54 }
 0x38d   :  { %2247 = vmatpush.bf16.msrb.mxu1 %v1759_v55 }
 0x390   :  { %2286 = vmatpush.bf16.msra.mxu2 %v1695_v35 }
 0x391   :  { %2248 = vmatpush.bf16.msrb.mxu1 %v1702_v23 }
 0x392   :  { %v2086_v63 = vpop.f32.mrf.mxu2 }
 0x393   :  { %v2010_v48 = vpop.permute.xlu1 %2009  ;;  %v2067_v58 = vpop.f32.mrf.mxu0 }
 0x394   :  { %v2017_v41 = vsel %vm2011_vm6, %v2008_v37, %v2010_v48  ;;  %2287 = vmatpush.bf16.msra.mxu2 %v1638_v56  ;;  %2307 = vmatpush.bf16.msrb.mxu0 %v2010_v48  ;;  %v4715_v14 = vadd.f32 %v2086_v63, %v2067_v58 }
 0x395   :  { %2249 = vmatpush.bf16.msrb.mxu1 %v1645_v57  ;;  %2269 = vmatpush.bf16.msra.mxu3 %v2017_v41 }
 0x397   :  { %2690 = vmatmul.msk.bf16.vlgmr.msrb.gmra.mxu0 %vm498_vm1, %v4558_v29 }
 0x398   :  { %2688 = vmatmul.msk.bf16.vlgmr.msra.gmra.mxu3 %vm498_vm1, %v4558_v29  ;;  %2288 = vmatpush.bf16.msra.mxu2 %v1588_v49 }
 0x399   :  { %2250 = vmatpush.bf16.msrb.mxu1 %v4437_v52 }
 0x39a   :  { %v2088_v11 = vpop.f32.mrf.mxu2 }
 0x39b   :  { %2289 = vmatmul.bf16.vlgmr.msra.gmra.mxu2 %v4575_v4  ;;  %v2069_v50 = vpop.f32.mrf.mxu0 }
 0x39c   :  { %2251 = vmatmul.bf16.vlgmr.msrb.gmra.mxu1 %v4575_v4  ;;  %v4724_v24 = vadd.f32 %v2088_v11, %v2069_v50 }
 0x3a7   :  { %2691 = vmatmul.msk.bf16.gmra.mxu0 %vm498_vm1, %v4604_v22 }
 0x3a8   :  { %2689 = vmatmul.msk.bf16.gmra.mxu3 %vm498_vm1, %v4604_v22 }
 0x3a9   :  { %v2100_v8 = vpop.f32.mrf.mxu3 }
 0x3ab   :  { %2294 = vmatmul.bf16.gmra.mxu2 %v4621_v62 }
 0x3ac   :  { %2256 = vmatmul.bf16.gmra.mxu1 %v4621_v62 }
 0x3af   :  { %v2119_v29 = vpop.f32.mrf.mxu1 }
 0x3b0   :  { %v4746_v51 = vadd.f32 %v2119_v29, %v2100_v8 }
 0x3b1   :  { %v2102_v47 = vpop.f32.mrf.mxu3 }
 0x3b2   :  { %v2319_v28 = vadd.f32 %v4746_v51, %v4704_v1  ;;  %v2356_v40 = vmul.f32 %v4746_v51, %v4746_v51 }
 0x3b4   :  { %v2383_v6 = vadd.f32 %v2356_v40, %v2355_v10 }
 0x3b7   :  { %v2121_v31 = vpop.f32.mrf.mxu1 }
 0x3b8   :  { %v4765_v55 = vadd.f32 %v2121_v31, %v2102_v47 }
 0x3b9   :  { %v2105_v42 = vpop.f32.mrf.mxu3 }
 0x3ba   :  { %v2138_v18 = vpop.f32.mrf.mxu2  ;;  %v2328_v48 = vadd.f32 %v4765_v55, %v4709_v46 }
 0x3bf   :  { %v2124_v20 = vpop.f32.mrf.mxu1 }
 0x3c0   :  { %v2157_v52 = vpop.f32.mrf.mxu0  ;;  %v4784_v49 = vadd.f32 %v2124_v20, %v2105_v42 }
 0x3c1   :  { %v4738_v44 = vpop.f32.mrf.mxu3  ;;  %v4752_v21 = vadd.f32 %v2157_v52, %v2138_v18 }
 0x3c2   :  { %v2140_v9 = vpop.f32.mrf.mxu2 }
 0x3c3   :  { %v2320_v32 = vadd.f32 %v2319_v28, %v4752_v21  ;;  %v2357_v12 = vmul.f32 %v4752_v21, %v4752_v21 }
 0x3c5   :  { %v2384_v63 = vadd.f32 %v2383_v6, %v2357_v12 }
 0x3c7   :  { %v4734_v17 = vpop.f32.mrf.mxu1 }
 0x3c8   :  { %v2159_v4 = vpop.f32.mrf.mxu0  ;;  %v4814_v40 = vadd.f32 %v4734_v17, %v4738_v44 }
 0x3c9   :  { %v2195_v53 = vpop.f32.mrf.mxu3  ;;  %v4772_v23 = vadd.f32 %v2159_v4, %v2140_v9 }
 0x3ca   :  { %v2143_v5 = vpop.f32.mrf.mxu2 }
 0x3cb   :  { %v2329_v29 = vadd.f32 %v2328_v48, %v4772_v23 }
 0x3d0   :  { %v4732_v61 = vpop.f32.mrf.mxu0 }
 0x3d1   :  { %v2197_v7 = vpop.f32.mrf.mxu3 }
 0x3d2   :  { %v4740_v62 = vpop.f32.mrf.mxu2 }
 0x3d8   :  { %v4736_v22 = vpop.f32.mrf.mxu0  ;;  %v2176_v16 = vpop.f32.mrf.mxu1 }
 0x3d9   :  { %v2200_v60 = vpop.f32.mrf.mxu3  ;;  %v4756_v45 = vadd.f32 %v2195_v53, %v2176_v16  ;;  %v2337_v16 = vadd.f32 %v4784_v49, %v4715_v14  ;;  %v4803_v53 = vadd.f32 %v4732_v61, %v2143_v5  ;;  %v4827_v17 = vadd.f32 %v4736_v22, %v4740_v62 }
 0x3db   :  { %v2321_v36 = vadd.f32 %v2320_v32, %v4756_v45  ;;  %v2358_v58 = vmul.f32 %v4756_v45, %v4756_v45  ;;  %v2338_v5 = vadd.f32 %v2337_v16, %v4803_v53 }
 0x3dd   :  { %v2385_v9 = vadd.f32 %v2384_v63, %v2358_v58 }
 0x3e0   :  { %v2178_v33 = vpop.f32.mrf.mxu1 }
 0x3e1   :  { %v4748_v34 = vpop.f32.mrf.mxu3  ;;  %v4781_v41 = vadd.f32 %v2197_v7, %v2178_v33 }
 0x3e2   :  { %v2233_v13 = vpop.f32.mrf.mxu0  ;;  %v2214_v39 = vpop.f32.mrf.mxu2 }
 0x3e3   :  { %v4763_v2 = vadd.f32 %v2233_v13, %v2214_v39  ;;  %v2330_v20 = vadd.f32 %v2329_v29, %v4781_v41  ;;  %v2365_v63 = vmul.f32 %v4781_v41, %v4781_v41  ;;  %v2346_v29 = vadd.f32 %v4814_v40, %v4724_v24 }
 0x3e5   :  { %v2322_v56 = vadd.f32 %v2321_v36, %v4763_v2  ;;  %v2359_v52 = vmul.f32 %v4763_v2, %v4763_v2 }
 0x3e7   :  { %v2386_v33 = vadd.f32 %v2385_v9, %v2359_v52  ;;  %v2370_v52 = vmul.f32 %v4784_v49, %v4784_v49 }
 0x3e8   :  { %v2181_v0 = vpop.f32.mrf.mxu1 }
 0x3e9   :  { %v4809_v28 = vadd.f32 %v2200_v60, %v2181_v0  ;;  %v2362_v0 = vmul.f32 %v4709_v46, %v4709_v46  ;;  %v2363_v60 = vmul.f32 %v4765_v55, %v4765_v55 }
 0x3ea   :  { %v2235_v3 = vpop.f32.mrf.mxu0  ;;  %v2216_v38 = vpop.f32.mrf.mxu2 }
 0x3eb   :  { %v4791_v8 = vadd.f32 %v2235_v3, %v2216_v38  ;;  %v2339_v6 = vadd.f32 %v2338_v5, %v4809_v28  ;;  %v2392_v58 = vadd.f32 %v2363_v60, %v2362_v0 }
 0x3ed   :  { %v2331_v39 = vadd.f32 %v2330_v20, %v4791_v8  ;;  %v2366_v9 = vmul.f32 %v4791_v8, %v4791_v8 }
 0x3f0   :  { %v4744_v37 = vpop.f32.mrf.mxu1 }
 0x3f1   :  { %v4840_v22 = vadd.f32 %v4748_v34, %v4744_v37 }
 0x3f2   :  { %v2238_v59 = vpop.f32.mrf.mxu0  ;;  %v2219_v27 = vpop.f32.mrf.mxu2 }
 0x3f3   :  { %v4819_v32 = vadd.f32 %v2238_v59, %v2219_v27  ;;  %v2376_v27 = vmul.f32 %v4724_v24, %v4724_v24  ;;  %v2379_v20 = vmul.f32 %v4840_v22, %v4840_v22 }
 0x3f5   :  { %v2340_v62 = vadd.f32 %v2339_v6, %v4819_v32 }
 0x3fa   :  { %v4742_v30 = vpop.f32.mrf.mxu0  ;;  %v4754_v43 = vpop.f32.mrf.mxu2 }
 0x3fb   :  { %v4855_v37 = vadd.f32 %v4742_v30, %v4754_v43 }
 0x414   :  { %v2309_v15 = vpop.f32.mrf.mxu0 }
 0x419   :  { %v2252_v19 = vpop.f32.mrf.mxu1 }
 0x41b   :  { %v2271_v54 = vpop.f32.mrf.mxu3 }
 0x41c   :  { %v4768_v35 = vadd.f32 %v2271_v54, %v2252_v19  ;;  %v2311_v31 = vpop.f32.mrf.mxu0 }
 0x41e   :  { %v2290_v26 = vpop.f32.mrf.mxu2  ;;  %v2323_v57 = vadd.f32 %v2322_v56, %v4768_v35  ;;  %v2360_v42 = vmul.f32 %v4768_v35, %v4768_v35  ;;  %v2364_v56 = vmul.f32 %v4772_v23, %v4772_v23 }
 0x41f   :  { %v4775_v25 = vadd.f32 %v2309_v15, %v2290_v26  ;;  %v2377_v26 = vmul.f32 %v4814_v40, %v4814_v40 }
 0x420   :  { %v2387_v15 = vadd.f32 %v2386_v33, %v2360_v42 }
 0x421   :  { %v2254_v50 = vpop.f32.mrf.mxu1  ;;  %v2324_v11 = vsel %vm498_vm1, %v4775_v25, 0.0  ;;  %v2361_v47 = vmul.f32 %v4775_v25, %v4775_v25 }
 0x422   :  { %v2325_v18 = vadd.f32 %v2324_v11, %v2323_v57  ;;  %v2378_v57 = vmul.f32 %v4827_v17, %v4827_v17  ;;  %v2369_v11 = vmul.f32 %v4715_v14, %v4715_v14 }
 0x423   :  { %v2273_v4 = vpop.f32.mrf.mxu3  ;;  %v2388_v38 = vsel %vm498_vm1, %v2361_v47, 0.0  ;;  %v2347_v47 = vadd.f32 %v2346_v29, %v4827_v17 }
 0x424   :  { %v4798_v13 = vadd.f32 %v2273_v4, %v2254_v50  ;;  %2326 = vadd.xlane.f32.xlu0 %v2325_v18  ;;  %v2389_v54 = vadd.f32 %v2388_v38, %v2387_v15  ;;  %v2314_v59 = vpop.f32.mrf.mxu0  ;;  %v2393_v18 = vadd.f32 %v2392_v58, %v2364_v56  ;;  %v2380_v38 = vmul.f32 %v4855_v37, %v4855_v37 }
 0x425   :  { %v2348_v33 = vadd.f32 %v2347_v47, %v4840_v22 }
 0x426   :  { %v2292_v3 = vpop.f32.mrf.mxu2  ;;  %v2332_v10 = vadd.f32 %v2331_v39, %v4798_v13  ;;  %v2394_v42 = vadd.f32 %v2393_v18, %v2365_v63  ;;  %v2367_v15 = vmul.f32 %v4798_v13, %v4798_v13  ;;  %v2373_v63 = vmul.f32 %v4819_v32, %v4819_v32 }
 0x427   :  { %v4806_v7 = vadd.f32 %v2311_v31, %v2292_v3  ;;  %v2410_v31 = vadd.f32 %v2377_v26, %v2376_v27  ;;  %v2372_v27 = vmul.f32 %v4809_v28, %v4809_v28 }
 0x429   :  { %v2257_v19 = vpop.f32.mrf.mxu1  ;;  %v2333_v61 = vsel %vm498_vm1, %v4806_v7, 0.0  ;;  %v2411_v43 = vadd.f32 %v2410_v31, %v2378_v57  ;;  %v2368_v3 = vmul.f32 %v4806_v7, %v4806_v7 }
 0x42a   :  { %v2334_v36 = vadd.f32 %v2333_v61, %v2332_v10  ;;  %v2371_v61 = vmul.f32 %v4803_v53, %v4803_v53 }
 0x42b   :  { %v2276_v44 = vpop.f32.mrf.mxu3  ;;  %v2412_v5 = vadd.f32 %v2411_v43, %v2379_v20 }
 0x42c   :  { %v4830_v12 = vadd.f32 %v2276_v44, %v2257_v19  ;;  %2390 = vadd.xlane.f32.xlu0 %v2389_v54  ;;  %2335 = vadd.xlane.f32.xlu2 %v2334_v36  ;;  %v2401_v19 = vadd.f32 %v2370_v52, %v2369_v11  ;;  %v2349_v54 = vadd.f32 %v2348_v33, %v4855_v37  ;;  %v2316_v60 = vpop.f32.mrf.mxu0 }
 0x42d   :  { %v2395_v44 = vadd.f32 %v2394_v42, %v2366_v9  ;;  %v2563_v42 = vld [vmem:[%s5089_s6] sm:$0xff] }
 0x42e   :  { %v2295_v48 = vpop.f32.mrf.mxu2  ;;  %v2341_v34 = vadd.f32 %v2340_v62, %v4830_v12  ;;  %v2413_v62 = vadd.f32 %v2412_v5, %v2380_v38 }
 0x42f   :  { %v4847_v50 = vadd.f32 %v2314_v59, %v2295_v48  ;;  %v2397_v59 = vsel %vm498_vm1, %v2368_v3, 0.0  ;;  %v2396_v56 = vadd.f32 %v2395_v44, %v2367_v15  ;;  %v2402_v48 = vadd.f32 %v2401_v19, %v2371_v61 }
 0x431   :  { %v2342_v4 = vsel %vm498_vm1, %v4847_v50, 0.0  ;;  %v2259_v16 = vpop.f32.mrf.mxu1  ;;  %v2398_v11 = vadd.f32 %v2397_v59, %v2396_v56  ;;  %v2375_v18 = vmul.f32 %v4847_v50, %v4847_v50  ;;  %v2403_v31 = vadd.f32 %v2402_v48, %v2372_v27 }
 0x432   :  { %v2343_v30 = vadd.f32 %v2342_v4, %v2341_v34  ;;  %v2374_v4 = vmul.f32 %v4830_v12, %v4830_v12 }
 0x433   :  { %v2278_v39 = vpop.f32.mrf.mxu3  ;;  %v2404_v9 = vadd.f32 %v2403_v31, %v2373_v63  ;;  %v2406_v20 = vsel %vm498_vm1, %v2375_v18, 0.0  ;;  %v2479_v31 = vld [vmem:[%s5090_s5] sm:$0xff] }
 0x434   :  { %v4874_v10 = vadd.f32 %v2278_v39, %v2259_v16  ;;  %2344 = vadd.xlane.f32.xlu1 %v2343_v30 }
 0x435   :  { %v2405_v30 = vadd.f32 %v2404_v9, %v2374_v4 }
 0x436   :  { %v2381_v36 = vmul.f32 %v4874_v10, %v4874_v10  ;;  %v2297_v0 = vpop.f32.mrf.mxu2  ;;  %v2350_v26 = vadd.f32 %v2349_v54, %v4874_v10 }
 0x437   :  { %v4881_v6 = vadd.f32 %v2316_v60, %v2297_v0  ;;  %v2407_v43 = vadd.f32 %v2406_v20, %v2405_v30 }
 0x438   :  { %v2414_v34 = vadd.f32 %v2413_v62, %v2381_v36 }
 0x439   :  { %v2351_v58 = vsel %vm498_vm1, %v4881_v6, 0.0  ;;  %v2382_v57 = vmul.f32 %v4881_v6, %v4881_v6 }
 0x43a   :  { %v2352_v29 = vadd.f32 %v2351_v58, %v2350_v26 }
 0x43b   :  { %v2415_v52 = vsel %vm498_vm1, %v2382_v57, 0.0 }
 0x43c   :  { %2399 = vadd.xlane.f32.xlu1 %v2398_v11  ;;  %2353 = vadd.xlane.f32.xlu2 %v2352_v29  ;;  %v2416_v47 = vadd.f32 %v2415_v52, %v2414_v34 }
 0x43e   :  { %2417 = vadd.xlane.f32.xlu0 %v2416_v47 }
 0x444   :  { %2408 = vadd.xlane.f32.xlu2 %v2407_v43 }
 0x452   :  { %2569 = vperm.xlu0 %2715, %v2563_v42  }
 0x497   :  { %v2327_v16 = vpop.xlane.xlu0 %2326 }
 0x498   :  { %v4902_v39 = vmul.f32 0.0012755102, %v2327_v16 }
 0x49a   :  { %v2427_v33 = vmul.f32 %v4902_v39, %v4902_v39 }
 0x49f   :  { %v2391_v3 = vpop.xlane.xlu0 %2390  ;;  %v2336_v61 = vpop.xlane.xlu2 %2335 }
 0x4a0   :  { %v2423_v38 = vmul.f32 0.0012755102, %v2391_v3  ;;  %v4906_v36 = vmul.f32 0.0012755102, %v2336_v61 }
 0x4a2   :  { %v2431_v15 = vsub.f32 %v2423_v38, %v2427_v33  ;;  %v2428_v27 = vmul.f32 %v4906_v36, %v4906_v36 }
 0x4a4   :  { %v2435_v19 = vadd.f32 0.001, %v2431_v15 }
 0x4a6   :  { %2827 = vrsqrt.f32 %v2435_v19  ;;  %vm2445_vm11 = vweird.f32 %v2435_v19 }
 0x4a7   :  { %v2345_v5 = vpop.xlane.xlu1 %2344 }
 0x4a8   :  { %v4914_v29 = vmul.f32 0.0012755102, %v2345_v5 }
 0x4aa   :  { %v2429_v20 = vmul.f32 %v4914_v29, %v4914_v29 }
 0x4ac   :  { %v2828_v54 = vpop.eup %2827 }
 0x4ad   :  { %v2440_v0 = vmul.f32 %v2828_v54, %v2435_v19  ;;  %vm2446_vm9 = vweird.f32 %v2828_v54 }
 0x4ae   :  { %vm2447_vm12 = vmor %vm2445_vm11, %vm2446_vm9 }
 0x4af   :  { %v2441_v60 = vmul.f32 %v2828_v54, %v2440_v0  ;;  %v2400_v44 = vpop.xlane.xlu1 %2399  ;;  %v2354_v59 = vpop.xlane.xlu2 %2353 }
 0x4b0   :  { %v2424_v56 = vmul.f32 0.0012755102, %v2400_v44  ;;  %v4910_v26 = vmul.f32 0.0012755102, %v2354_v59 }
 0x4b1   :  { %v2442_v62 = vmul.f32 0.5, %v2441_v60  ;;  %v2418_v48 = vpop.xlane.xlu0 %2417 }
 0x4b2   :  { %v2432_v58 = vsub.f32 %v2424_v56, %v2428_v27  ;;  %v2426_v57 = vmul.f32 0.0012755102, %v2418_v48  ;;  %v2430_v63 = vmul.f32 %v4910_v26, %v4910_v26  ;;  %v2480_v56 = vld [vmem:[%s5090_s5 + $0x8] sm:$0xff] }
 0x4b3   :  { %v2443_v11 = vsub.f32 1.5, %v2442_v62 }
 0x4b4   :  { %v2436_v34 = vadd.f32 0.001, %v2432_v58  ;;  %v2434_v52 = vsub.f32 %v2426_v57, %v2430_v63  ;;  %v2482_v57 = vld [vmem:[%s5090_s5 + $0x18] sm:$0xff] }
 0x4b5   :  { %v2444_v18 = vmul.f32 %v2828_v54, %v2443_v11 }
 0x4b6   :  { %2829 = vrsqrt.f32 %v2436_v34  ;;  %v2438_v4 = vadd.f32 0.001, %v2434_v52  ;;  %vm2455_vm14 = vweird.f32 %v2436_v34 }
 0x4b7   :  { %v2409_v47 = vpop.xlane.xlu2 %2408  ;;  %v2448_v9 = vsel %vm2447_vm12, %v2828_v54, %v2444_v18 }
 0x4b8   :  { %2831 = vrsqrt.f32 %v2438_v4  ;;  %v2425_v30 = vmul.f32 0.0012755102, %v2409_v47  ;;  %v2483_v43 = vmul.f32 %v2479_v31, %v2448_v9  ;;  %vm2475_vm2 = vweird.f32 %v2438_v4  ;;  %v2564_v47 = vld [vmem:[%s5089_s6 + $0x8] sm:$0xff] }
 0x4ba   :  { %v2433_v42 = vsub.f32 %v2425_v30, %v2429_v20  ;;  %2517 = vperm.xlu1 %2716, %v2483_v43   ;;  %v2565_v30 = vld [vmem:[%s5089_s6 + $0x10] sm:$0xff]  ;;  %v2566_v43 = vld [vmem:[%s5089_s6 + $0x18] sm:$0xff] }
 0x4bc   :  { %v2830_v16 = vpop.eup %2829  ;;  %v2437_v3 = vadd.f32 0.001, %v2433_v42 }
 0x4bd   :  { %v2450_v33 = vmul.f32 %v2830_v16, %v2436_v34  ;;  %vm2456_vm13 = vweird.f32 %v2830_v16 }
 0x4be   :  { %v2832_v38 = vpop.eup %2831  ;;  %2833 = vrsqrt.f32 %v2437_v3  ;;  %vm2457_vm0 = vmor %vm2455_vm14, %vm2456_vm13  ;;  %vm2465_vm5 = vweird.f32 %v2437_v3 }
 0x4bf   :  { %v2451_v15 = vmul.f32 %v2830_v16, %v2450_v33  ;;  %v2470_v19 = vmul.f32 %v2832_v38, %v2438_v4  ;;  %vm2476_vm15 = vweird.f32 %v2832_v38  ;;  %v2481_v4 = vld [vmem:[%s5090_s5 + $0x10] sm:$0xff]  ;;  %v2488_v33 = vsub.f32 %v4746_v51, %v4902_v39 }
 0x4c0   :  { %vm2477_vm3 = vmor %vm2475_vm2, %vm2476_vm15 }
 0x4c1   :  { %v2452_v61 = vmul.f32 0.5, %v2451_v15  ;;  %v2471_v5 = vmul.f32 %v2832_v38, %v2470_v19  ;;  %v2490_v15 = vsub.f32 %v4756_v45, %v4902_v39  ;;  %v2491_v19 = vsub.f32 %v4763_v2, %v4902_v39 }
 0x4c3   :  { %v2453_v0 = vsub.f32 1.5, %v2452_v61  ;;  %v2472_v60 = vmul.f32 0.5, %v2471_v5  ;;  %v2492_v61 = vsub.f32 %v4768_v35, %v4902_v39  ;;  %v2495_v35 = vsub.f32 %v4765_v55, %v4906_v36 }
 0x4c4   :  { %v2834_v54 = vpop.eup %2833  ;;  %v2497_v55 = vsub.f32 %v4781_v41, %v4906_v36  ;;  %v2500_v41 = vsub.f32 %v4806_v7, %v4906_v36 }
 0x4c5   :  { %v2473_v44 = vsub.f32 1.5, %v2472_v60  ;;  %v2460_v59 = vmul.f32 %v2834_v54, %v2437_v3  ;;  %v2454_v27 = vmul.f32 %v2830_v16, %v2453_v0  ;;  %vm2466_vm4 = vweird.f32 %v2834_v54 }
 0x4c6   :  { %vm2467_vm6 = vmor %vm2465_vm5, %vm2466_vm4  ;;  %v2487_v3 = vsub.f32 %v4704_v1, %v4902_v39 }
 0x4c7   :  { %v2461_v62 = vmul.f32 %v2834_v54, %v2460_v59  ;;  %v2458_v48 = vsel %vm2457_vm0, %v2830_v16, %v2454_v27  ;;  %v2474_v58 = vmul.f32 %v2832_v38, %v2473_v44  ;;  %v2494_v16 = vsub.f32 %v4709_v46, %v4906_v36 }
 0x4c8   :  { %v2484_v63 = vmul.f32 %v2480_v56, %v2458_v48  ;;  %v2493_v46 = vsub.f32 %v4775_v25, %v4902_v39 }
 0x4c9   :  { %v2462_v11 = vmul.f32 0.5, %v2461_v62  ;;  %v2478_v34 = vsel %vm2477_vm3, %v2832_v38, %v2474_v58  ;;  %v2489_v38 = vsub.f32 %v4752_v21, %v4902_v39  ;;  %v2570_v21 = vpop.permute.xlu0 %2569  ;;  %v2496_v39 = vsub.f32 %v4772_v23, %v4906_v36 }
 0x4ca   :  { %2522 = vperm.xlu2 %2797, %v2484_v63   ;;  %v2486_v52 = vmul.f32 %v2482_v57, %v2478_v34  ;;  %v2498_v34 = vsub.f32 %v4791_v8, %v4906_v36  ;;  %v2499_v23 = vsub.f32 %v4798_v13, %v4906_v36 }
 0x4cb   :  { %v2463_v18 = vsub.f32 1.5, %v2462_v11 }
 0x4cc   :  { %2532 = vperm.xlu1 %2716, %v2486_v52  }
 0x4cd   :  { %v2464_v31 = vmul.f32 %v2834_v54, %v2463_v18 }
 0x4cf   :  { %v2468_v9 = vsel %vm2467_vm6, %v2834_v54, %v2464_v31 }
 0x4d0   :  { %v2485_v20 = vmul.f32 %v2481_v4, %v2468_v9 }
 0x4d2   :  { %2574 = vperm.xlu2 %2797, %v2564_v47   ;;  %2527 = vperm.xlu0 %2715, %v2485_v20  }
 0x4d4   :  { %2579 = vperm.xlu1 %2716, %v2565_v30  }
 0x4da   :  { %2584 = vperm.xlu0 %2715, %v2566_v43   ;;  %v2501_v43 = vsub.f32 %v4715_v14, %v4914_v29 }
 0x524   :  { %v2523_v42 = vpop.permute.xlu2 %2522 }
 0x525   :  { %v2542_v1 = vmul.f32 %v2523_v42, %v2494_v16  ;;  %v2543_v63 = vmul.f32 %v2523_v42, %v2495_v35  ;;  %v2544_v52 = vmul.f32 %v2523_v42, %v2496_v39  ;;  %v2545_v18 = vmul.f32 %v2523_v42, %v2497_v55 }
 0x526   :  { %v2546_v4 = vmul.f32 %v2523_v42, %v2498_v34  ;;  %v2547_v8 = vmul.f32 %v2523_v42, %v2499_v23  ;;  %v2548_v13 = vmul.f32 %v2523_v42, %v2500_v41  ;;  %v2502_v42 = vsub.f32 %v4784_v49, %v4914_v29 }
 0x527   :  { %v2503_v16 = vsub.f32 %v4803_v53, %v4914_v29 }
 0x52c   :  { %v2518_v5 = vpop.permute.xlu1 %2517  ;;  %v2575_v0 = vpop.permute.xlu2 %2574 }
 0x52d   :  { %v2535_v60 = vmul.f32 %v2518_v5, %v2487_v3  ;;  %v2536_v51 = vmul.f32 %v2518_v5, %v2488_v33  ;;  %v2537_v54 = vmul.f32 %v2518_v5, %v2489_v38  ;;  %v2538_v44 = vmul.f32 %v2518_v5, %v2490_v15 }
 0x52e   :  { %v2539_v59 = vmul.f32 %v2518_v5, %v2491_v19  ;;  %v2540_v27 = vmul.f32 %v2518_v5, %v2492_v61  ;;  %v2594_v45 = vadd.f32 %v2575_v0, %v2542_v1  ;;  %v2541_v56 = vmul.f32 %v2518_v5, %v2493_v46 }
 0x52f   :  { %v2587_v62 = vadd.f32 %v2570_v21, %v2535_v60  ;;  %v2588_v2 = vadd.f32 %v2570_v21, %v2536_v51  ;;  %v2589_v48 = vadd.f32 %v2570_v21, %v2537_v54  ;;  %v2590_v58 = vadd.f32 %v2570_v21, %v2538_v44 }
 0x530   :  { %2622 = vst [vmem:[%s5091_s8 + $0x38] sm:$0xff] %v2594_v45  ;;  %v2591_v25 = vadd.f32 %v2570_v21, %v2539_v59  ;;  %v2592_v57 = vadd.f32 %v2570_v21, %v2540_v27  ;;  %v2593_v11 = vadd.f32 %v2570_v21, %v2541_v56  ;;  %v2595_v31 = vadd.f32 %v2575_v0, %v2543_v63 }
 0x531   :  { %2615 = vst [vmem:[%s5091_s8] sm:$0xff] %v2587_v62  ;;  %v2596_v47 = vadd.f32 %v2575_v0, %v2544_v52  ;;  %v2597_v9 = vadd.f32 %v2575_v0, %v2545_v18  ;;  %v2598_v20 = vadd.f32 %v2575_v0, %v2546_v4  ;;  %v2599_v30 = vadd.f32 %v2575_v0, %v2547_v8 }
 0x532   :  { %2616 = vst [vmem:[%s5091_s8 + $0x8] sm:$0xff] %v2588_v2  ;;  %v2600_v7 = vadd.f32 %v2575_v0, %v2548_v13  ;;  %v2504_v3 = vsub.f32 %v4809_v28, %v4914_v29  ;;  %v2505_v38 = vsub.f32 %v4819_v32, %v4914_v29  ;;  %v2506_v15 = vsub.f32 %v4830_v12, %v4914_v29 }
 0x533   :  { %2617 = vst [vmem:[%s5091_s8 + $0x10] sm:$0xff] %v2589_v48  ;;  %v2507_v19 = vsub.f32 %v4847_v50, %v4914_v29  ;;  %v2508_v32 = vsub.f32 %v4724_v24, %v4910_v26  ;;  %v2509_v12 = vsub.f32 %v4814_v40, %v4910_v26  ;;  %v2510_v29 = vsub.f32 %v4827_v17, %v4910_v26 }
 0x534   :  { %2618 = vst [vmem:[%s5091_s8 + $0x18] sm:$0xff] %v2590_v58  ;;  %v2511_v59 = vsub.f32 %v4840_v22, %v4910_v26  ;;  %v2512_v40 = vsub.f32 %v4855_v37, %v4910_v26  ;;  %v2513_v17 = vsub.f32 %v4874_v10, %v4910_v26  ;;  %v2514_v48 = vsub.f32 %v4881_v6, %v4910_v26 }
 0x535   :  { %2619 = vst [vmem:[%s5091_s8 + $0x20] sm:$0xff] %v2591_v25 }
 0x536   :  { %2620 = vst [vmem:[%s5091_s8 + $0x28] sm:$0xff] %v2592_v57 }
 0x537   :  { %2621 = vst.msk [vmem:[%s5091_s8 + $0x30] sm:$0xff] %vm498_vm1, %v2593_v11 }
 0x538   :  { %2623 = vst [vmem:[%s5091_s8 + $0x40] sm:$0xff] %v2595_v31 }
 0x539   :  { %2624 = vst [vmem:[%s5091_s8 + $0x48] sm:$0xff] %v2596_v47 }
 0x53a   :  { %2625 = vst [vmem:[%s5091_s8 + $0x50] sm:$0xff] %v2597_v9 }
 0x53b   :  { %2626 = vst [vmem:[%s5091_s8 + $0x58] sm:$0xff] %v2598_v20 }
 0x53c   :  { %2627 = vst [vmem:[%s5091_s8 + $0x60] sm:$0xff] %v2599_v30 }
 0x53d   :  { %2628 = vst.msk [vmem:[%s5091_s8 + $0x68] sm:$0xff] %vm498_vm1, %v2600_v7 }
 0x53e   :  { %v2533_v36 = vpop.permute.xlu1 %2532 }
 0x53f   :  { %v2556_v24 = vmul.f32 %v2533_v36, %v2508_v32  ;;  %v2557_v27 = vmul.f32 %v2533_v36, %v2509_v12  ;;  %v2558_v45 = vmul.f32 %v2533_v36, %v2510_v29  ;;  %v2559_v62 = vmul.f32 %v2533_v36, %v2511_v59 }
 0x540   :  { %v2560_v37 = vmul.f32 %v2533_v36, %v2512_v40  ;;  %v2561_v35 = vmul.f32 %v2533_v36, %v2513_v17  ;;  %v2562_v10 = vmul.f32 %v2533_v36, %v2514_v48 }
 0x544   :  { %v2528_v33 = vpop.permute.xlu0 %2527 }
 0x545   :  { %v2549_v14 = vmul.f32 %v2528_v33, %v2501_v43  ;;  %v2550_v61 = vmul.f32 %v2528_v33, %v2502_v42  ;;  %v2551_v46 = vmul.f32 %v2528_v33, %v2503_v16  ;;  %v2552_v49 = vmul.f32 %v2528_v33, %v2504_v3 }
 0x546   :  { %v2580_v5 = vpop.permute.xlu1 %2579  ;;  %v2553_v1 = vmul.f32 %v2528_v33, %v2505_v38  ;;  %v2554_v53 = vmul.f32 %v2528_v33, %v2506_v15  ;;  %v2555_v0 = vmul.f32 %v2528_v33, %v2507_v19 }
 0x547   :  { %v2601_v60 = vadd.f32 %v2580_v5, %v2549_v14  ;;  %v2602_v28 = vadd.f32 %v2580_v5, %v2550_v61  ;;  %v2603_v51 = vadd.f32 %v2580_v5, %v2551_v46  ;;  %v2604_v54 = vadd.f32 %v2580_v5, %v2552_v49 }
 0x548   :  { %v2605_v44 = vadd.f32 %v2580_v5, %v2553_v1  ;;  %v2606_v50 = vadd.f32 %v2580_v5, %v2554_v53  ;;  %v2607_v21 = vadd.f32 %v2580_v5, %v2555_v0 }
 0x549   :  { %2629 = vst [vmem:[%s5091_s8 + $0x70] sm:$0xff] %v2601_v60 }
 0x54a   :  { %2630 = vst [vmem:[%s5091_s8 + $0x78] sm:$0xff] %v2602_v28 }
 0x54b   :  { %2631 = vst [vmem:[%s5091_s8 + $0x80] sm:$0xff] %v2603_v51 }
 0x54c   :  { %2632 = vst [vmem:[%s5091_s8 + $0x88] sm:$0xff] %v2604_v54  ;;  %v2585_v56 = vpop.permute.xlu0 %2584 }
 0x54d   :  { %2633 = vst [vmem:[%s5091_s8 + $0x90] sm:$0xff] %v2605_v44  ;;  %v2608_v22 = vadd.f32 %v2585_v56, %v2556_v24  ;;  %v2609_v2 = vadd.f32 %v2585_v56, %v2557_v27  ;;  %v2610_v58 = vadd.f32 %v2585_v56, %v2558_v45  ;;  %v2611_v25 = vadd.f32 %v2585_v56, %v2559_v62 }
 0x54e   :  { %2634 = vst [vmem:[%s5091_s8 + $0x98] sm:$0xff] %v2606_v50  ;;  %v2612_v39 = vadd.f32 %v2585_v56, %v2560_v37  ;;  %v2613_v57 = vadd.f32 %v2585_v56, %v2561_v35  ;;  %v2614_v6 = vadd.f32 %v2585_v56, %v2562_v10 }
 0x54f   :  { %2635 = vst.msk [vmem:[%s5091_s8 + $0xa0] sm:$0xff] %vm498_vm1, %v2607_v21 }
 0x550   :  { %2636 = vst [vmem:[%s5091_s8 + $0xa8] sm:$0xff] %v2608_v22 }
 0x551   :  { %2637 = vst [vmem:[%s5091_s8 + $0xb0] sm:$0xff] %v2609_v2 }
 0x552   :  { %2638 = vst [vmem:[%s5091_s8 + $0xb8] sm:$0xff] %v2610_v58 }
 0x553   :  { %2639 = vst [vmem:[%s5091_s8 + $0xc0] sm:$0xff] %v2611_v25 }
 0x554   :  { %2640 = vst [vmem:[%s5091_s8 + $0xc8] sm:$0xff] %v2612_v39 }
 0x555   :  { %2641 = vst [vmem:[%s5091_s8 + $0xd0] sm:$0xff] %v2613_v57 }
 0x556   :  { %2642 = vst.msk [vmem:[%s5091_s8 + $0xd8] sm:$0xff] %vm498_vm1, %v2614_v6 }

</bundles_post_ra>
